<compile_context>
chip_gen: v5e
topology: v5e:2x2
jax: 0.10.0
libtpu: 0.0.40
codegen_flags: <defaults>
</compile_context>

<pallas_src>
import functools

import jax
import jax.numpy as jnp
from jax.experimental import pallas as pl
from jax.experimental.pallas import tpu as pltpu


def _round_up(x, m):
    return (x + m - 1) // m * m


def _pick_tile(n, candidates):
    """Largest candidate <= n that divides n (fallback: full extent)."""
    for c in candidates:
        if c <= n and n % c == 0:
            return c
    return n


def _vmem_limit_bytes(est_bytes):
    """2x the static estimate + headroom, clamped to a sane ceiling."""
    return int(min(max(2 * est_bytes + (8 << 20), 32 << 20), 112 << 20))


# ----------------------------------------------------------------------------
# Fused LSTM stack kernel: nlayers x LSTM (bias=False), gate order [i, f, g, o].
# ----------------------------------------------------------------------------
def _make_lstm_kernel(nlayers, T, B_pad, H_pad):
    """Ref layout:
      inputs : emb (T*B_pad, I_pad) bf16, h0 (L,B_pad,H_pad) f32, c0 (same),
               [w_ih_t_l (Iin_pad,4H_pad) bf16, w_hh_t_l (H_pad,4H_pad) bf16]*L
      outputs: acts (T*B_pad,H_pad) bf16 (final layer activations, lane-dense),
               hT (L,B_pad,H_pad) f32, cT (L,B_pad,H_pad) f32
      scratch: gx (T*B_pad,4H_pad) f32  -- hoisted input projection
               x  (T*B_pad,H_pad)  f32  -- inter-layer activations (VMEM)
    """
    unroll = T if T <= 16 else 8   # cap unroll: serial dep chain, avoid spills

    def kernel(*refs):
        emb_ref, h0_ref, c0_ref = refs[0], refs[1], refs[2]
        w_refs = refs[3:3 + 2 * nlayers]
        acts_ref = refs[3 + 2 * nlayers]
        hT_ref = refs[4 + 2 * nlayers]
        cT_ref = refs[5 + 2 * nlayers]
        gx_ref = refs[6 + 2 * nlayers]
        x_ref = refs[7 + 2 * nlayers]

        for l in range(nlayers):
            wih = w_refs[2 * l][...]        # bf16 (I_in_pad, 4*H_pad)
            whh = w_refs[2 * l + 1][...]    # bf16 (H_pad,    4*H_pad)

            # ---- hoisted input projection: one big MXU matmul for all T ----
            x_in = emb_ref[...] if l == 0 else x_ref[...]
            gx_ref[...] = jnp.dot(x_in.astype(jnp.bfloat16), wih,
                                  preferred_element_type=jnp.float32)

            def step(t, carry, _whh=whh):
                h, c = carry
                off = pl.multiple_of(t * B_pad, B_pad)
                gx = gx_ref[pl.ds(off, B_pad), :]              # (B_pad, 4H_pad)
                # bf16 operands only at the matmul boundary; gates/elementwise f32.
                gates = gx + jnp.dot(h.astype(jnp.bfloat16), _whh,
                                     preferred_element_type=jnp.float32)
                # Gate slices at k*H_pad are whole-vreg (lane) aligned.
                i_g = jax.nn.sigmoid(gates[:, 0 * H_pad:1 * H_pad])
                f_g = jax.nn.sigmoid(gates[:, 1 * H_pad:2 * H_pad])
                g_g = jnp.tanh(gates[:, 2 * H_pad:3 * H_pad])
                o_g = jax.nn.sigmoid(gates[:, 3 * H_pad:4 * H_pad])
                c_new = f_g * c + i_g * g_g
                h_new = o_g * jnp.tanh(c_new)
                # Layer output overwrites slot t of the activation buffer
                # (read-before-write within the same step is safe).
                x_ref[pl.ds(off, B_pad), :] = h_new
                return (h_new, c_new)

            hT, cT = jax.lax.fori_loop(0, T, step, (h0_ref[l], c0_ref[l]),
                                       unroll=unroll)
            # Final-state writes once per layer (not every step).
            hT_ref[l] = hT
            cT_ref[l] = cT

        # Lane-/sublane-aligned whole-buffer cast for the decoder stage.
        acts_ref[...] = x_ref[...].astype(acts_ref.dtype)

    return kernel


# ----------------------------------------------------------------------------
# Tiled decoder kernel: (rows, H) @ (H, V) + bias, pipelined over rows x V.
# ----------------------------------------------------------------------------
def _decoder_kernel(x_ref, w_ref, b_ref, o_ref):
    o_ref[...] = (jnp.dot(x_ref[...], w_ref[...],
                          preferred_element_type=jnp.float32)
                  + b_ref[...]).astype(o_ref.dtype)


# ----------------------------------------------------------------------------
# One-time parameter prep: pad to (8,128)-friendly shapes, pre-transpose, bf16.
# ----------------------------------------------------------------------------
def prepare_params(raw, nlayers, ninp, nhid, ntoken):
    I_pad = _round_up(ninp, 128)
    H_pad = _round_up(nhid, 128)
    V_pad = _round_up(ntoken, 128)

    p = {}
    p["encoder_weight"] = jnp.pad(
        raw["encoder_weight"], ((0, 0), (0, I_pad - ninp))).astype(jnp.bfloat16)
    for l in range(nlayers):
        in_dim = ninp if l == 0 else nhid
        in_pad = I_pad if l == 0 else H_pad
        # Pad per-gate blocks (PyTorch layout [Wi; Wf; Wg; Wo]) so each gate's
        # H-slice sits at lane offset k*H_pad.  Zero padding (exact in bf16)
        # keeps padded hidden lanes exactly zero through the recurrence
        # (requires bias=False and zero-padded initial state).
        w_ih = raw[f"w_ih_l{l}"].reshape(4, nhid, in_dim)
        w_ih = jnp.pad(w_ih, ((0, 0), (0, H_pad - nhid), (0, in_pad - in_dim)))
        p[f"w_ih_t_l{l}"] = w_ih.reshape(4 * H_pad, in_pad).T.astype(jnp.bfloat16)
        w_hh = raw[f"w_hh_l{l}"].reshape(4, nhid, nhid)
        w_hh = jnp.pad(w_hh, ((0, 0), (0, H_pad - nhid), (0, H_pad - nhid)))
        p[f"w_hh_t_l{l}"] = w_hh.reshape(4 * H_pad, H_pad).T.astype(jnp.bfloat16)
    dec_w = jnp.pad(raw["decoder_weight"],
                    ((0, V_pad - ntoken), (0, H_pad - nhid)))
    p["decoder_w_t"] = dec_w.T.astype(jnp.bfloat16)               # (H_pad, V_pad)
    p["decoder_bias"] = jnp.pad(raw["decoder_bias"],
                                (0, V_pad - ntoken)).reshape(1, V_pad)
    return p


# ----------------------------------------------------------------------------
# Full model forward
# ----------------------------------------------------------------------------
@functools.partial(jax.jit, static_argnames=("nlayers", "nhid", "ntoken"))
def rnn_model_forward(tokens, h0, c0, prepped, nlayers, nhid, ntoken):
    """tokens:(T,B) int32, h0/c0:(nlayers,B,nhid). Returns decoded (T,B,ntoken),
    (hT, cT) each (nlayers,B,nhid)."""
    T, B = tokens.shape
    enc_w = prepped["encoder_weight"]
    I_pad = enc_w.shape[1]
    H_pad = prepped["w_hh_t_l0"].shape[0]
    V_pad = prepped["decoder_w_t"].shape[1]
    B_pad = _round_up(max(B, 8), 8)
    rows = T * B_pad

    # Embedding lookup (gather) — glue, plain JAX.  drop(emb) == identity (eval).
    # Padded batch rows gather token 0; they never mix with real rows and are
    # sliced out at the end, so no separate float pad copy is needed.
    tokens_p = jnp.pad(tokens, ((0, 0), (0, B_pad - B)))
    emb_flat = jnp.take(enc_w, tokens_p, axis=0).reshape(rows, I_pad)  # bf16

    h0_p = jnp.pad(h0, ((0, 0), (0, B_pad - B), (0, H_pad - nhid)))
    c0_p = jnp.pad(c0, ((0, 0), (0, B_pad - B), (0, H_pad - nhid)))

    weights = []
    for l in range(nlayers):
        weights += [prepped[f"w_ih_t_l{l}"], prepped[f"w_hh_t_l{l}"]]

    # ---------------- LSTM stack (single fused, gridless call) ----------------
    lstm_kernel = _make_lstm_kernel(nlayers, T, B_pad, H_pad)

    in_specs = [
        pl.BlockSpec(emb_flat.shape, lambda: (0, 0)),
        pl.BlockSpec(h0_p.shape, lambda: (0, 0, 0)),
        pl.BlockSpec(c0_p.shape, lambda: (0, 0, 0)),
    ]
    in_specs += [pl.BlockSpec(w.shape, lambda: (0, 0)) for w in weights]

    out_shape = (
        jax.ShapeDtypeStruct((rows, H_pad), jnp.bfloat16),          # acts
        jax.ShapeDtypeStruct((nlayers, B_pad, H_pad), jnp.float32),  # hT
        jax.ShapeDtypeStruct((nlayers, B_pad, H_pad), jnp.float32),  # cT
    )
    out_specs = (
        pl.BlockSpec((rows, H_pad), lambda: (0, 0)),
        pl.BlockSpec((nlayers, B_pad, H_pad), lambda: (0, 0, 0)),
        pl.BlockSpec((nlayers, B_pad, H_pad), lambda: (0, 0, 0)),
    )

    lstm_vmem_est = (
        rows * I_pad * 2                              # emb (bf16)
        + 2 * nlayers * B_pad * H_pad * 4             # h0, c0
        + sum(int(w.size) * 2 for w in weights)       # bf16 weights
        + rows * H_pad * 2                            # acts out (bf16)
        + 2 * nlayers * B_pad * H_pad * 4             # hT, cT
        + rows * 4 * H_pad * 4                        # gx scratch
        + rows * H_pad * 4                            # x scratch
    )

    acts, hT_pad, cT_pad = pl.pallas_call(
        lstm_kernel,
        out_shape=out_shape,
        in_specs=in_specs,
        out_specs=out_specs,
        scratch_shapes=[
            pltpu.VMEM((rows, 4 * H_pad), jnp.float32),   # hoisted x-projection
            pltpu.VMEM((rows, H_pad), jnp.float32),       # inter-layer acts
        ],
        # h0/c0 buffers are reused in place for hT/cT (same shape & dtype).
        input_output_aliases={1: 1, 2: 2},
        compiler_params=pltpu.CompilerParams(
            vmem_limit_bytes=_vmem_limit_bytes(lstm_vmem_est)),
    )(emb_flat, h0_p, c0_p, *weights)

    # ---------------- Decoder: tiled, pipelined, core-parallel ----------------
    tm = _pick_tile(rows, (512, 256, 128, 64, 32, 16, 8))
    tn = _pick_tile(V_pad, (512, 384, 256, 128))
    dec_vmem_est = 2 * (tm * H_pad * 2 + H_pad * tn * 2 + tn * 4 + tm * tn * 4)

    decoded_pad = pl.pallas_call(
        _decoder_kernel,
        out_shape=jax.ShapeDtypeStruct((rows, V_pad), jnp.float32),
        grid=(rows // tm, V_pad // tn),
        in_specs=[
            pl.BlockSpec((tm, H_pad), lambda i, j: (i, 0)),
            pl.BlockSpec((H_pad, tn), lambda i, j: (0, j)),
            pl.BlockSpec((1, tn), lambda i, j: (0, j)),
        ],
        out_specs=pl.BlockSpec((tm, tn), lambda i, j: (i, j)),
        compiler_params=pltpu.CompilerParams(
            dimension_semantics=("parallel", "parallel"),
            vmem_limit_bytes=_vmem_limit_bytes(dec_vmem_est)),
    )(acts, prepped["decoder_w_t"], prepped["decoder_bias"])

    decoded = decoded_pad.reshape(T, B_pad, V_pad)[:, :B, :ntoken]
    hidden = (hT_pad[:, :B, :nhid], cT_pad[:, :B, :nhid])
    return decoded, hidden


# ----------------------------------------------------------------------------
# Pure-JAX reference (for correctness checking; f32 weights)
# ----------------------------------------------------------------------------
def reference_forward(tokens, h0, c0, params, nlayers):
    emb = jnp.take(params["encoder_weight"], tokens, axis=0)
    x = emb
    hs, cs = [], []
    for l in range(nlayers):
        w_ih = params[f"w_ih_l{l}"]
        w_hh = params[f"w_hh_l{l}"]
        H = w_hh.shape[1]

        def step(carry, xt):
            h, c = carry
            gates = xt @ w_ih.T + h @ w_hh.T
            i = jax.nn.sigmoid(gates[:, 0 * H:1 * H])
            f = jax.nn.sigmoid(gates[:, 1 * H:2 * H])
            g = jnp.tanh(gates[:, 2 * H:3 * H])
            o = jax.nn.sigmoid(gates[:, 3 * H:4 * H])
            c_new = f * c + i * g
            h_new = o * jnp.tanh(c_new)
            return (h_new, c_new), h_new

        (hT, cT), y = jax.lax.scan(step, (h0[l], c0[l]), x)
        hs.append(hT)
        cs.append(cT)
        x = y
    T, B, H = x.shape
    dec = x.reshape(T * B, H) @ params["decoder_weight"].T + params["decoder_bias"]
    return dec.reshape(T, B, -1), (jnp.stack(hs, 0), jnp.stack(cs, 0))


# ----------------------------------------------------------------------------
# Main
# ----------------------------------------------------------------------------
if __name__ == "__main__":
    # Module hyperparameters (rnn_type='LSTM', bias=False).
    ntoken, ninp, nhid, nlayers = 50, 32, 32, 2
    T, B = 8, 2

    key = jax.random.PRNGKey(0)
    keys = jax.random.split(key, 3 + 2 * nlayers)

    initrange = 0.1
    params = {
        # nn.Embedding / nn.Linear init per init_weights(): uniform(-0.1, 0.1), bias=0
        "encoder_weight": jax.random.uniform(keys[0], (ntoken, ninp),
                                             minval=-initrange, maxval=initrange,
                                             dtype=jnp.float32),
        "decoder_weight": jax.random.uniform(keys[1], (ntoken, nhid),
                                             minval=-initrange, maxval=initrange,
                                             dtype=jnp.float32),
        "decoder_bias": jnp.zeros((ntoken,), jnp.float32),
    }
    # nn.LSTM default init: uniform(-1/sqrt(nhid), 1/sqrt(nhid)); bias=False.
    bound = 1.0 / jnp.sqrt(jnp.float32(nhid))
    for l in range(nlayers):
        in_dim = ninp if l == 0 else nhid
        params[f"w_ih_l{l}"] = jax.random.uniform(
            keys[3 + 2 * l], (4 * nhid, in_dim), minval=-bound, maxval=bound,
            dtype=jnp.float32)
        params[f"w_hh_l{l}"] = jax.random.uniform(
            keys[3 + 2 * l + 1], (4 * nhid, nhid), minval=-bound, maxval=bound,
            dtype=jnp.float32)

    tokens = jax.random.randint(keys[2], (T, B), 0, ntoken, dtype=jnp.int32)
    h0 = jnp.zeros((nlayers, B, nhid), jnp.float32)   # init_hidden()
    c0 = jnp.zeros((nlayers, B, nhid), jnp.float32)

    # One-time weight prep (pad + transpose + bf16 cast), outside the jitted fwd.
    prepped = prepare_params(params, nlayers, ninp, nhid, ntoken)

    decoded, (hT, cT) = rnn_model_forward(tokens, h0, c0, prepped,
                                          nlayers, nhid, ntoken)
    jax.block_until_ready(decoded)
    jax.block_until_ready(hT)
    jax.block_until_ready(cT)

    ref_dec, (ref_h, ref_c) = reference_forward(tokens, h0, c0, params, nlayers)
    assert decoded.shape == (T, B, ntoken)
    assert hT.shape == (nlayers, B, nhid) and cT.shape == (nlayers, B, nhid)
    # bf16 matmul operands (f32 accumulation) vs f32 reference -> relaxed tol.
    assert jnp.allclose(decoded, ref_dec, atol=2e-2, rtol=2e-2)
    assert jnp.allclose(hT, ref_h, atol=2e-2, rtol=2e-2)
    assert jnp.allclose(cT, ref_c, atol=2e-2, rtol=2e-2)

    print("KERNEL_OK")
</pallas_src>

<mosaic_0001>
module attributes {stable_mosaic.version = 11 : i64} {
  func.func @_decoder_kernel(%arg0: i32, %arg1: i32, %arg2: memref<64x128xbf16, #tpu.memory_space<vmem>>, %arg3: memref<128x128xbf16, #tpu.memory_space<vmem>>, %arg4: memref<1x128xf32, #tpu.memory_space<vmem>>, %arg5: memref<64x128xf32, #tpu.memory_space<vmem>>) attributes {dimension_semantics = [#tpu.dimension_semantics<parallel>, #tpu.dimension_semantics<parallel>], iteration_bounds = array<i64: 1, 1>, scalar_prefetch = 0 : i64, scratch_operands = 0 : i64, tpu.core_type = #tpu.core_type<tc>, window_params = [{transform_indices = @transform_0, window_bounds = array<i64: 64, 128>}, {transform_indices = @transform_1, window_bounds = array<i64: 128, 128>}, {transform_indices = @transform_2, window_bounds = array<i64: 1, 128>}, {transform_indices = @transform_3, window_bounds = array<i64: 64, 128>}]} {
    %c0 = arith.constant 0 : index
    %c0_0 = arith.constant 0 : index
    %0 = vector.load %arg2[%c0, %c0_0] : memref<64x128xbf16, #tpu.memory_space<vmem>>, vector<64x128xbf16>
    %c0_1 = arith.constant 0 : index
    %c0_2 = arith.constant 0 : index
    %1 = vector.load %arg3[%c0_1, %c0_2] : memref<128x128xbf16, #tpu.memory_space<vmem>>, vector<128x128xbf16>
    %cst = arith.constant dense<0.000000e+00> : vector<64x128xf32>
    %2 = tpu.matmul %0, %1, %cst {dimension_numbers = #tpu.dot_dimension_numbers<[1], [0], [0], [1], [0, 0, 1, 1], [], []>} : vector<64x128xbf16>, vector<128x128xbf16>, vector<64x128xf32> -> vector<64x128xf32>
    %c0_3 = arith.constant 0 : index
    %c0_4 = arith.constant 0 : index
    %3 = vector.load %arg4[%c0_3, %c0_4] : memref<1x128xf32, #tpu.memory_space<vmem>>, vector<1x128xf32>
    %4 = vector.broadcast %3 : vector<1x128xf32> to vector<64x128xf32>
    %5 = arith.addf %2, %4 : vector<64x128xf32>
    %c0_5 = arith.constant 0 : index
    %c0_6 = arith.constant 0 : index
    %6 = vector.load %arg5[%c0_5, %c0_6] : memref<64x128xf32, #tpu.memory_space<vmem>>, vector<64x128xf32>
    tpu.vector_store %arg5[%c0_5, %c0_6], %5 {strides = array<i32>} : memref<64x128xf32, #tpu.memory_space<vmem>>, vector<64x128xf32>,
    return
  }
  func.func @transform_0(%arg0: i32, %arg1: i32) -> (i32, i32) {
    %c0_i32 = arith.constant 0 : i32
    %c0_i32_0 = arith.constant 0 : i32
    return %arg0, %c0_i32 : i32, i32
  }
  func.func @transform_1(%arg0: i32, %arg1: i32) -> (i32, i32) {
    %c0_i32 = arith.constant 0 : i32
    %c0_i32_0 = arith.constant 0 : i32
    return %c0_i32, %arg1 : i32, i32
  }
  func.func @transform_2(%arg0: i32, %arg1: i32) -> (i32, i32) {
    %c0_i32 = arith.constant 0 : i32
    %c0_i32_0 = arith.constant 0 : i32
    return %c0_i32, %arg1 : i32, i32
  }
  func.func @transform_3(%arg0: i32, %arg1: i32) -> (i32, i32) {
    %c0_i32 = arith.constant 0 : i32
    return %arg0, %arg1 : i32, i32
  }
}

module attributes {stable_mosaic.version = 11 : i64} {
  func.func @kernel(%arg0: memref<64x128xbf16, #tpu.memory_space<vmem>>, %arg1: memref<2x8x128xf32, #tpu.memory_space<vmem>>, %arg2: memref<2x8x128xf32, #tpu.memory_space<vmem>>, %arg3: memref<128x512xbf16, #tpu.memory_space<vmem>>, %arg4: memref<128x512xbf16, #tpu.memory_space<vmem>>, %arg5: memref<128x512xbf16, #tpu.memory_space<vmem>>, %arg6: memref<128x512xbf16, #tpu.memory_space<vmem>>, %arg7: memref<64x128xbf16, #tpu.memory_space<vmem>>, %arg8: memref<2x8x128xf32, #tpu.memory_space<vmem>>, %arg9: memref<2x8x128xf32, #tpu.memory_space<vmem>>, %arg10: memref<64x512xf32, #tpu.memory_space<vmem>>, %arg11: memref<64x128xf32, #tpu.memory_space<vmem>>) attributes {dimension_semantics = [], scalar_prefetch = 0 : i64, scratch_operands = 2 : i64, tpu.core_type = #tpu.core_type<tc>} {
    %c0 = arith.constant 0 : index
    %c0_0 = arith.constant 0 : index
    %0 = vector.load %arg3[%c0, %c0_0] : memref<128x512xbf16, #tpu.memory_space<vmem>>, vector<128x512xbf16>
    %c0_1 = arith.constant 0 : index
    %c0_2 = arith.constant 0 : index
    %1 = vector.load %arg4[%c0_1, %c0_2] : memref<128x512xbf16, #tpu.memory_space<vmem>>, vector<128x512xbf16>
    %c0_3 = arith.constant 0 : index
    %c0_4 = arith.constant 0 : index
    %2 = vector.load %arg0[%c0_3, %c0_4] : memref<64x128xbf16, #tpu.memory_space<vmem>>, vector<64x128xbf16>
    %cst = arith.constant dense<0.000000e+00> : vector<64x512xf32>
    %3 = tpu.matmul %2, %0, %cst {dimension_numbers = #tpu.dot_dimension_numbers<[1], [0], [0], [1], [0, 0, 1, 1], [], []>} : vector<64x128xbf16>, vector<128x512xbf16>, vector<64x512xf32> -> vector<64x512xf32>
    %c0_5 = arith.constant 0 : index
    %c0_6 = arith.constant 0 : index
    %4 = vector.load %arg10[%c0_5, %c0_6] : memref<64x512xf32, #tpu.memory_space<vmem>>, vector<64x512xf32>
    tpu.vector_store %arg10[%c0_5, %c0_6], %3 {strides = array<i32>} : memref<64x512xf32, #tpu.memory_space<vmem>>, vector<64x512xf32>,
    %c0_7 = arith.constant 0 : index
    %c0_8 = arith.constant 0 : index
    %c0_9 = arith.constant 0 : index
    %5 = vector.load %arg1[%c0_7, %c0_8, %c0_9] : memref<2x8x128xf32, #tpu.memory_space<vmem>>, vector<1x8x128xf32>
    %6 = vector.shape_cast %5 : vector<1x8x128xf32> to vector<8x128xf32>
    %c0_10 = arith.constant 0 : index
    %c0_11 = arith.constant 0 : index
    %c0_12 = arith.constant 0 : index
    %7 = vector.load %arg2[%c0_10, %c0_11, %c0_12] : memref<2x8x128xf32, #tpu.memory_space<vmem>>, vector<1x8x128xf32>
    %8 = vector.shape_cast %7 : vector<1x8x128xf32> to vector<8x128xf32>
    %c0_i32 = arith.constant 0 : i32
    %c8_i32 = arith.constant 8 : i32
    %9 = arith.muli %c0_i32, %c8_i32 : i32
    %10 = tpu.assume_multiple %9, 8 : i32
    %11 = arith.index_cast %10 : i32 to index
    %c0_13 = arith.constant 0 : index
    %12 = vector.load %arg10[%11, %c0_13] : memref<64x512xf32, #tpu.memory_space<vmem>>, vector<8x512xf32>
    %13 = arith.truncf %6 : vector<8x128xf32> to vector<8x128xbf16>
    %cst_14 = arith.constant dense<0.000000e+00> : vector<8x512xf32>
    %14 = tpu.matmul %13, %1, %cst_14 {dimension_numbers = #tpu.dot_dimension_numbers<[1], [0], [0], [1], [0, 0, 1, 1], [], []>} : vector<8x128xbf16>, vector<128x512xbf16>, vector<8x512xf32> -> vector<8x512xf32>
    %15 = arith.addf %12, %14 : vector<8x512xf32>
    %16 = vector.extract_strided_slice %15 {offsets = [0, 0], sizes = [8, 128], strides = [1, 1]} : vector<8x512xf32> to vector<8x128xf32>
    %17 = arith.negf %16 : vector<8x128xf32>
    %18 = math.exp %17 : vector<8x128xf32>
    %cst_15 = arith.constant 1.000000e+00 : f32
    %19 = vector.broadcast %cst_15 : f32 to vector<8x128xf32>
    %20 = arith.addf %19, %18 : vector<8x128xf32>
    %21 = arith.divf %19, %20 : vector<8x128xf32>
    %22 = vector.extract_strided_slice %15 {offsets = [0, 128], sizes = [8, 128], strides = [1, 1]} : vector<8x512xf32> to vector<8x128xf32>
    %23 = arith.negf %22 : vector<8x128xf32>
    %24 = math.exp %23 : vector<8x128xf32>
    %cst_16 = arith.constant 1.000000e+00 : f32
    %25 = vector.broadcast %cst_16 : f32 to vector<8x128xf32>
    %26 = arith.addf %25, %24 : vector<8x128xf32>
    %27 = arith.divf %25, %26 : vector<8x128xf32>
    %28 = vector.extract_strided_slice %15 {offsets = [0, 256], sizes = [8, 128], strides = [1, 1]} : vector<8x512xf32> to vector<8x128xf32>
    %29 = math.tanh %28 : vector<8x128xf32>
    %30 = vector.extract_strided_slice %15 {offsets = [0, 384], sizes = [8, 128], strides = [1, 1]} : vector<8x512xf32> to vector<8x128xf32>
    %31 = arith.negf %30 : vector<8x128xf32>
    %32 = math.exp %31 : vector<8x128xf32>
    %cst_17 = arith.constant 1.000000e+00 : f32
    %33 = vector.broadcast %cst_17 : f32 to vector<8x128xf32>
    %34 = arith.addf %33, %32 : vector<8x128xf32>
    %35 = arith.divf %33, %34 : vector<8x128xf32>
    %36 = arith.mulf %27, %8 : vector<8x128xf32>
    %37 = arith.mulf %21, %29 : vector<8x128xf32>
    %38 = arith.addf %36, %37 : vector<8x128xf32>
    %39 = math.tanh %38 : vector<8x128xf32>
    %40 = arith.mulf %35, %39 : vector<8x128xf32>
    %41 = arith.index_cast %10 : i32 to index
    %c0_18 = arith.constant 0 : index
    %42 = vector.load %arg11[%41, %c0_18] : memref<64x128xf32, #tpu.memory_space<vmem>>, vector<8x128xf32>
    tpu.vector_store %arg11[%41, %c0_18], %40 {strides = array<i32>} : memref<64x128xf32, #tpu.memory_space<vmem>>, vector<8x128xf32>,
    %c1_i32 = arith.constant 1 : i32
    %c8_i32_19 = arith.constant 8 : i32
    %43 = arith.muli %c1_i32, %c8_i32_19 : i32
    %44 = tpu.assume_multiple %43, 8 : i32
    %45 = arith.index_cast %44 : i32 to index
    %c0_20 = arith.constant 0 : index
    %46 = vector.load %arg10[%45, %c0_20] : memref<64x512xf32, #tpu.memory_space<vmem>>, vector<8x512xf32>
    %47 = arith.truncf %40 : vector<8x128xf32> to vector<8x128xbf16>
    %cst_21 = arith.constant dense<0.000000e+00> : vector<8x512xf32>
    %48 = tpu.matmul %47, %1, %cst_21 {dimension_numbers = #tpu.dot_dimension_numbers<[1], [0], [0], [1], [0, 0, 1, 1], [], []>} : vector<8x128xbf16>, vector<128x512xbf16>, vector<8x512xf32> -> vector<8x512xf32>
    %49 = arith.addf %46, %48 : vector<8x512xf32>
    %50 = vector.extract_strided_slice %49 {offsets = [0, 0], sizes = [8, 128], strides = [1, 1]} : vector<8x512xf32> to vector<8x128xf32>
    %51 = arith.negf %50 : vector<8x128xf32>
    %52 = math.exp %51 : vector<8x128xf32>
    %cst_22 = arith.constant 1.000000e+00 : f32
    %53 = vector.broadcast %cst_22 : f32 to vector<8x128xf32>
    %54 = arith.addf %53, %52 : vector<8x128xf32>
    %55 = arith.divf %53, %54 : vector<8x128xf32>
    %56 = vector.extract_strided_slice %49 {offsets = [0, 128], sizes = [8, 128], strides = [1, 1]} : vector<8x512xf32> to vector<8x128xf32>
    %57 = arith.negf %56 : vector<8x128xf32>
    %58 = math.exp %57 : vector<8x128xf32>
    %cst_23 = arith.constant 1.000000e+00 : f32
    %59 = vector.broadcast %cst_23 : f32 to vector<8x128xf32>
    %60 = arith.addf %59, %58 : vector<8x128xf32>
    %61 = arith.divf %59, %60 : vector<8x128xf32>
    %62 = vector.extract_strided_slice %49 {offsets = [0, 256], sizes = [8, 128], strides = [1, 1]} : vector<8x512xf32> to vector<8x128xf32>
    %63 = math.tanh %62 : vector<8x128xf32>
    %64 = vector.extract_strided_slice %49 {offsets = [0, 384], sizes = [8, 128], strides = [1, 1]} : vector<8x512xf32> to vector<8x128xf32>
    %65 = arith.negf %64 : vector<8x128xf32>
    %66 = math.exp %65 : vector<8x128xf32>
    %cst_24 = arith.constant 1.000000e+00 : f32
    %67 = vector.broadcast %cst_24 : f32 to vector<8x128xf32>
    %68 = arith.addf %67, %66 : vector<8x128xf32>
    %69 = arith.divf %67, %68 : vector<8x128xf32>
    %70 = arith.mulf %61, %38 : vector<8x128xf32>
    %71 = arith.mulf %55, %63 : vector<8x128xf32>
    %72 = arith.addf %70, %71 : vector<8x128xf32>
    %73 = math.tanh %72 : vector<8x128xf32>
    %74 = arith.mulf %69, %73 : vector<8x128xf32>
    %75 = arith.index_cast %44 : i32 to index
    %c0_25 = arith.constant 0 : index
    %76 = vector.load %arg11[%75, %c0_25] : memref<64x128xf32, #tpu.memory_space<vmem>>, vector<8x128xf32>
    tpu.vector_store %arg11[%75, %c0_25], %74 {strides = array<i32>} : memref<64x128xf32, #tpu.memory_space<vmem>>, vector<8x128xf32>,
    %c2_i32 = arith.constant 2 : i32
    %c8_i32_26 = arith.constant 8 : i32
    %77 = arith.muli %c2_i32, %c8_i32_26 : i32
    %78 = tpu.assume_multiple %77, 8 : i32
    %79 = arith.index_cast %78 : i32 to index
    %c0_27 = arith.constant 0 : index
    %80 = vector.load %arg10[%79, %c0_27] : memref<64x512xf32, #tpu.memory_space<vmem>>, vector<8x512xf32>
    %81 = arith.truncf %74 : vector<8x128xf32> to vector<8x128xbf16>
    %cst_28 = arith.constant dense<0.000000e+00> : vector<8x512xf32>
    %82 = tpu.matmul %81, %1, %cst_28 {dimension_numbers = #tpu.dot_dimension_numbers<[1], [0], [0], [1], [0, 0, 1, 1], [], []>} : vector<8x128xbf16>, vector<128x512xbf16>, vector<8x512xf32> -> vector<8x512xf32>
    %83 = arith.addf %80, %82 : vector<8x512xf32>
    %84 = vector.extract_strided_slice %83 {offsets = [0, 0], sizes = [8, 128], strides = [1, 1]} : vector<8x512xf32> to vector<8x128xf32>
    %85 = arith.negf %84 : vector<8x128xf32>
    %86 = math.exp %85 : vector<8x128xf32>
    %cst_29 = arith.constant 1.000000e+00 : f32
    %87 = vector.broadcast %cst_29 : f32 to vector<8x128xf32>
    %88 = arith.addf %87, %86 : vector<8x128xf32>
    %89 = arith.divf %87, %88 : vector<8x128xf32>
    %90 = vector.extract_strided_slice %83 {offsets = [0, 128], sizes = [8, 128], strides = [1, 1]} : vector<8x512xf32> to vector<8x128xf32>
    %91 = arith.negf %90 : vector<8x128xf32>
    %92 = math.exp %91 : vector<8x128xf32>
    %cst_30 = arith.constant 1.000000e+00 : f32
    %93 = vector.broadcast %cst_30 : f32 to vector<8x128xf32>
    %94 = arith.addf %93, %92 : vector<8x128xf32>
    %95 = arith.divf %93, %94 : vector<8x128xf32>
    %96 = vector.extract_strided_slice %83 {offsets = [0, 256], sizes = [8, 128], strides = [1, 1]} : vector<8x512xf32> to vector<8x128xf32>
    %97 = math.tanh %96 : vector<8x128xf32>
    %98 = vector.extract_strided_slice %83 {offsets = [0, 384], sizes = [8, 128], strides = [1, 1]} : vector<8x512xf32> to vector<8x128xf32>
    %99 = arith.negf %98 : vector<8x128xf32>
    %100 = math.exp %99 : vector<8x128xf32>
    %cst_31 = arith.constant 1.000000e+00 : f32
    %101 = vector.broadcast %cst_31 : f32 to vector<8x128xf32>
    %102 = arith.addf %101, %100 : vector<8x128xf32>
    %103 = arith.divf %101, %102 : vector<8x128xf32>
    %104 = arith.mulf %95, %72 : vector<8x128xf32>
    %105 = arith.mulf %89, %97 : vector<8x128xf32>
    %106 = arith.addf %104, %105 : vector<8x128xf32>
    %107 = math.tanh %106 : vector<8x128xf32>
    %108 = arith.mulf %103, %107 : vector<8x128xf32>
    %109 = arith.index_cast %78 : i32 to index
    %c0_32 = arith.constant 0 : index
    %110 = vector.load %arg11[%109, %c0_32] : memref<64x128xf32, #tpu.memory_space<vmem>>, vector<8x128xf32>
    tpu.vector_store %arg11[%109, %c0_32], %108 {strides = array<i32>} : memref<64x128xf32, #tpu.memory_space<vmem>>, vector<8x128xf32>,
    %c3_i32 = arith.constant 3 : i32
    %c8_i32_33 = arith.constant 8 : i32
    %111 = arith.muli %c3_i32, %c8_i32_33 : i32
    %112 = tpu.assume_multiple %111, 8 : i32
    %113 = arith.index_cast %112 : i32 to index
    %c0_34 = arith.constant 0 : index
    %114 = vector.load %arg10[%113, %c0_34] : memref<64x512xf32, #tpu.memory_space<vmem>>, vector<8x512xf32>
    %115 = arith.truncf %108 : vector<8x128xf32> to vector<8x128xbf16>
    %cst_35 = arith.constant dense<0.000000e+00> : vector<8x512xf32>
    %116 = tpu.matmul %115, %1, %cst_35 {dimension_numbers = #tpu.dot_dimension_numbers<[1], [0], [0], [1], [0, 0, 1, 1], [], []>} : vector<8x128xbf16>, vector<128x512xbf16>, vector<8x512xf32> -> vector<8x512xf32>
    %117 = arith.addf %114, %116 : vector<8x512xf32>
    %118 = vector.extract_strided_slice %117 {offsets = [0, 0], sizes = [8, 128], strides = [1, 1]} : vector<8x512xf32> to vector<8x128xf32>
    %119 = arith.negf %118 : vector<8x128xf32>
    %120 = math.exp %119 : vector<8x128xf32>
    %cst_36 = arith.constant 1.000000e+00 : f32
    %121 = vector.broadcast %cst_36 : f32 to vector<8x128xf32>
    %122 = arith.addf %121, %120 : vector<8x128xf32>
    %123 = arith.divf %121, %122 : vector<8x128xf32>
    %124 = vector.extract_strided_slice %117 {offsets = [0, 128], sizes = [8, 128], strides = [1, 1]} : vector<8x512xf32> to vector<8x128xf32>
    %125 = arith.negf %124 : vector<8x128xf32>
    %126 = math.exp %125 : vector<8x128xf32>
    %cst_37 = arith.constant 1.000000e+00 : f32
    %127 = vector.broadcast %cst_37 : f32 to vector<8x128xf32>
    %128 = arith.addf %127, %126 : vector<8x128xf32>
    %129 = arith.divf %127, %128 : vector<8x128xf32>
    %130 = vector.extract_strided_slice %117 {offsets = [0, 256], sizes = [8, 128], strides = [1, 1]} : vector<8x512xf32> to vector<8x128xf32>
    %131 = math.tanh %130 : vector<8x128xf32>
    %132 = vector.extract_strided_slice %117 {offsets = [0, 384], sizes = [8, 128], strides = [1, 1]} : vector<8x512xf32> to vector<8x128xf32>
    %133 = arith.negf %132 : vector<8x128xf32>
    %134 = math.exp %133 : vector<8x128xf32>
    %cst_38 = arith.constant 1.000000e+00 : f32
    %135 = vector.broadcast %cst_38 : f32 to vector<8x128xf32>
    %136 = arith.addf %135, %134 : vector<8x128xf32>
    %137 = arith.divf %135, %136 : vector<8x128xf32>
    %138 = arith.mulf %129, %106 : vector<8x128xf32>
    %139 = arith.mulf %123, %131 : vector<8x128xf32>
    %140 = arith.addf %138, %139 : vector<8x128xf32>
    %141 = math.tanh %140 : vector<8x128xf32>
    %142 = arith.mulf %137, %141 : vector<8x128xf32>
    %143 = arith.index_cast %112 : i32 to index
    %c0_39 = arith.constant 0 : index
    %144 = vector.load %arg11[%143, %c0_39] : memref<64x128xf32, #tpu.memory_space<vmem>>, vector<8x128xf32>
    tpu.vector_store %arg11[%143, %c0_39], %142 {strides = array<i32>} : memref<64x128xf32, #tpu.memory_space<vmem>>, vector<8x128xf32>,
    %c4_i32 = arith.constant 4 : i32
    %c8_i32_40 = arith.constant 8 : i32
    %145 = arith.muli %c4_i32, %c8_i32_40 : i32
    %146 = tpu.assume_multiple %145, 8 : i32
    %147 = arith.index_cast %146 : i32 to index
    %c0_41 = arith.constant 0 : index
    %148 = vector.load %arg10[%147, %c0_41] : memref<64x512xf32, #tpu.memory_space<vmem>>, vector<8x512xf32>
    %149 = arith.truncf %142 : vector<8x128xf32> to vector<8x128xbf16>
    %cst_42 = arith.constant dense<0.000000e+00> : vector<8x512xf32>
    %150 = tpu.matmul %149, %1, %cst_42 {dimension_numbers = #tpu.dot_dimension_numbers<[1], [0], [0], [1], [0, 0, 1, 1], [], []>} : vector<8x128xbf16>, vector<128x512xbf16>, vector<8x512xf32> -> vector<8x512xf32>
    %151 = arith.addf %148, %150 : vector<8x512xf32>
    %152 = vector.extract_strided_slice %151 {offsets = [0, 0], sizes = [8, 128], strides = [1, 1]} : vector<8x512xf32> to vector<8x128xf32>
    %153 = arith.negf %152 : vector<8x128xf32>
    %154 = math.exp %153 : vector<8x128xf32>
    %cst_43 = arith.constant 1.000000e+00 : f32
    %155 = vector.broadcast %cst_43 : f32 to vector<8x128xf32>
    %156 = arith.addf %155, %154 : vector<8x128xf32>
    %157 = arith.divf %155, %156 : vector<8x128xf32>
    %158 = vector.extract_strided_slice %151 {offsets = [0, 128], sizes = [8, 128], strides = [1, 1]} : vector<8x512xf32> to vector<8x128xf32>
    %159 = arith.negf %158 : vector<8x128xf32>
    %160 = math.exp %159 : vector<8x128xf32>
    %cst_44 = arith.constant 1.000000e+00 : f32
    %161 = vector.broadcast %cst_44 : f32 to vector<8x128xf32>
    %162 = arith.addf %161, %160 : vector<8x128xf32>
    %163 = arith.divf %161, %162 : vector<8x128xf32>
    %164 = vector.extract_strided_slice %151 {offsets = [0, 256], sizes = [8, 128], strides = [1, 1]} : vector<8x512xf32> to vector<8x128xf32>
    %165 = math.tanh %164 : vector<8x128xf32>
    %166 = vector.extract_strided_slice %151 {offsets = [0, 384], sizes = [8, 128], strides = [1, 1]} : vector<8x512xf32> to vector<8x128xf32>
    %167 = arith.negf %166 : vector<8x128xf32>
    %168 = math.exp %167 : vector<8x128xf32>
    %cst_45 = arith.constant 1.000000e+00 : f32
    %169 = vector.broadcast %cst_45 : f32 to vector<8x128xf32>
    %170 = arith.addf %169, %168 : vector<8x128xf32>
    %171 = arith.divf %169, %170 : vector<8x128xf32>
    %172 = arith.mulf %163, %140 : vector<8x128xf32>
    %173 = arith.mulf %157, %165 : vector<8x128xf32>
    %174 = arith.addf %172, %173 : vector<8x128xf32>
    %175 = math.tanh %174 : vector<8x128xf32>
    %176 = arith.mulf %171, %175 : vector<8x128xf32>
    %177 = arith.index_cast %146 : i32 to index
    %c0_46 = arith.constant 0 : index
    %178 = vector.load %arg11[%177, %c0_46] : memref<64x128xf32, #tpu.memory_space<vmem>>, vector<8x128xf32>
    tpu.vector_store %arg11[%177, %c0_46], %176 {strides = array<i32>} : memref<64x128xf32, #tpu.memory_space<vmem>>, vector<8x128xf32>,
    %c5_i32 = arith.constant 5 : i32
    %c8_i32_47 = arith.constant 8 : i32
    %179 = arith.muli %c5_i32, %c8_i32_47 : i32
    %180 = tpu.assume_multiple %179, 8 : i32
    %181 = arith.index_cast %180 : i32 to index
    %c0_48 = arith.constant 0 : index
    %182 = vector.load %arg10[%181, %c0_48] : memref<64x512xf32, #tpu.memory_space<vmem>>, vector<8x512xf32>
    %183 = arith.truncf %176 : vector<8x128xf32> to vector<8x128xbf16>
    %cst_49 = arith.constant dense<0.000000e+00> : vector<8x512xf32>
    %184 = tpu.matmul %183, %1, %cst_49 {dimension_numbers = #tpu.dot_dimension_numbers<[1], [0], [0], [1], [0, 0, 1, 1], [], []>} : vector<8x128xbf16>, vector<128x512xbf16>, vector<8x512xf32> -> vector<8x512xf32>
    %185 = arith.addf %182, %184 : vector<8x512xf32>
    %186 = vector.extract_strided_slice %185 {offsets = [0, 0], sizes = [8, 128], strides = [1, 1]} : vector<8x512xf32> to vector<8x128xf32>
    %187 = arith.negf %186 : vector<8x128xf32>
    %188 = math.exp %187 : vector<8x128xf32>
    %cst_50 = arith.constant 1.000000e+00 : f32
    %189 = vector.broadcast %cst_50 : f32 to vector<8x128xf32>
    %190 = arith.addf %189, %188 : vector<8x128xf32>
    %191 = arith.divf %189, %190 : vector<8x128xf32>
    %192 = vector.extract_strided_slice %185 {offsets = [0, 128], sizes = [8, 128], strides = [1, 1]} : vector<8x512xf32> to vector<8x128xf32>
    %193 = arith.negf %192 : vector<8x128xf32>
    %194 = math.exp %193 : vector<8x128xf32>
    %cst_51 = arith.constant 1.000000e+00 : f32
    %195 = vector.broadcast %cst_51 : f32 to vector<8x128xf32>
    %196 = arith.addf %195, %194 : vector<8x128xf32>
    %197 = arith.divf %195, %196 : vector<8x128xf32>
    %198 = vector.extract_strided_slice %185 {offsets = [0, 256], sizes = [8, 128], strides = [1, 1]} : vector<8x512xf32> to vector<8x128xf32>
    %199 = math.tanh %198 : vector<8x128xf32>
    %200 = vector.extract_strided_slice %185 {offsets = [0, 384], sizes = [8, 128], strides = [1, 1]} : vector<8x512xf32> to vector<8x128xf32>
    %201 = arith.negf %200 : vector<8x128xf32>
    %202 = math.exp %201 : vector<8x128xf32>
    %cst_52 = arith.constant 1.000000e+00 : f32
    %203 = vector.broadcast %cst_52 : f32 to vector<8x128xf32>
    %204 = arith.addf %203, %202 : vector<8x128xf32>
    %205 = arith.divf %203, %204 : vector<8x128xf32>
    %206 = arith.mulf %197, %174 : vector<8x128xf32>
    %207 = arith.mulf %191, %199 : vector<8x128xf32>
    %208 = arith.addf %206, %207 : vector<8x128xf32>
    %209 = math.tanh %208 : vector<8x128xf32>
    %210 = arith.mulf %205, %209 : vector<8x128xf32>
    %211 = arith.index_cast %180 : i32 to index
    %c0_53 = arith.constant 0 : index
    %212 = vector.load %arg11[%211, %c0_53] : memref<64x128xf32, #tpu.memory_space<vmem>>, vector<8x128xf32>
    tpu.vector_store %arg11[%211, %c0_53], %210 {strides = array<i32>} : memref<64x128xf32, #tpu.memory_space<vmem>>, vector<8x128xf32>,
    %c6_i32 = arith.constant 6 : i32
    %c8_i32_54 = arith.constant 8 : i32
    %213 = arith.muli %c6_i32, %c8_i32_54 : i32
    %214 = tpu.assume_multiple %213, 8 : i32
    %215 = arith.index_cast %214 : i32 to index
    %c0_55 = arith.constant 0 : index
    %216 = vector.load %arg10[%215, %c0_55] : memref<64x512xf32, #tpu.memory_space<vmem>>, vector<8x512xf32>
    %217 = arith.truncf %210 : vector<8x128xf32> to vector<8x128xbf16>
    %cst_56 = arith.constant dense<0.000000e+00> : vector<8x512xf32>
    %218 = tpu.matmul %217, %1, %cst_56 {dimension_numbers = #tpu.dot_dimension_numbers<[1], [0], [0], [1], [0, 0, 1, 1], [], []>} : vector<8x128xbf16>, vector<128x512xbf16>, vector<8x512xf32> -> vector<8x512xf32>
    %219 = arith.addf %216, %218 : vector<8x512xf32>
    %220 = vector.extract_strided_slice %219 {offsets = [0, 0], sizes = [8, 128], strides = [1, 1]} : vector<8x512xf32> to vector<8x128xf32>
    %221 = arith.negf %220 : vector<8x128xf32>
    %222 = math.exp %221 : vector<8x128xf32>
    %cst_57 = arith.constant 1.000000e+00 : f32
    %223 = vector.broadcast %cst_57 : f32 to vector<8x128xf32>
    %224 = arith.addf %223, %222 : vector<8x128xf32>
    %225 = arith.divf %223, %224 : vector<8x128xf32>
    %226 = vector.extract_strided_slice %219 {offsets = [0, 128], sizes = [8, 128], strides = [1, 1]} : vector<8x512xf32> to vector<8x128xf32>
    %227 = arith.negf %226 : vector<8x128xf32>
    %228 = math.exp %227 : vector<8x128xf32>
    %cst_58 = arith.constant 1.000000e+00 : f32
    %229 = vector.broadcast %cst_58 : f32 to vector<8x128xf32>
    %230 = arith.addf %229, %228 : vector<8x128xf32>
    %231 = arith.divf %229, %230 : vector<8x128xf32>
    %232 = vector.extract_strided_slice %219 {offsets = [0, 256], sizes = [8, 128], strides = [1, 1]} : vector<8x512xf32> to vector<8x128xf32>
    %233 = math.tanh %232 : vector<8x128xf32>
    %234 = vector.extract_strided_slice %219 {offsets = [0, 384], sizes = [8, 128], strides = [1, 1]} : vector<8x512xf32> to vector<8x128xf32>
    %235 = arith.negf %234 : vector<8x128xf32>
    %236 = math.exp %235 : vector<8x128xf32>
    %cst_59 = arith.constant 1.000000e+00 : f32
    %237 = vector.broadcast %cst_59 : f32 to vector<8x128xf32>
    %238 = arith.addf %237, %236 : vector<8x128xf32>
    %239 = arith.divf %237, %238 : vector<8x128xf32>
    %240 = arith.mulf %231, %208 : vector<8x128xf32>
    %241 = arith.mulf %225, %233 : vector<8x128xf32>
    %242 = arith.addf %240, %241 : vector<8x128xf32>
    %243 = math.tanh %242 : vector<8x128xf32>
    %244 = arith.mulf %239, %243 : vector<8x128xf32>
    %245 = arith.index_cast %214 : i32 to index
    %c0_60 = arith.constant 0 : index
    %246 = vector.load %arg11[%245, %c0_60] : memref<64x128xf32, #tpu.memory_space<vmem>>, vector<8x128xf32>
    tpu.vector_store %arg11[%245, %c0_60], %244 {strides = array<i32>} : memref<64x128xf32, #tpu.memory_space<vmem>>, vector<8x128xf32>,
    %c7_i32 = arith.constant 7 : i32
    %c8_i32_61 = arith.constant 8 : i32
    %247 = arith.muli %c7_i32, %c8_i32_61 : i32
    %248 = tpu.assume_multiple %247, 8 : i32
    %249 = arith.index_cast %248 : i32 to index
    %c0_62 = arith.constant 0 : index
    %250 = vector.load %arg10[%249, %c0_62] : memref<64x512xf32, #tpu.memory_space<vmem>>, vector<8x512xf32>
    %251 = arith.truncf %244 : vector<8x128xf32> to vector<8x128xbf16>
    %cst_63 = arith.constant dense<0.000000e+00> : vector<8x512xf32>
    %252 = tpu.matmul %251, %1, %cst_63 {dimension_numbers = #tpu.dot_dimension_numbers<[1], [0], [0], [1], [0, 0, 1, 1], [], []>} : vector<8x128xbf16>, vector<128x512xbf16>, vector<8x512xf32> -> vector<8x512xf32>
    %253 = arith.addf %250, %252 : vector<8x512xf32>
    %254 = vector.extract_strided_slice %253 {offsets = [0, 0], sizes = [8, 128], strides = [1, 1]} : vector<8x512xf32> to vector<8x128xf32>
    %255 = arith.negf %254 : vector<8x128xf32>
    %256 = math.exp %255 : vector<8x128xf32>
    %cst_64 = arith.constant 1.000000e+00 : f32
    %257 = vector.broadcast %cst_64 : f32 to vector<8x128xf32>
    %258 = arith.addf %257, %256 : vector<8x128xf32>
    %259 = arith.divf %257, %258 : vector<8x128xf32>
    %260 = vector.extract_strided_slice %253 {offsets = [0, 128], sizes = [8, 128], strides = [1, 1]} : vector<8x512xf32> to vector<8x128xf32>
    %261 = arith.negf %260 : vector<8x128xf32>
    %262 = math.exp %261 : vector<8x128xf32>
    %cst_65 = arith.constant 1.000000e+00 : f32
    %263 = vector.broadcast %cst_65 : f32 to vector<8x128xf32>
    %264 = arith.addf %263, %262 : vector<8x128xf32>
    %265 = arith.divf %263, %264 : vector<8x128xf32>
    %266 = vector.extract_strided_slice %253 {offsets = [0, 256], sizes = [8, 128], strides = [1, 1]} : vector<8x512xf32> to vector<8x128xf32>
    %267 = math.tanh %266 : vector<8x128xf32>
    %268 = vector.extract_strided_slice %253 {offsets = [0, 384], sizes = [8, 128], strides = [1, 1]} : vector<8x512xf32> to vector<8x128xf32>
    %269 = arith.negf %268 : vector<8x128xf32>
    %270 = math.exp %269 : vector<8x128xf32>
    %cst_66 = arith.constant 1.000000e+00 : f32
    %271 = vector.broadcast %cst_66 : f32 to vector<8x128xf32>
    %272 = arith.addf %271, %270 : vector<8x128xf32>
    %273 = arith.divf %271, %272 : vector<8x128xf32>
    %274 = arith.mulf %265, %242 : vector<8x128xf32>
    %275 = arith.mulf %259, %267 : vector<8x128xf32>
    %276 = arith.addf %274, %275 : vector<8x128xf32>
    %277 = math.tanh %276 : vector<8x128xf32>
    %278 = arith.mulf %273, %277 : vector<8x128xf32>
    %279 = arith.index_cast %248 : i32 to index
    %c0_67 = arith.constant 0 : index
    %280 = vector.load %arg11[%279, %c0_67] : memref<64x128xf32, #tpu.memory_space<vmem>>, vector<8x128xf32>
    tpu.vector_store %arg11[%279, %c0_67], %278 {strides = array<i32>} : memref<64x128xf32, #tpu.memory_space<vmem>>, vector<8x128xf32>,
    %c8_i32_68 = arith.constant 8 : i32
    %c0_69 = arith.constant 0 : index
    %c0_70 = arith.constant 0 : index
    %c0_71 = arith.constant 0 : index
    %281 = vector.load %arg8[%c0_69, %c0_70, %c0_71] : memref<2x8x128xf32, #tpu.memory_space<vmem>>, vector<1x8x128xf32>
    %282 = vector.shape_cast %281 : vector<1x8x128xf32> to vector<8x128xf32>
    %283 = vector.shape_cast %278 : vector<8x128xf32> to vector<1x8x128xf32>
    tpu.vector_store %arg8[%c0_69, %c0_70, %c0_71], %283 {strides = array<i32>} : memref<2x8x128xf32, #tpu.memory_space<vmem>>, vector<1x8x128xf32>,
    %c0_72 = arith.constant 0 : index
    %c0_73 = arith.constant 0 : index
    %c0_74 = arith.constant 0 : index
    %284 = vector.load %arg9[%c0_72, %c0_73, %c0_74] : memref<2x8x128xf32, #tpu.memory_space<vmem>>, vector<1x8x128xf32>
    %285 = vector.shape_cast %284 : vector<1x8x128xf32> to vector<8x128xf32>
    %286 = vector.shape_cast %276 : vector<8x128xf32> to vector<1x8x128xf32>
    tpu.vector_store %arg9[%c0_72, %c0_73, %c0_74], %286 {strides = array<i32>} : memref<2x8x128xf32, #tpu.memory_space<vmem>>, vector<1x8x128xf32>,
    %c0_75 = arith.constant 0 : index
    %c0_76 = arith.constant 0 : index
    %287 = vector.load %arg5[%c0_75, %c0_76] : memref<128x512xbf16, #tpu.memory_space<vmem>>, vector<128x512xbf16>
    %c0_77 = arith.constant 0 : index
    %c0_78 = arith.constant 0 : index
    %288 = vector.load %arg6[%c0_77, %c0_78] : memref<128x512xbf16, #tpu.memory_space<vmem>>, vector<128x512xbf16>
    %c0_79 = arith.constant 0 : index
    %c0_80 = arith.constant 0 : index
    %289 = vector.load %arg11[%c0_79, %c0_80] : memref<64x128xf32, #tpu.memory_space<vmem>>, vector<64x128xf32>
    %290 = arith.truncf %289 : vector<64x128xf32> to vector<64x128xbf16>
    %cst_81 = arith.constant dense<0.000000e+00> : vector<64x512xf32>
    %291 = tpu.matmul %290, %287, %cst_81 {dimension_numbers = #tpu.dot_dimension_numbers<[1], [0], [0], [1], [0, 0, 1, 1], [], []>} : vector<64x128xbf16>, vector<128x512xbf16>, vector<64x512xf32> -> vector<64x512xf32>
    %c0_82 = arith.constant 0 : index
    %c0_83 = arith.constant 0 : index
    %292 = vector.load %arg10[%c0_82, %c0_83] : memref<64x512xf32, #tpu.memory_space<vmem>>, vector<64x512xf32>
    tpu.vector_store %arg10[%c0_82, %c0_83], %291 {strides = array<i32>} : memref<64x512xf32, #tpu.memory_space<vmem>>, vector<64x512xf32>,
    %c1 = arith.constant 1 : index
    %c0_84 = arith.constant 0 : index
    %c0_85 = arith.constant 0 : index
    %293 = vector.load %arg1[%c1, %c0_84, %c0_85] : memref<2x8x128xf32, #tpu.memory_space<vmem>>, vector<1x8x128xf32>
    %294 = vector.shape_cast %293 : vector<1x8x128xf32> to vector<8x128xf32>
    %c1_86 = arith.constant 1 : index
    %c0_87 = arith.constant 0 : index
    %c0_88 = arith.constant 0 : index
    %295 = vector.load %arg2[%c1_86, %c0_87, %c0_88] : memref<2x8x128xf32, #tpu.memory_space<vmem>>, vector<1x8x128xf32>
    %296 = vector.shape_cast %295 : vector<1x8x128xf32> to vector<8x128xf32>
    %c0_i32_89 = arith.constant 0 : i32
    %c8_i32_90 = arith.constant 8 : i32
    %297 = arith.muli %c0_i32_89, %c8_i32_90 : i32
    %298 = tpu.assume_multiple %297, 8 : i32
    %299 = arith.index_cast %298 : i32 to index
    %c0_91 = arith.constant 0 : index
    %300 = vector.load %arg10[%299, %c0_91] : memref<64x512xf32, #tpu.memory_space<vmem>>, vector<8x512xf32>
    %301 = arith.truncf %294 : vector<8x128xf32> to vector<8x128xbf16>
    %cst_92 = arith.constant dense<0.000000e+00> : vector<8x512xf32>
    %302 = tpu.matmul %301, %288, %cst_92 {dimension_numbers = #tpu.dot_dimension_numbers<[1], [0], [0], [1], [0, 0, 1, 1], [], []>} : vector<8x128xbf16>, vector<128x512xbf16>, vector<8x512xf32> -> vector<8x512xf32>
    %303 = arith.addf %300, %302 : vector<8x512xf32>
    %304 = vector.extract_strided_slice %303 {offsets = [0, 0], sizes = [8, 128], strides = [1, 1]} : vector<8x512xf32> to vector<8x128xf32>
    %305 = arith.negf %304 : vector<8x128xf32>
    %306 = math.exp %305 : vector<8x128xf32>
    %cst_93 = arith.constant 1.000000e+00 : f32
    %307 = vector.broadcast %cst_93 : f32 to vector<8x128xf32>
    %308 = arith.addf %307, %306 : vector<8x128xf32>
    %309 = arith.divf %307, %308 : vector<8x128xf32>
    %310 = vector.extract_strided_slice %303 {offsets = [0, 128], sizes = [8, 128], strides = [1, 1]} : vector<8x512xf32> to vector<8x128xf32>
    %311 = arith.negf %310 : vector<8x128xf32>
    %312 = math.exp %311 : vector<8x128xf32>
    %cst_94 = arith.constant 1.000000e+00 : f32
    %313 = vector.broadcast %cst_94 : f32 to vector<8x128xf32>
    %314 = arith.addf %313, %312 : vector<8x128xf32>
    %315 = arith.divf %313, %314 : vector<8x128xf32>
    %316 = vector.extract_strided_slice %303 {offsets = [0, 256], sizes = [8, 128], strides = [1, 1]} : vector<8x512xf32> to vector<8x128xf32>
    %317 = math.tanh %316 : vector<8x128xf32>
    %318 = vector.extract_strided_slice %303 {offsets = [0, 384], sizes = [8, 128], strides = [1, 1]} : vector<8x512xf32> to vector<8x128xf32>
    %319 = arith.negf %318 : vector<8x128xf32>
    %320 = math.exp %319 : vector<8x128xf32>
    %cst_95 = arith.constant 1.000000e+00 : f32
    %321 = vector.broadcast %cst_95 : f32 to vector<8x128xf32>
    %322 = arith.addf %321, %320 : vector<8x128xf32>
    %323 = arith.divf %321, %322 : vector<8x128xf32>
    %324 = arith.mulf %315, %296 : vector<8x128xf32>
    %325 = arith.mulf %309, %317 : vector<8x128xf32>
    %326 = arith.addf %324, %325 : vector<8x128xf32>
    %327 = math.tanh %326 : vector<8x128xf32>
    %328 = arith.mulf %323, %327 : vector<8x128xf32>
    %329 = arith.index_cast %298 : i32 to index
    %c0_96 = arith.constant 0 : index
    %330 = vector.load %arg11[%329, %c0_96] : memref<64x128xf32, #tpu.memory_space<vmem>>, vector<8x128xf32>
    tpu.vector_store %arg11[%329, %c0_96], %328 {strides = array<i32>} : memref<64x128xf32, #tpu.memory_space<vmem>>, vector<8x128xf32>,
    %c1_i32_97 = arith.constant 1 : i32
    %c8_i32_98 = arith.constant 8 : i32
    %331 = arith.muli %c1_i32_97, %c8_i32_98 : i32
    %332 = tpu.assume_multiple %331, 8 : i32
    %333 = arith.index_cast %332 : i32 to index
    %c0_99 = arith.constant 0 : index
    %334 = vector.load %arg10[%333, %c0_99] : memref<64x512xf32, #tpu.memory_space<vmem>>, vector<8x512xf32>
    %335 = arith.truncf %328 : vector<8x128xf32> to vector<8x128xbf16>
    %cst_100 = arith.constant dense<0.000000e+00> : vector<8x512xf32>
    %336 = tpu.matmul %335, %288, %cst_100 {dimension_numbers = #tpu.dot_dimension_numbers<[1], [0], [0], [1], [0, 0, 1, 1], [], []>} : vector<8x128xbf16>, vector<128x512xbf16>, vector<8x512xf32> -> vector<8x512xf32>
    %337 = arith.addf %334, %336 : vector<8x512xf32>
    %338 = vector.extract_strided_slice %337 {offsets = [0, 0], sizes = [8, 128], strides = [1, 1]} : vector<8x512xf32> to vector<8x128xf32>
    %339 = arith.negf %338 : vector<8x128xf32>
    %340 = math.exp %339 : vector<8x128xf32>
    %cst_101 = arith.constant 1.000000e+00 : f32
    %341 = vector.broadcast %cst_101 : f32 to vector<8x128xf32>
    %342 = arith.addf %341, %340 : vector<8x128xf32>
    %343 = arith.divf %341, %342 : vector<8x128xf32>
    %344 = vector.extract_strided_slice %337 {offsets = [0, 128], sizes = [8, 128], strides = [1, 1]} : vector<8x512xf32> to vector<8x128xf32>
    %345 = arith.negf %344 : vector<8x128xf32>
    %346 = math.exp %345 : vector<8x128xf32>
    %cst_102 = arith.constant 1.000000e+00 : f32
    %347 = vector.broadcast %cst_102 : f32 to vector<8x128xf32>
    %348 = arith.addf %347, %346 : vector<8x128xf32>
    %349 = arith.divf %347, %348 : vector<8x128xf32>
    %350 = vector.extract_strided_slice %337 {offsets = [0, 256], sizes = [8, 128], strides = [1, 1]} : vector<8x512xf32> to vector<8x128xf32>
    %351 = math.tanh %350 : vector<8x128xf32>
    %352 = vector.extract_strided_slice %337 {offsets = [0, 384], sizes = [8, 128], strides = [1, 1]} : vector<8x512xf32> to vector<8x128xf32>
    %353 = arith.negf %352 : vector<8x128xf32>
    %354 = math.exp %353 : vector<8x128xf32>
    %cst_103 = arith.constant 1.000000e+00 : f32
    %355 = vector.broadcast %cst_103 : f32 to vector<8x128xf32>
    %356 = arith.addf %355, %354 : vector<8x128xf32>
    %357 = arith.divf %355, %356 : vector<8x128xf32>
    %358 = arith.mulf %349, %326 : vector<8x128xf32>
    %359 = arith.mulf %343, %351 : vector<8x128xf32>
    %360 = arith.addf %358, %359 : vector<8x128xf32>
    %361 = math.tanh %360 : vector<8x128xf32>
    %362 = arith.mulf %357, %361 : vector<8x128xf32>
    %363 = arith.index_cast %332 : i32 to index
    %c0_104 = arith.constant 0 : index
    %364 = vector.load %arg11[%363, %c0_104] : memref<64x128xf32, #tpu.memory_space<vmem>>, vector<8x128xf32>
    tpu.vector_store %arg11[%363, %c0_104], %362 {strides = array<i32>} : memref<64x128xf32, #tpu.memory_space<vmem>>, vector<8x128xf32>,
    %c2_i32_105 = arith.constant 2 : i32
    %c8_i32_106 = arith.constant 8 : i32
    %365 = arith.muli %c2_i32_105, %c8_i32_106 : i32
    %366 = tpu.assume_multiple %365, 8 : i32
    %367 = arith.index_cast %366 : i32 to index
    %c0_107 = arith.constant 0 : index
    %368 = vector.load %arg10[%367, %c0_107] : memref<64x512xf32, #tpu.memory_space<vmem>>, vector<8x512xf32>
    %369 = arith.truncf %362 : vector<8x128xf32> to vector<8x128xbf16>
    %cst_108 = arith.constant dense<0.000000e+00> : vector<8x512xf32>
    %370 = tpu.matmul %369, %288, %cst_108 {dimension_numbers = #tpu.dot_dimension_numbers<[1], [0], [0], [1], [0, 0, 1, 1], [], []>} : vector<8x128xbf16>, vector<128x512xbf16>, vector<8x512xf32> -> vector<8x512xf32>
    %371 = arith.addf %368, %370 : vector<8x512xf32>
    %372 = vector.extract_strided_slice %371 {offsets = [0, 0], sizes = [8, 128], strides = [1, 1]} : vector<8x512xf32> to vector<8x128xf32>
    %373 = arith.negf %372 : vector<8x128xf32>
    %374 = math.exp %373 : vector<8x128xf32>
    %cst_109 = arith.constant 1.000000e+00 : f32
    %375 = vector.broadcast %cst_109 : f32 to vector<8x128xf32>
    %376 = arith.addf %375, %374 : vector<8x128xf32>
    %377 = arith.divf %375, %376 : vector<8x128xf32>
    %378 = vector.extract_strided_slice %371 {offsets = [0, 128], sizes = [8, 128], strides = [1, 1]} : vector<8x512xf32> to vector<8x128xf32>
    %379 = arith.negf %378 : vector<8x128xf32>
    %380 = math.exp %379 : vector<8x128xf32>
    %cst_110 = arith.constant 1.000000e+00 : f32
    %381 = vector.broadcast %cst_110 : f32 to vector<8x128xf32>
    %382 = arith.addf %381, %380 : vector<8x128xf32>
    %383 = arith.divf %381, %382 : vector<8x128xf32>
    %384 = vector.extract_strided_slice %371 {offsets = [0, 256], sizes = [8, 128], strides = [1, 1]} : vector<8x512xf32> to vector<8x128xf32>
    %385 = math.tanh %384 : vector<8x128xf32>
    %386 = vector.extract_strided_slice %371 {offsets = [0, 384], sizes = [8, 128], strides = [1, 1]} : vector<8x512xf32> to vector<8x128xf32>
    %387 = arith.negf %386 : vector<8x128xf32>
    %388 = math.exp %387 : vector<8x128xf32>
    %cst_111 = arith.constant 1.000000e+00 : f32
    %389 = vector.broadcast %cst_111 : f32 to vector<8x128xf32>
    %390 = arith.addf %389, %388 : vector<8x128xf32>
    %391 = arith.divf %389, %390 : vector<8x128xf32>
    %392 = arith.mulf %383, %360 : vector<8x128xf32>
    %393 = arith.mulf %377, %385 : vector<8x128xf32>
    %394 = arith.addf %392, %393 : vector<8x128xf32>
    %395 = math.tanh %394 : vector<8x128xf32>
    %396 = arith.mulf %391, %395 : vector<8x128xf32>
    %397 = arith.index_cast %366 : i32 to index
    %c0_112 = arith.constant 0 : index
    %398 = vector.load %arg11[%397, %c0_112] : memref<64x128xf32, #tpu.memory_space<vmem>>, vector<8x128xf32>
    tpu.vector_store %arg11[%397, %c0_112], %396 {strides = array<i32>} : memref<64x128xf32, #tpu.memory_space<vmem>>, vector<8x128xf32>,
    %c3_i32_113 = arith.constant 3 : i32
    %c8_i32_114 = arith.constant 8 : i32
    %399 = arith.muli %c3_i32_113, %c8_i32_114 : i32
    %400 = tpu.assume_multiple %399, 8 : i32
    %401 = arith.index_cast %400 : i32 to index
    %c0_115 = arith.constant 0 : index
    %402 = vector.load %arg10[%401, %c0_115] : memref<64x512xf32, #tpu.memory_space<vmem>>, vector<8x512xf32>
    %403 = arith.truncf %396 : vector<8x128xf32> to vector<8x128xbf16>
    %cst_116 = arith.constant dense<0.000000e+00> : vector<8x512xf32>
    %404 = tpu.matmul %403, %288, %cst_116 {dimension_numbers = #tpu.dot_dimension_numbers<[1], [0], [0], [1], [0, 0, 1, 1], [], []>} : vector<8x128xbf16>, vector<128x512xbf16>, vector<8x512xf32> -> vector<8x512xf32>
    %405 = arith.addf %402, %404 : vector<8x512xf32>
    %406 = vector.extract_strided_slice %405 {offsets = [0, 0], sizes = [8, 128], strides = [1, 1]} : vector<8x512xf32> to vector<8x128xf32>
    %407 = arith.negf %406 : vector<8x128xf32>
    %408 = math.exp %407 : vector<8x128xf32>
    %cst_117 = arith.constant 1.000000e+00 : f32
    %409 = vector.broadcast %cst_117 : f32 to vector<8x128xf32>
    %410 = arith.addf %409, %408 : vector<8x128xf32>
    %411 = arith.divf %409, %410 : vector<8x128xf32>
    %412 = vector.extract_strided_slice %405 {offsets = [0, 128], sizes = [8, 128], strides = [1, 1]} : vector<8x512xf32> to vector<8x128xf32>
    %413 = arith.negf %412 : vector<8x128xf32>
    %414 = math.exp %413 : vector<8x128xf32>
    %cst_118 = arith.constant 1.000000e+00 : f32
    %415 = vector.broadcast %cst_118 : f32 to vector<8x128xf32>
    %416 = arith.addf %415, %414 : vector<8x128xf32>
    %417 = arith.divf %415, %416 : vector<8x128xf32>
    %418 = vector.extract_strided_slice %405 {offsets = [0, 256], sizes = [8, 128], strides = [1, 1]} : vector<8x512xf32> to vector<8x128xf32>
    %419 = math.tanh %418 : vector<8x128xf32>
    %420 = vector.extract_strided_slice %405 {offsets = [0, 384], sizes = [8, 128], strides = [1, 1]} : vector<8x512xf32> to vector<8x128xf32>
    %421 = arith.negf %420 : vector<8x128xf32>
    %422 = math.exp %421 : vector<8x128xf32>
    %cst_119 = arith.constant 1.000000e+00 : f32
    %423 = vector.broadcast %cst_119 : f32 to vector<8x128xf32>
    %424 = arith.addf %423, %422 : vector<8x128xf32>
    %425 = arith.divf %423, %424 : vector<8x128xf32>
    %426 = arith.mulf %417, %394 : vector<8x128xf32>
    %427 = arith.mulf %411, %419 : vector<8x128xf32>
    %428 = arith.addf %426, %427 : vector<8x128xf32>
    %429 = math.tanh %428 : vector<8x128xf32>
    %430 = arith.mulf %425, %429 : vector<8x128xf32>
    %431 = arith.index_cast %400 : i32 to index
    %c0_120 = arith.constant 0 : index
    %432 = vector.load %arg11[%431, %c0_120] : memref<64x128xf32, #tpu.memory_space<vmem>>, vector<8x128xf32>
    tpu.vector_store %arg11[%431, %c0_120], %430 {strides = array<i32>} : memref<64x128xf32, #tpu.memory_space<vmem>>, vector<8x128xf32>,
    %c4_i32_121 = arith.constant 4 : i32
    %c8_i32_122 = arith.constant 8 : i32
    %433 = arith.muli %c4_i32_121, %c8_i32_122 : i32
    %434 = tpu.assume_multiple %433, 8 : i32
    %435 = arith.index_cast %434 : i32 to index
    %c0_123 = arith.constant 0 : index
    %436 = vector.load %arg10[%435, %c0_123] : memref<64x512xf32, #tpu.memory_space<vmem>>, vector<8x512xf32>
    %437 = arith.truncf %430 : vector<8x128xf32> to vector<8x128xbf16>
    %cst_124 = arith.constant dense<0.000000e+00> : vector<8x512xf32>
    %438 = tpu.matmul %437, %288, %cst_124 {dimension_numbers = #tpu.dot_dimension_numbers<[1], [0], [0], [1], [0, 0, 1, 1], [], []>} : vector<8x128xbf16>, vector<128x512xbf16>, vector<8x512xf32> -> vector<8x512xf32>
    %439 = arith.addf %436, %438 : vector<8x512xf32>
    %440 = vector.extract_strided_slice %439 {offsets = [0, 0], sizes = [8, 128], strides = [1, 1]} : vector<8x512xf32> to vector<8x128xf32>
    %441 = arith.negf %440 : vector<8x128xf32>
    %442 = math.exp %441 : vector<8x128xf32>
    %cst_125 = arith.constant 1.000000e+00 : f32
    %443 = vector.broadcast %cst_125 : f32 to vector<8x128xf32>
    %444 = arith.addf %443, %442 : vector<8x128xf32>
    %445 = arith.divf %443, %444 : vector<8x128xf32>
    %446 = vector.extract_strided_slice %439 {offsets = [0, 128], sizes = [8, 128], strides = [1, 1]} : vector<8x512xf32> to vector<8x128xf32>
    %447 = arith.negf %446 : vector<8x128xf32>
    %448 = math.exp %447 : vector<8x128xf32>
    %cst_126 = arith.constant 1.000000e+00 : f32
    %449 = vector.broadcast %cst_126 : f32 to vector<8x128xf32>
    %450 = arith.addf %449, %448 : vector<8x128xf32>
    %451 = arith.divf %449, %450 : vector<8x128xf32>
    %452 = vector.extract_strided_slice %439 {offsets = [0, 256], sizes = [8, 128], strides = [1, 1]} : vector<8x512xf32> to vector<8x128xf32>
    %453 = math.tanh %452 : vector<8x128xf32>
    %454 = vector.extract_strided_slice %439 {offsets = [0, 384], sizes = [8, 128], strides = [1, 1]} : vector<8x512xf32> to vector<8x128xf32>
    %455 = arith.negf %454 : vector<8x128xf32>
    %456 = math.exp %455 : vector<8x128xf32>
    %cst_127 = arith.constant 1.000000e+00 : f32
    %457 = vector.broadcast %cst_127 : f32 to vector<8x128xf32>
    %458 = arith.addf %457, %456 : vector<8x128xf32>
    %459 = arith.divf %457, %458 : vector<8x128xf32>
    %460 = arith.mulf %451, %428 : vector<8x128xf32>
    %461 = arith.mulf %445, %453 : vector<8x128xf32>
    %462 = arith.addf %460, %461 : vector<8x128xf32>
    %463 = math.tanh %462 : vector<8x128xf32>
    %464 = arith.mulf %459, %463 : vector<8x128xf32>
    %465 = arith.index_cast %434 : i32 to index
    %c0_128 = arith.constant 0 : index
    %466 = vector.load %arg11[%465, %c0_128] : memref<64x128xf32, #tpu.memory_space<vmem>>, vector<8x128xf32>
    tpu.vector_store %arg11[%465, %c0_128], %464 {strides = array<i32>} : memref<64x128xf32, #tpu.memory_space<vmem>>, vector<8x128xf32>,
    %c5_i32_129 = arith.constant 5 : i32
    %c8_i32_130 = arith.constant 8 : i32
    %467 = arith.muli %c5_i32_129, %c8_i32_130 : i32
    %468 = tpu.assume_multiple %467, 8 : i32
    %469 = arith.index_cast %468 : i32 to index
    %c0_131 = arith.constant 0 : index
    %470 = vector.load %arg10[%469, %c0_131] : memref<64x512xf32, #tpu.memory_space<vmem>>, vector<8x512xf32>
    %471 = arith.truncf %464 : vector<8x128xf32> to vector<8x128xbf16>
    %cst_132 = arith.constant dense<0.000000e+00> : vector<8x512xf32>
    %472 = tpu.matmul %471, %288, %cst_132 {dimension_numbers = #tpu.dot_dimension_numbers<[1], [0], [0], [1], [0, 0, 1, 1], [], []>} : vector<8x128xbf16>, vector<128x512xbf16>, vector<8x512xf32> -> vector<8x512xf32>
    %473 = arith.addf %470, %472 : vector<8x512xf32>
    %474 = vector.extract_strided_slice %473 {offsets = [0, 0], sizes = [8, 128], strides = [1, 1]} : vector<8x512xf32> to vector<8x128xf32>
    %475 = arith.negf %474 : vector<8x128xf32>
    %476 = math.exp %475 : vector<8x128xf32>
    %cst_133 = arith.constant 1.000000e+00 : f32
    %477 = vector.broadcast %cst_133 : f32 to vector<8x128xf32>
    %478 = arith.addf %477, %476 : vector<8x128xf32>
    %479 = arith.divf %477, %478 : vector<8x128xf32>
    %480 = vector.extract_strided_slice %473 {offsets = [0, 128], sizes = [8, 128], strides = [1, 1]} : vector<8x512xf32> to vector<8x128xf32>
    %481 = arith.negf %480 : vector<8x128xf32>
    %482 = math.exp %481 : vector<8x128xf32>
    %cst_134 = arith.constant 1.000000e+00 : f32
    %483 = vector.broadcast %cst_134 : f32 to vector<8x128xf32>
    %484 = arith.addf %483, %482 : vector<8x128xf32>
    %485 = arith.divf %483, %484 : vector<8x128xf32>
    %486 = vector.extract_strided_slice %473 {offsets = [0, 256], sizes = [8, 128], strides = [1, 1]} : vector<8x512xf32> to vector<8x128xf32>
    %487 = math.tanh %486 : vector<8x128xf32>
    %488 = vector.extract_strided_slice %473 {offsets = [0, 384], sizes = [8, 128], strides = [1, 1]} : vector<8x512xf32> to vector<8x128xf32>
    %489 = arith.negf %488 : vector<8x128xf32>
    %490 = math.exp %489 : vector<8x128xf32>
    %cst_135 = arith.constant 1.000000e+00 : f32
    %491 = vector.broadcast %cst_135 : f32 to vector<8x128xf32>
    %492 = arith.addf %491, %490 : vector<8x128xf32>
    %493 = arith.divf %491, %492 : vector<8x128xf32>
    %494 = arith.mulf %485, %462 : vector<8x128xf32>
    %495 = arith.mulf %479, %487 : vector<8x128xf32>
    %496 = arith.addf %494, %495 : vector<8x128xf32>
    %497 = math.tanh %496 : vector<8x128xf32>
    %498 = arith.mulf %493, %497 : vector<8x128xf32>
    %499 = arith.index_cast %468 : i32 to index
    %c0_136 = arith.constant 0 : index
    %500 = vector.load %arg11[%499, %c0_136] : memref<64x128xf32, #tpu.memory_space<vmem>>, vector<8x128xf32>
    tpu.vector_store %arg11[%499, %c0_136], %498 {strides = array<i32>} : memref<64x128xf32, #tpu.memory_space<vmem>>, vector<8x128xf32>,
    %c6_i32_137 = arith.constant 6 : i32
    %c8_i32_138 = arith.constant 8 : i32
    %501 = arith.muli %c6_i32_137, %c8_i32_138 : i32
    %502 = tpu.assume_multiple %501, 8 : i32
    %503 = arith.index_cast %502 : i32 to index
    %c0_139 = arith.constant 0 : index
    %504 = vector.load %arg10[%503, %c0_139] : memref<64x512xf32, #tpu.memory_space<vmem>>, vector<8x512xf32>
    %505 = arith.truncf %498 : vector<8x128xf32> to vector<8x128xbf16>
    %cst_140 = arith.constant dense<0.000000e+00> : vector<8x512xf32>
    %506 = tpu.matmul %505, %288, %cst_140 {dimension_numbers = #tpu.dot_dimension_numbers<[1], [0], [0], [1], [0, 0, 1, 1], [], []>} : vector<8x128xbf16>, vector<128x512xbf16>, vector<8x512xf32> -> vector<8x512xf32>
    %507 = arith.addf %504, %506 : vector<8x512xf32>
    %508 = vector.extract_strided_slice %507 {offsets = [0, 0], sizes = [8, 128], strides = [1, 1]} : vector<8x512xf32> to vector<8x128xf32>
    %509 = arith.negf %508 : vector<8x128xf32>
    %510 = math.exp %509 : vector<8x128xf32>
    %cst_141 = arith.constant 1.000000e+00 : f32
    %511 = vector.broadcast %cst_141 : f32 to vector<8x128xf32>
    %512 = arith.addf %511, %510 : vector<8x128xf32>
    %513 = arith.divf %511, %512 : vector<8x128xf32>
    %514 = vector.extract_strided_slice %507 {offsets = [0, 128], sizes = [8, 128], strides = [1, 1]} : vector<8x512xf32> to vector<8x128xf32>
    %515 = arith.negf %514 : vector<8x128xf32>
    %516 = math.exp %515 : vector<8x128xf32>
    %cst_142 = arith.constant 1.000000e+00 : f32
    %517 = vector.broadcast %cst_142 : f32 to vector<8x128xf32>
    %518 = arith.addf %517, %516 : vector<8x128xf32>
    %519 = arith.divf %517, %518 : vector<8x128xf32>
    %520 = vector.extract_strided_slice %507 {offsets = [0, 256], sizes = [8, 128], strides = [1, 1]} : vector<8x512xf32> to vector<8x128xf32>
    %521 = math.tanh %520 : vector<8x128xf32>
    %522 = vector.extract_strided_slice %507 {offsets = [0, 384], sizes = [8, 128], strides = [1, 1]} : vector<8x512xf32> to vector<8x128xf32>
    %523 = arith.negf %522 : vector<8x128xf32>
    %524 = math.exp %523 : vector<8x128xf32>
    %cst_143 = arith.constant 1.000000e+00 : f32
    %525 = vector.broadcast %cst_143 : f32 to vector<8x128xf32>
    %526 = arith.addf %525, %524 : vector<8x128xf32>
    %527 = arith.divf %525, %526 : vector<8x128xf32>
    %528 = arith.mulf %519, %496 : vector<8x128xf32>
    %529 = arith.mulf %513, %521 : vector<8x128xf32>
    %530 = arith.addf %528, %529 : vector<8x128xf32>
    %531 = math.tanh %530 : vector<8x128xf32>
    %532 = arith.mulf %527, %531 : vector<8x128xf32>
    %533 = arith.index_cast %502 : i32 to index
    %c0_144 = arith.constant 0 : index
    %534 = vector.load %arg11[%533, %c0_144] : memref<64x128xf32, #tpu.memory_space<vmem>>, vector<8x128xf32>
    tpu.vector_store %arg11[%533, %c0_144], %532 {strides = array<i32>} : memref<64x128xf32, #tpu.memory_space<vmem>>, vector<8x128xf32>,
    %c7_i32_145 = arith.constant 7 : i32
    %c8_i32_146 = arith.constant 8 : i32
    %535 = arith.muli %c7_i32_145, %c8_i32_146 : i32
    %536 = tpu.assume_multiple %535, 8 : i32
    %537 = arith.index_cast %536 : i32 to index
    %c0_147 = arith.constant 0 : index
    %538 = vector.load %arg10[%537, %c0_147] : memref<64x512xf32, #tpu.memory_space<vmem>>, vector<8x512xf32>
    %539 = arith.truncf %532 : vector<8x128xf32> to vector<8x128xbf16>
    %cst_148 = arith.constant dense<0.000000e+00> : vector<8x512xf32>
    %540 = tpu.matmul %539, %288, %cst_148 {dimension_numbers = #tpu.dot_dimension_numbers<[1], [0], [0], [1], [0, 0, 1, 1], [], []>} : vector<8x128xbf16>, vector<128x512xbf16>, vector<8x512xf32> -> vector<8x512xf32>
    %541 = arith.addf %538, %540 : vector<8x512xf32>
    %542 = vector.extract_strided_slice %541 {offsets = [0, 0], sizes = [8, 128], strides = [1, 1]} : vector<8x512xf32> to vector<8x128xf32>
    %543 = arith.negf %542 : vector<8x128xf32>
    %544 = math.exp %543 : vector<8x128xf32>
    %cst_149 = arith.constant 1.000000e+00 : f32
    %545 = vector.broadcast %cst_149 : f32 to vector<8x128xf32>
    %546 = arith.addf %545, %544 : vector<8x128xf32>
    %547 = arith.divf %545, %546 : vector<8x128xf32>
    %548 = vector.extract_strided_slice %541 {offsets = [0, 128], sizes = [8, 128], strides = [1, 1]} : vector<8x512xf32> to vector<8x128xf32>
    %549 = arith.negf %548 : vector<8x128xf32>
    %550 = math.exp %549 : vector<8x128xf32>
    %cst_150 = arith.constant 1.000000e+00 : f32
    %551 = vector.broadcast %cst_150 : f32 to vector<8x128xf32>
    %552 = arith.addf %551, %550 : vector<8x128xf32>
    %553 = arith.divf %551, %552 : vector<8x128xf32>
    %554 = vector.extract_strided_slice %541 {offsets = [0, 256], sizes = [8, 128], strides = [1, 1]} : vector<8x512xf32> to vector<8x128xf32>
    %555 = math.tanh %554 : vector<8x128xf32>
    %556 = vector.extract_strided_slice %541 {offsets = [0, 384], sizes = [8, 128], strides = [1, 1]} : vector<8x512xf32> to vector<8x128xf32>
    %557 = arith.negf %556 : vector<8x128xf32>
    %558 = math.exp %557 : vector<8x128xf32>
    %cst_151 = arith.constant 1.000000e+00 : f32
    %559 = vector.broadcast %cst_151 : f32 to vector<8x128xf32>
    %560 = arith.addf %559, %558 : vector<8x128xf32>
    %561 = arith.divf %559, %560 : vector<8x128xf32>
    %562 = arith.mulf %553, %530 : vector<8x128xf32>
    %563 = arith.mulf %547, %555 : vector<8x128xf32>
    %564 = arith.addf %562, %563 : vector<8x128xf32>
    %565 = math.tanh %564 : vector<8x128xf32>
    %566 = arith.mulf %561, %565 : vector<8x128xf32>
    %567 = arith.index_cast %536 : i32 to index
    %c0_152 = arith.constant 0 : index
    %568 = vector.load %arg11[%567, %c0_152] : memref<64x128xf32, #tpu.memory_space<vmem>>, vector<8x128xf32>
    tpu.vector_store %arg11[%567, %c0_152], %566 {strides = array<i32>} : memref<64x128xf32, #tpu.memory_space<vmem>>, vector<8x128xf32>,
    %c8_i32_153 = arith.constant 8 : i32
    %c1_154 = arith.constant 1 : index
    %c0_155 = arith.constant 0 : index
    %c0_156 = arith.constant 0 : index
    %569 = vector.load %arg8[%c1_154, %c0_155, %c0_156] : memref<2x8x128xf32, #tpu.memory_space<vmem>>, vector<1x8x128xf32>
    %570 = vector.shape_cast %569 : vector<1x8x128xf32> to vector<8x128xf32>
    %571 = vector.shape_cast %566 : vector<8x128xf32> to vector<1x8x128xf32>
    tpu.vector_store %arg8[%c1_154, %c0_155, %c0_156], %571 {strides = array<i32>} : memref<2x8x128xf32, #tpu.memory_space<vmem>>, vector<1x8x128xf32>,
    %c1_157 = arith.constant 1 : index
    %c0_158 = arith.constant 0 : index
    %c0_159 = arith.constant 0 : index
    %572 = vector.load %arg9[%c1_157, %c0_158, %c0_159] : memref<2x8x128xf32, #tpu.memory_space<vmem>>, vector<1x8x128xf32>
    %573 = vector.shape_cast %572 : vector<1x8x128xf32> to vector<8x128xf32>
    %574 = vector.shape_cast %564 : vector<8x128xf32> to vector<1x8x128xf32>
    tpu.vector_store %arg9[%c1_157, %c0_158, %c0_159], %574 {strides = array<i32>} : memref<2x8x128xf32, #tpu.memory_space<vmem>>, vector<1x8x128xf32>,
    %c0_160 = arith.constant 0 : index
    %c0_161 = arith.constant 0 : index
    %575 = vector.load %arg11[%c0_160, %c0_161] : memref<64x128xf32, #tpu.memory_space<vmem>>, vector<64x128xf32>
    %576 = arith.truncf %575 : vector<64x128xf32> to vector<64x128xbf16>
    %c0_162 = arith.constant 0 : index
    %c0_163 = arith.constant 0 : index
    %577 = vector.load %arg7[%c0_162, %c0_163] : memref<64x128xbf16, #tpu.memory_space<vmem>>, vector<64x128xbf16>
    tpu.vector_store %arg7[%c0_162, %c0_163], %576 {strides = array<i32>} : memref<64x128xbf16, #tpu.memory_space<vmem>>, vector<64x128xbf16>,
    return
  }
}

</mosaic_0001>

<bundles_post_ra>
// kernel: rnn_model_forward.3
= control target key start
LH: loop header
LB: loop body
LE: loop exit
PB: predicated region body
PF: predicated region fallthrough
CT: control target
= control target key end

     0   :  { %s323_s1 = inlined_call_operand.vmem [shape: bf16[128,128], index: 1, kind: input, shape index: {}]   ;;  %s324_s2 = inlined_call_operand.vmem [shape: f32[1,128], index: 2, kind: input, shape index: {}]   ;;  %s325_s0 = inlined_call_operand.vmem [shape: bf16[64,128], index: 0, kind: input, shape index: {}]   ;;  %s326_s3 = inlined_call_operand.vmem [shape: f32[64,128], index: 3, kind: output, shape index: {}]  }
   0x1   :  { %v214_v0 = vld [vmem:[%s323_s1 + $0x38] sm:$0xff]  ;;  %v213_v1 = vld [vmem:[%s323_s1 + $0x30] sm:$0xff]  ;;  %v212_v2 = vld [vmem:[%s323_s1 + $0x28] sm:$0xff] }
   0x2   :  { %114 = vmatpush.bf16.msra.mxu0 %v214_v0  ;;  %215 = vmatpush.bf16.msra.mxu1 %v214_v0  ;;  %v211_v3 = vld [vmem:[%s323_s1 + $0x20] sm:$0xff]  ;;  %v210_v4 = vld [vmem:[%s323_s1 + $0x18] sm:$0xff]  ;;  %v209_v5 = vld [vmem:[%s323_s1 + $0x10] sm:$0xff] }
   0x3   :  { %216 = vmatpush.bf16.msra.mxu2 %v214_v0  ;;  %217 = vmatpush.bf16.msra.mxu3 %v214_v0  ;;  %v208_v6 = vld [vmem:[%s323_s1 + $0x8] sm:$0xff]  ;;  %v207_v7 = vld [vmem:[%s323_s1] sm:$0xff]  ;;  %v205_v10 = vld [vmem:[%s325_s0 + $0x10] sm:$0xff] }
   0x4   :  { %v203_v8 = vld [vmem:[%s325_s0] sm:$0xff]  ;;  %v204_v9 = vld [vmem:[%s325_s0 + $0x8] sm:$0xff]  ;;  %v206_v11 = vld [vmem:[%s325_s0 + $0x18] sm:$0xff] }
   0x5   :  { %v239_v12 = vld [vmem:[%s324_s2] ss:$0 sm:$0xff] }
   0x6   :  { %115 = vmatpush.bf16.msra.mxu0 %v213_v1  ;;  %218 = vmatpush.bf16.msra.mxu1 %v213_v1 }
   0x7   :  { %219 = vmatpush.bf16.msra.mxu2 %v213_v1  ;;  %220 = vmatpush.bf16.msra.mxu3 %v213_v1 }
   0xa   :  { %116 = vmatpush.bf16.msra.mxu0 %v212_v2  ;;  %221 = vmatpush.bf16.msra.mxu1 %v212_v2 }
   0xb   :  { %222 = vmatpush.bf16.msra.mxu2 %v212_v2  ;;  %223 = vmatpush.bf16.msra.mxu3 %v212_v2 }
   0xe   :  { %117 = vmatpush.bf16.msra.mxu0 %v211_v3  ;;  %224 = vmatpush.bf16.msra.mxu1 %v211_v3 }
   0xf   :  { %225 = vmatpush.bf16.msra.mxu2 %v211_v3  ;;  %226 = vmatpush.bf16.msra.mxu3 %v211_v3 }
  0x12   :  { %118 = vmatpush.bf16.msra.mxu0 %v210_v4  ;;  %227 = vmatpush.bf16.msra.mxu1 %v210_v4 }
  0x13   :  { %228 = vmatpush.bf16.msra.mxu2 %v210_v4  ;;  %229 = vmatpush.bf16.msra.mxu3 %v210_v4 }
  0x16   :  { %119 = vmatpush.bf16.msra.mxu0 %v209_v5  ;;  %230 = vmatpush.bf16.msra.mxu1 %v209_v5 }
  0x17   :  { %231 = vmatpush.bf16.msra.mxu2 %v209_v5  ;;  %232 = vmatpush.bf16.msra.mxu3 %v209_v5 }
  0x1a   :  { %120 = vmatpush.bf16.msra.mxu0 %v208_v6  ;;  %233 = vmatpush.bf16.msra.mxu1 %v208_v6 }
  0x1b   :  { %234 = vmatpush.bf16.msra.mxu2 %v208_v6  ;;  %235 = vmatpush.bf16.msra.mxu3 %v208_v6 }
  0x1e   :  { %121 = vmatpush.bf16.msra.mxu0 %v207_v7  ;;  %236 = vmatpush.bf16.msra.mxu1 %v207_v7 }
  0x1f   :  { %237 = vmatpush.bf16.msra.mxu2 %v207_v7  ;;  %238 = vmatpush.bf16.msra.mxu3 %v207_v7 }
  0x21   :  { %122 = vmatmul.bf16.vlgmr.msra.gmra.mxu0 %v203_v8  ;;  %127 = vmatmul.bf16.vlgmr.msra.gmra.mxu1 %v204_v9 }
  0x22   :  { %132 = vmatmul.bf16.vlgmr.msra.gmra.mxu2 %v205_v10  ;;  %137 = vmatmul.bf16.vlgmr.msra.gmra.mxu3 %v206_v11 }
  0x9e   :  { %v123_v13 = vpop.f32.mrf.mxu0  ;;  %v128_v14 = vpop.f32.mrf.mxu1 }
  0x9f   :  { %v124_v15 = vadd.f32 %v239_v12, %v123_v13  ;;  %v129_v16 = vadd.f32 %v239_v12, %v128_v14 }
  0xa1   :  { %143 = vst [vmem:[%s326_s3] sm:$0xff] %v124_v15 }
  0xa2   :  { %145 = vst [vmem:[%s326_s3 + $0x10] sm:$0xff] %v129_v16 }
  0xa5   :  { %v133_v17 = vpop.f32.mrf.mxu2  ;;  %v138_v18 = vpop.f32.mrf.mxu3 }
  0xa6   :  { %v134_v19 = vadd.f32 %v239_v12, %v133_v17  ;;  %v139_v20 = vadd.f32 %v239_v12, %v138_v18  ;;  %v125_v21 = vpop.f32.mrf.mxu0  ;;  %v130_v22 = vpop.f32.mrf.mxu1 }
  0xa7   :  { %v126_v23 = vadd.f32 %v239_v12, %v125_v21  ;;  %v131_v24 = vadd.f32 %v239_v12, %v130_v22 }
  0xa8   :  { %147 = vst [vmem:[%s326_s3 + $0x20] sm:$0xff] %v134_v19 }
  0xa9   :  { %149 = vst [vmem:[%s326_s3 + $0x30] sm:$0xff] %v139_v20 }
  0xaa   :  { %144 = vst [vmem:[%s326_s3 + $0x8] sm:$0xff] %v126_v23 }
  0xab   :  { %146 = vst [vmem:[%s326_s3 + $0x18] sm:$0xff] %v131_v24 }
  0xad   :  { %v135_v25 = vpop.f32.mrf.mxu2  ;;  %v140_v26 = vpop.f32.mrf.mxu3 }
  0xae   :  { %v136_v27 = vadd.f32 %v239_v12, %v135_v25  ;;  %v141_v28 = vadd.f32 %v239_v12, %v140_v26 }
  0xb0   :  { %148 = vst [vmem:[%s326_s3 + $0x28] sm:$0xff] %v136_v27 }
  0xb1   :  { %150 = vst [vmem:[%s326_s3 + $0x38] sm:$0xff] %v141_v28 }

// kernel: rnn_model_forward.2
= control target key start
LH: loop header
LB: loop body
LE: loop exit
PB: predicated region body
PF: predicated region fallthrough
CT: control target
= control target key end

     0   :  { %15 = vsyncpa [#allocation5], 0  ;;  %s5656_s0 = inlined_call_operand.vmem [shape: bf16[64,128], index: 0, kind: input, shape index: {}]   ;;  %s5657_s1 = inlined_call_operand.vmem [shape: f32[2,8,128], index: 1, kind: input, shape index: {}, may-alias: {1,8}]   ;;  %s5658_s2 = inlined_call_operand.vmem [shape: f32[2,8,128], index: 2, kind: input, shape index: {}, may-alias: {2,9}]   ;;  %s5659_s3 = inlined_call_operand.vmem [shape: bf16[128,512], index: 3, kind: input, shape index: {}]   ;;  %s5660_s4 = inlined_call_operand.hbm [shape: bf16[128,512], index: 4, kind: input, shape index: {}]   ;;  %s5661_s5 = inlined_call_operand.hbm [shape: bf16[128,512], index: 5, kind: input, shape index: {}]   ;;  %s5662_s6 = inlined_call_operand.hbm [shape: bf16[128,512], index: 6, kind: input, shape index: {}]   ;;  %s5663_s7 = inlined_call_operand.vmem [shape: bf16[64,128], index: 7, kind: output, shape index: {0}]   ;;  %s5664_s8 = inlined_call_operand.vmem [shape: f32[2,8,128], index: 8, kind: output, shape index: {1}, may-alias: {1,8}]   ;;  %s5665_s9 = inlined_call_operand.vmem [shape: f32[2,8,128], index: 9, kind: output, shape index: {2}, may-alias: {2,9}]  }
   0x1   :  { %16 = vsyncpa [#allocation7], 0  ;;  %s42_s11 = sshll.u32 %s5661_s5, 4  ;;  %s4344_s12 = smov [#allocation6]   ;;  %s43_s11 = int_to_ptr.hbm [resolvable:$true] %s42_s11 }
   0x2   :  { %s44_s13 = sshll.u32 %s4344_s12, 4  ;;  %s29_s16 = sshll.u32 %s5660_s4, 4  ;;  %s45_s13 = int_to_ptr.vmem [resolvable:$true] %s44_s13  ;;  %s30_s16 = int_to_ptr.hbm [resolvable:$true] %s29_s16 }
   0x3   :  { %s4345_s17 = smov 256   ;;  %s4346_s18 = smov 16  }
   0x4   :  { %50 = dma.hbm_to_vmem [thread:$0]  %s43_s11, 4096, %s45_s13, [#allocation7], %s4345_s17, %s4345_s17, %s4346_s18  }
   0x5   :  { %s4347_s19 = smov [#allocation4]   ;;  %s55_s23 = sshll.u32 %s5662_s6, 4  ;;  %s56_s23 = int_to_ptr.hbm [resolvable:$true] %s55_s23 }
   0x6   :  { %s31_s20 = sshll.u32 %s4347_s19, 4  ;;  %s4348_s5 = smov [#allocation8]   ;;  %s32_s20 = int_to_ptr.vmem [resolvable:$true] %s31_s20 }
   0x7   :  { %37 = dma.hbm_to_vmem [thread:$0]  %s30_s16, 4096, %s32_s20, [#allocation5], %s4345_s17, %s4345_s17, %s4346_s18  }
   0x8   :  { %s57_s24 = sshll.u32 %s4348_s5, 4  ;;  %s58_s24 = int_to_ptr.vmem [resolvable:$true] %s57_s24 }
   0x9   :  { %63 = dma.hbm_to_vmem [thread:$0]  %s56_s23, 4096, %s58_s24, [#allocation7], %s4345_s17, %s4345_s17, %s4346_s18  }
   0xa   :  { %4340 = dma.done.wait [#allocation5], 4096  }
   0xb   :  { %4341 = vsyncadd [#allocation5], 4294963200 }
   0xc   :  { %4342 = dma.done.wait [#allocation7], 8192  }
   0xd   :  { %4343 = vsyncadd [#allocation7], 4294959104  ;;  %v3402_v0 = vld [vmem:[%s5659_s3 + $0xe0] sm:$0xf]  ;;  %v3882_v1 = vld [vmem:[%s5659_s3 + $0xec] sm:$0xf0] }
   0xe   :  { %v3880_v2 = vld [vmem:[%s5659_s3 + $0xe4] sm:$0xf]  ;;  %v3403_v3 = vor.u32 %v3882_v1, %v3402_v0  ;;  %v3404_v4 = vld [vmem:[%s5659_s3 + $0xf0] sm:$0xf0]  ;;  %v3410_v5 = vld [vmem:[%s5659_s3 + $0xe8] sm:$0xf] }
   0xf   :  { %v3883_v6 = vld [vmem:[%s5659_s3 + $0xf4] sm:$0xf0]  ;;  %v3407_v7 = vor.u32 %v3880_v2, %v3404_v4  ;;  %v3881_v9 = vld [vmem:[%s5659_s3 + $0xec] sm:$0xf]  ;;  %v3412_v10 = vld [vmem:[%s5659_s3 + $0xf8] sm:$0xf0] }
  0x10   :  { %v3411_v8 = vor.u32 %v3883_v6, %v3410_v5  ;;  %v3386_v11 = vld [vmem:[%s5659_s3 + $0xc0] sm:$0xf]  ;;  %332 = vmatpush.bf16.msra.mxu0 %v3403_v3  ;;  %v3415_v12 = vor.u32 %v3881_v9, %v3412_v10  ;;  %v3878_v13 = vld [vmem:[%s5659_s3 + $0xcc] sm:$0xf0]  ;;  %v3876_v14 = vld [vmem:[%s5659_s3 + $0xc4] sm:$0xf] }
  0x11   :  { %v3388_v15 = vld [vmem:[%s5659_s3 + $0xd0] sm:$0xf0]  ;;  %361 = vmatpush.bf16.msra.mxu1 %v3407_v7  ;;  %v3387_v16 = vor.u32 %v3878_v13, %v3386_v11  ;;  %v3394_v18 = vld [vmem:[%s5659_s3 + $0xc8] sm:$0xf]  ;;  %v3879_v19 = vld [vmem:[%s5659_s3 + $0xd4] sm:$0xf0] }
  0x12   :  { %390 = vmatpush.bf16.msra.mxu2 %v3411_v8  ;;  %v3391_v17 = vor.u32 %v3876_v14, %v3388_v15  ;;  %v3877_v20 = vld [vmem:[%s5659_s3 + $0xcc] sm:$0xf]  ;;  %419 = vmatpush.bf16.msra.mxu3 %v3415_v12  ;;  %v3395_v21 = vor.u32 %v3879_v19, %v3394_v18  ;;  %v3396_v22 = vld [vmem:[%s5659_s3 + $0xd8] sm:$0xf0]  ;;  %v3370_v23 = vld [vmem:[%s5659_s3 + $0xa0] sm:$0xf] }
  0x13   :  { %v3874_v24 = vld [vmem:[%s5659_s3 + $0xac] sm:$0xf0]  ;;  %v3399_v25 = vor.u32 %v3877_v20, %v3396_v22  ;;  %v3872_v26 = vld [vmem:[%s5659_s3 + $0xa4] sm:$0xf]  ;;  %v3372_v27 = vld [vmem:[%s5659_s3 + $0xb0] sm:$0xf0] }
  0x14   :  { %v3378_v28 = vld [vmem:[%s5659_s3 + $0xa8] sm:$0xf]  ;;  %333 = vmatpush.bf16.msra.mxu0 %v3387_v16  ;;  %v3371_v29 = vor.u32 %v3874_v24, %v3370_v23  ;;  %v3875_v30 = vld [vmem:[%s5659_s3 + $0xb4] sm:$0xf0]  ;;  %v3873_v31 = vld [vmem:[%s5659_s3 + $0xac] sm:$0xf]  ;;  %v3375_v33 = vor.u32 %v3872_v26, %v3372_v27 }
  0x15   :  { %v3380_v32 = vld [vmem:[%s5659_s3 + $0xb8] sm:$0xf0]  ;;  %362 = vmatpush.bf16.msra.mxu1 %v3391_v17  ;;  %v3379_v34 = vor.u32 %v3875_v30, %v3378_v28  ;;  %v3354_v35 = vld [vmem:[%s5659_s3 + $0x80] sm:$0xf]  ;;  %v3870_v36 = vld [vmem:[%s5659_s3 + $0x8c] sm:$0xf0] }
  0x16   :  { %391 = vmatpush.bf16.msra.mxu2 %v3395_v21  ;;  %v3868_v37 = vld [vmem:[%s5659_s3 + $0x84] sm:$0xf]  ;;  %420 = vmatpush.bf16.msra.mxu3 %v3399_v25  ;;  %v3383_v38 = vor.u32 %v3873_v31, %v3380_v32  ;;  %v3356_v39 = vld [vmem:[%s5659_s3 + $0x90] sm:$0xf0]  ;;  %v3362_v40 = vld [vmem:[%s5659_s3 + $0x88] sm:$0xf]  ;;  %v3355_v44 = vor.u32 %v3870_v36, %v3354_v35 }
  0x17   :  { %v3871_v41 = vld [vmem:[%s5659_s3 + $0x94] sm:$0xf0]  ;;  %v3869_v42 = vld [vmem:[%s5659_s3 + $0x8c] sm:$0xf]  ;;  %v3364_v43 = vld [vmem:[%s5659_s3 + $0x98] sm:$0xf0]  ;;  %v3359_v45 = vor.u32 %v3868_v37, %v3356_v39 }
  0x18   :  { %334 = vmatpush.bf16.msra.mxu0 %v3371_v29  ;;  %v3363_v46 = vor.u32 %v3871_v41, %v3362_v40  ;;  %v3338_v47 = vld [vmem:[%s5659_s3 + $0x60] sm:$0xf]  ;;  %v3866_v48 = vld [vmem:[%s5659_s3 + $0x6c] sm:$0xf0]  ;;  %v3864_v49 = vld [vmem:[%s5659_s3 + $0x64] sm:$0xf]  ;;  %v3367_v50 = vor.u32 %v3869_v42, %v3364_v43 }
  0x19   :  { %363 = vmatpush.bf16.msra.mxu1 %v3375_v33  ;;  %v3340_v51 = vld [vmem:[%s5659_s3 + $0x70] sm:$0xf0]  ;;  %v3346_v52 = vld [vmem:[%s5659_s3 + $0x68] sm:$0xf]  ;;  %v3867_v53 = vld [vmem:[%s5659_s3 + $0x74] sm:$0xf0]  ;;  %v3339_v56 = vor.u32 %v3866_v48, %v3338_v47 }
  0x1a   :  { %392 = vmatpush.bf16.msra.mxu2 %v3379_v34  ;;  %421 = vmatpush.bf16.msra.mxu3 %v3383_v38  ;;  %v3865_v54 = vld [vmem:[%s5659_s3 + $0x6c] sm:$0xf]  ;;  %v3348_v55 = vld [vmem:[%s5659_s3 + $0x78] sm:$0xf0]  ;;  %v3343_v57 = vor.u32 %v3864_v49, %v3340_v51  ;;  %v3347_v58 = vor.u32 %v3867_v53, %v3346_v52  ;;  %v3322_v59 = vld [vmem:[%s5659_s3 + $0x40] sm:$0xf] }
  0x1b   :  { %v3862_v60 = vld [vmem:[%s5659_s3 + $0x4c] sm:$0xf0]  ;;  %v3860_v61 = vld [vmem:[%s5659_s3 + $0x44] sm:$0xf]  ;;  %v3351_v62 = vor.u32 %v3865_v54, %v3348_v55  ;;  %v3324_v63 = vld [vmem:[%s5659_s3 + $0x50] sm:$0xf0] }
  0x1c   :  { %335 = vmatpush.bf16.msra.mxu0 %v3355_v44  ;;  %v3330_v0 = vld [vmem:[%s5659_s3 + $0x48] sm:$0xf]  ;;  %v3863_v1 = vld [vmem:[%s5659_s3 + $0x54] sm:$0xf0]  ;;  %v3861_v2 = vld [vmem:[%s5659_s3 + $0x4c] sm:$0xf]  ;;  %v3323_v4 = vor.u32 %v3862_v60, %v3322_v59  ;;  %v3327_v5 = vor.u32 %v3860_v61, %v3324_v63 }
  0x1d   :  { %364 = vmatpush.bf16.msra.mxu1 %v3359_v45  ;;  %v3332_v3 = vld [vmem:[%s5659_s3 + $0x58] sm:$0xf0]  ;;  %v3331_v6 = vor.u32 %v3863_v1, %v3330_v0  ;;  %v3306_v7 = vld [vmem:[%s5659_s3 + $0x20] sm:$0xf]  ;;  %v3858_v8 = vld [vmem:[%s5659_s3 + $0x2c] sm:$0xf0] }
  0x1e   :  { %393 = vmatpush.bf16.msra.mxu2 %v3363_v46  ;;  %422 = vmatpush.bf16.msra.mxu3 %v3367_v50  ;;  %v3856_v9 = vld [vmem:[%s5659_s3 + $0x24] sm:$0xf]  ;;  %v3335_v10 = vor.u32 %v3861_v2, %v3332_v3  ;;  %v3308_v11 = vld [vmem:[%s5659_s3 + $0x30] sm:$0xf0]  ;;  %v3314_v12 = vld [vmem:[%s5659_s3 + $0x28] sm:$0xf]  ;;  %v3307_v16 = vor.u32 %v3858_v8, %v3306_v7 }
  0x1f   :  { %v3859_v13 = vld [vmem:[%s5659_s3 + $0x34] sm:$0xf0]  ;;  %v3857_v14 = vld [vmem:[%s5659_s3 + $0x2c] sm:$0xf]  ;;  %v3316_v15 = vld [vmem:[%s5659_s3 + $0x38] sm:$0xf0]  ;;  %v3311_v18 = vor.u32 %v3856_v9, %v3308_v11 }
  0x20   :  { %336 = vmatpush.bf16.msra.mxu0 %v3339_v56  ;;  %v3290_v17 = vld [vmem:[%s5659_s3] sm:$0xf]  ;;  %v3315_v19 = vor.u32 %v3859_v13, %v3314_v12  ;;  %v3854_v20 = vld [vmem:[%s5659_s3 + $0xc] sm:$0xf0]  ;;  %v3852_v21 = vld [vmem:[%s5659_s3 + $0x4] sm:$0xf]  ;;  %v3319_v23 = vor.u32 %v3857_v14, %v3316_v15 }
  0x21   :  { %365 = vmatpush.bf16.msra.mxu1 %v3343_v57  ;;  %v3292_v22 = vld [vmem:[%s5659_s3 + $0x10] sm:$0xf0]  ;;  %v3298_v24 = vld [vmem:[%s5659_s3 + $0x8] sm:$0xf]  ;;  %v3855_v25 = vld [vmem:[%s5659_s3 + $0x14] sm:$0xf0]  ;;  %v3291_v30 = vor.u32 %v3854_v20, %v3290_v17 }
  0x22   :  { %394 = vmatpush.bf16.msra.mxu2 %v3347_v58  ;;  %423 = vmatpush.bf16.msra.mxu3 %v3351_v62  ;;  %v3853_v26 = vld [vmem:[%s5659_s3 + $0xc] sm:$0xf]  ;;  %v3300_v27 = vld [vmem:[%s5659_s3 + $0x18] sm:$0xf0]  ;;  %v3530_v28 = vld [vmem:[#allocation4 + $0xe0] sm:$0xf]  ;;  %v3295_v33 = vor.u32 %v3852_v21, %v3292_v22  ;;  %v3299_v34 = vor.u32 %v3855_v25, %v3298_v24 }
  0x23   :  { %v3914_v29 = vld [vmem:[#allocation4 + $0xec] sm:$0xf0]  ;;  %v3912_v31 = vld [vmem:[#allocation4 + $0xe4] sm:$0xf]  ;;  %v3532_v32 = vld [vmem:[#allocation4 + $0xf0] sm:$0xf0]  ;;  %v3303_v36 = vor.u32 %v3853_v26, %v3300_v27 }
  0x24   :  { %337 = vmatpush.bf16.msra.mxu0 %v3323_v4  ;;  %v3916_v35 = vld [vmem:[%s5656_s0] sm:$0xff]  ;;  %v4603_v37 = vor.u32 %v3914_v29, %v3530_v28  ;;  %v3913_v38 = vld [vmem:[#allocation4 + $0xec] sm:$0xf]  ;;  %v3538_v39 = vld [vmem:[#allocation4 + $0xe8] sm:$0xf]  ;;  %v4605_v41 = vor.u32 %v3912_v31, %v3532_v32 }
  0x25   :  { %366 = vmatpush.bf16.msra.mxu1 %v3327_v5  ;;  %v3915_v40 = vld [vmem:[#allocation4 + $0xf4] sm:$0xf0]  ;;  %v3540_v42 = vld [vmem:[#allocation4 + $0xf8] sm:$0xf0]  ;;  %v3514_v43 = vld [vmem:[#allocation4 + $0xc0] sm:$0xf] }
  0x26   :  { %395 = vmatpush.bf16.msra.mxu2 %v3331_v6  ;;  %424 = vmatpush.bf16.msra.mxu3 %v3335_v10  ;;  %v3910_v44 = vld [vmem:[#allocation4 + $0xcc] sm:$0xf0]  ;;  %v3908_v45 = vld [vmem:[#allocation4 + $0xc4] sm:$0xf]  ;;  %v3516_v46 = vld [vmem:[#allocation4 + $0xd0] sm:$0xf0]  ;;  %v4607_v47 = vor.u32 %v3915_v40, %v3538_v39  ;;  %v4610_v48 = vor.u32 %v3913_v38, %v3540_v42 }
  0x27   :  { %v4612_v49 = vor.u32 %v3910_v44, %v3514_v43  ;;  %v3909_v50 = vld [vmem:[#allocation4 + $0xcc] sm:$0xf]  ;;  %v3522_v51 = vld [vmem:[#allocation4 + $0xc8] sm:$0xf]  ;;  %v3911_v52 = vld [vmem:[#allocation4 + $0xd4] sm:$0xf0]  ;;  %v4615_v53 = vor.u32 %v3908_v45, %v3516_v46 }
  0x28   :  { %338 = vmatpush.bf16.msra.mxu0 %v3307_v16  ;;  %v3524_v54 = vld [vmem:[#allocation4 + $0xd8] sm:$0xf0]  ;;  %v3498_v55 = vld [vmem:[#allocation4 + $0xa0] sm:$0xf]  ;;  %v3906_v56 = vld [vmem:[#allocation4 + $0xac] sm:$0xf0]  ;;  %v4618_v59 = vor.u32 %v3911_v52, %v3522_v51 }
  0x29   :  { %367 = vmatpush.bf16.msra.mxu1 %v3311_v18  ;;  %v3904_v57 = vld [vmem:[#allocation4 + $0xa4] sm:$0xf]  ;;  %v3500_v58 = vld [vmem:[#allocation4 + $0xb0] sm:$0xf0]  ;;  %v4622_v60 = vor.u32 %v3909_v50, %v3524_v54  ;;  %v4624_v61 = vor.u32 %v3906_v56, %v3498_v55  ;;  %v3905_v62 = vld [vmem:[#allocation4 + $0xac] sm:$0xf] }
  0x2a   :  { %396 = vmatpush.bf16.msra.mxu2 %v3315_v19  ;;  %425 = vmatpush.bf16.msra.mxu3 %v3319_v23  ;;  %v3506_v63 = vld [vmem:[#allocation4 + $0xa8] sm:$0xf]  ;;  %v3907_v0 = vld [vmem:[#allocation4 + $0xb4] sm:$0xf0]  ;;  %v4627_v1 = vor.u32 %v3904_v57, %v3500_v58  ;;  %v3508_v2 = vld [vmem:[#allocation4 + $0xb8] sm:$0xf0] }
  0x2b   :  { %v3482_v3 = vld [vmem:[#allocation4 + $0x80] sm:$0xf]  ;;  %v3902_v4 = vld [vmem:[#allocation4 + $0x8c] sm:$0xf0]  ;;  %v3900_v5 = vld [vmem:[#allocation4 + $0x84] sm:$0xf]  ;;  %v4630_v7 = vor.u32 %v3907_v0, %v3506_v63  ;;  %v4634_v8 = vor.u32 %v3905_v62, %v3508_v2 }
  0x2c   :  { %339 = vmatpush.bf16.msra.mxu0 %v3291_v30  ;;  %v3484_v6 = vld [vmem:[#allocation4 + $0x90] sm:$0xf0]  ;;  %v4636_v9 = vor.u32 %v3902_v4, %v3482_v3  ;;  %v3901_v10 = vld [vmem:[#allocation4 + $0x8c] sm:$0xf]  ;;  %v3490_v11 = vld [vmem:[#allocation4 + $0x88] sm:$0xf] }
  0x2d   :  { %368 = vmatpush.bf16.msra.mxu1 %v3295_v33  ;;  %v3903_v12 = vld [vmem:[#allocation4 + $0x94] sm:$0xf0]  ;;  %v4639_v13 = vor.u32 %v3900_v5, %v3484_v6  ;;  %v3492_v14 = vld [vmem:[#allocation4 + $0x98] sm:$0xf0]  ;;  %v3466_v15 = vld [vmem:[#allocation4 + $0x60] sm:$0xf] }
  0x2e   :  { %397 = vmatpush.bf16.msra.mxu2 %v3299_v34  ;;  %426 = vmatpush.bf16.msra.mxu3 %v3303_v36  ;;  %v3898_v16 = vld [vmem:[#allocation4 + $0x6c] sm:$0xf0]  ;;  %v3896_v17 = vld [vmem:[#allocation4 + $0x64] sm:$0xf]  ;;  %v3468_v18 = vld [vmem:[#allocation4 + $0x70] sm:$0xf0]  ;;  %v4645_v20 = vor.u32 %v3903_v12, %v3490_v11  ;;  %v4649_v21 = vor.u32 %v3901_v10, %v3492_v14 }
  0x2f   :  { %340 = vmatmul.bf16.vlgmr.msra.gmra.mxu0 %v3916_v35  ;;  %v3917_v19 = vld [vmem:[%s5656_s0 + $0x8] sm:$0xff]  ;;  %v4651_v22 = vor.u32 %v3898_v16, %v3466_v15  ;;  %v3899_v25 = vld [vmem:[#allocation4 + $0x74] sm:$0xf0]  ;;  %v4654_v26 = vor.u32 %v3896_v17, %v3468_v18  ;;  %v3476_v27 = vld [vmem:[#allocation4 + $0x78] sm:$0xf0] }
  0x30   :  { %650 = vmatpush.bf16.msrb.mxu0 %v4603_v37  ;;  %369 = vmatmul.bf16.vlgmr.msra.gmra.mxu1 %v3916_v35  ;;  %v3897_v23 = vld [vmem:[#allocation4 + $0x6c] sm:$0xf]  ;;  %v3474_v24 = vld [vmem:[#allocation4 + $0x68] sm:$0xf]  ;;  %v3450_v28 = vld [vmem:[#allocation4 + $0x40] sm:$0xf] }
  0x31   :  { %663 = vmatpush.bf16.msrb.mxu1 %v4605_v41  ;;  %398 = vmatmul.bf16.vlgmr.msra.gmra.mxu2 %v3916_v35  ;;  %v3894_v29 = vld [vmem:[#allocation4 + $0x4c] sm:$0xf0]  ;;  %v3892_v30 = vld [vmem:[#allocation4 + $0x44] sm:$0xf]  ;;  %v3452_v31 = vld [vmem:[#allocation4 + $0x50] sm:$0xf0]  ;;  %v4657_v32 = vor.u32 %v3899_v25, %v3474_v24  ;;  %v4661_v33 = vor.u32 %v3897_v23, %v3476_v27 }
  0x32   :  { %427 = vmatmul.bf16.vlgmr.msra.gmra.mxu3 %v3916_v35  ;;  %676 = vmatpush.bf16.msrb.mxu2 %v4607_v47  ;;  %v4663_v34 = vor.u32 %v3894_v29, %v3450_v28  ;;  %v4666_v35 = vor.u32 %v3892_v30, %v3452_v31  ;;  %v3893_v36 = vld [vmem:[#allocation4 + $0x4c] sm:$0xf]  ;;  %v3460_v38 = vld [vmem:[#allocation4 + $0x58] sm:$0xf0]  ;;  %v3434_v39 = vld [vmem:[#allocation4 + $0x20] sm:$0xf] }
  0x33   :  { %689 = vmatpush.bf16.msrb.mxu3 %v4610_v48  ;;  %v3890_v40 = vld [vmem:[#allocation4 + $0x2c] sm:$0xf0]  ;;  %v3888_v42 = vld [vmem:[#allocation4 + $0x24] sm:$0xf]  ;;  %v4671_v43 = vor.u32 %v3893_v36, %v3460_v38  ;;  %v3436_v45 = vld [vmem:[#allocation4 + $0x30] sm:$0xf0] }
  0x34   :  { %651 = vmatpush.bf16.msrb.mxu0 %v4612_v49  ;;  %v4673_v44 = vor.u32 %v3890_v40, %v3434_v39  ;;  %v3458_v46 = vld [vmem:[#allocation4 + $0x48] sm:$0xf]  ;;  %v3895_v50 = vld [vmem:[#allocation4 + $0x54] sm:$0xf0]  ;;  %v4676_v51 = vor.u32 %v3888_v42, %v3436_v45  ;;  %v3889_v54 = vld [vmem:[#allocation4 + $0x2c] sm:$0xf] }
  0x35   :  { %664 = vmatpush.bf16.msrb.mxu1 %v4615_v53  ;;  %v4678_v52 = vor.u32 %v3895_v50, %v3458_v46  ;;  %v3444_v55 = vld [vmem:[#allocation4 + $0x38] sm:$0xf0]  ;;  %v3418_v56 = vld [vmem:[#allocation4] sm:$0xf]  ;;  %v3886_v57 = vld [vmem:[#allocation4 + $0xc] sm:$0xf0] }
  0x36   :  { %677 = vmatpush.bf16.msrb.mxu2 %v4618_v59  ;;  %v3884_v58 = vld [vmem:[#allocation4 + $0x4] sm:$0xf]  ;;  %v3420_v62 = vld [vmem:[#allocation4 + $0x10] sm:$0xf0]  ;;  %v3442_v63 = vld [vmem:[#allocation4 + $0x28] sm:$0xf]  ;;  %v4683_v2 = vor.u32 %v3889_v54, %v3444_v55  ;;  %v4685_v3 = vor.u32 %v3886_v57, %v3418_v56 }
  0x37   :  { %690 = vmatpush.bf16.msrb.mxu3 %v4622_v60  ;;  %v3891_v0 = vld [vmem:[#allocation4 + $0x34] sm:$0xf0]  ;;  %v3426_v5 = vld [vmem:[#allocation4 + $0x8] sm:$0xf]  ;;  %v4690_v10 = vor.u32 %v3884_v58, %v3420_v62  ;;  %v3885_v11 = vld [vmem:[#allocation4 + $0xc] sm:$0xf] }
  0x38   :  { %652 = vmatpush.bf16.msrb.mxu0 %v4624_v61  ;;  %v4687_v4 = vor.u32 %v3891_v0, %v3442_v63  ;;  %v3887_v6 = vld [vmem:[#allocation4 + $0x14] sm:$0xf0]  ;;  %v3428_v12 = vld [vmem:[#allocation4 + $0x18] sm:$0xf0]  ;;  %v3918_v16 = vld [vmem:[%s5656_s0 + $0x10] sm:$0xff] }
  0x39   :  { %665 = vmatpush.bf16.msrb.mxu1 %v4627_v1  ;;  %v4693_v14 = vor.u32 %v3887_v6, %v3426_v5  ;;  %v4697_v15 = vor.u32 %v3885_v11, %v3428_v12  ;;  %v3919_v17 = vld [vmem:[%s5656_s0 + $0x18] sm:$0xff]  ;;  %v480_v18 = vld [vmem:[%s5657_s1] sm:$0xff] }
  0x3a   :  { %678 = vmatpush.bf16.msrb.mxu2 %v4630_v7 }
  0x3b   :  { %691 = vmatpush.bf16.msrb.mxu3 %v4634_v8 }
  0x3c   :  { %653 = vmatpush.bf16.msrb.mxu0 %v4636_v9 }
  0x3d   :  { %666 = vmatpush.bf16.msrb.mxu1 %v4639_v13 }
  0x3e   :  { %679 = vmatpush.bf16.msrb.mxu2 %v4645_v20 }
  0x3f   :  { %692 = vmatpush.bf16.msrb.mxu3 %v4649_v21  ;;  %345 = vmatmul.bf16.gmra.mxu0 %v3917_v19 }
  0x40   :  { %654 = vmatpush.bf16.msrb.mxu0 %v4651_v22  ;;  %374 = vmatmul.bf16.gmra.mxu1 %v3917_v19 }
  0x41   :  { %667 = vmatpush.bf16.msrb.mxu1 %v4654_v26  ;;  %403 = vmatmul.bf16.gmra.mxu2 %v3917_v19 }
  0x42   :  { %432 = vmatmul.bf16.gmra.mxu3 %v3917_v19  ;;  %680 = vmatpush.bf16.msrb.mxu2 %v4657_v32  ;;  %v489_v19 = vpack.c.bf16 %v480_v18, %v480_v18 }
  0x43   :  { %693 = vmatpush.bf16.msrb.mxu3 %v4661_v33 }
  0x44   :  { %655 = vmatpush.bf16.msrb.mxu0 %v4663_v34 }
  0x45   :  { %668 = vmatpush.bf16.msrb.mxu1 %v4666_v35 }
  0x46   :  { %681 = vmatpush.bf16.msrb.mxu2 %v4678_v52 }
  0x47   :  { %694 = vmatpush.bf16.msrb.mxu3 %v4671_v43 }
  0x48   :  { %656 = vmatpush.bf16.msrb.mxu0 %v4673_v44 }
  0x49   :  { %669 = vmatpush.bf16.msrb.mxu1 %v4676_v51 }
  0x4a   :  { %682 = vmatpush.bf16.msrb.mxu2 %v4687_v4 }
  0x4b   :  { %695 = vmatpush.bf16.msrb.mxu3 %v4683_v2 }
  0x4c   :  { %657 = vmatpush.bf16.msrb.mxu0 %v4685_v3 }
  0x4d   :  { %670 = vmatpush.bf16.msrb.mxu1 %v4690_v10 }
  0x4e   :  { %683 = vmatpush.bf16.msrb.mxu2 %v4693_v14 }
  0x4f   :  { %696 = vmatpush.bf16.msrb.mxu3 %v4697_v15  ;;  %350 = vmatmul.bf16.gmra.mxu0 %v3918_v16 }
  0x50   :  { %778 = vmatpush.bf16.msra.mxu0 %v4603_v37  ;;  %379 = vmatmul.bf16.gmra.mxu1 %v3918_v16 }
  0x51   :  { %791 = vmatpush.bf16.msra.mxu1 %v4605_v41  ;;  %408 = vmatmul.bf16.gmra.mxu2 %v3918_v16 }
  0x52   :  { %804 = vmatpush.bf16.msra.mxu2 %v4607_v47  ;;  %437 = vmatmul.bf16.gmra.mxu3 %v3918_v16 }
  0x53   :  { %817 = vmatpush.bf16.msra.mxu3 %v4610_v48 }
  0x54   :  { %779 = vmatpush.bf16.msra.mxu0 %v4612_v49 }
  0x55   :  { %792 = vmatpush.bf16.msra.mxu1 %v4615_v53 }
  0x56   :  { %805 = vmatpush.bf16.msra.mxu2 %v4618_v59 }
  0x57   :  { %818 = vmatpush.bf16.msra.mxu3 %v4622_v60 }
  0x58   :  { %780 = vmatpush.bf16.msra.mxu0 %v4624_v61 }
  0x59   :  { %793 = vmatpush.bf16.msra.mxu1 %v4627_v1 }
  0x5a   :  { %806 = vmatpush.bf16.msra.mxu2 %v4630_v7 }
  0x5b   :  { %819 = vmatpush.bf16.msra.mxu3 %v4634_v8 }
  0x5c   :  { %781 = vmatpush.bf16.msra.mxu0 %v4636_v9 }
  0x5d   :  { %794 = vmatpush.bf16.msra.mxu1 %v4639_v13 }
  0x5e   :  { %807 = vmatpush.bf16.msra.mxu2 %v4645_v20 }
  0x5f   :  { %820 = vmatpush.bf16.msra.mxu3 %v4649_v21  ;;  %355 = vmatmul.bf16.gmra.mxu0 %v3919_v17 }
  0x60   :  { %782 = vmatpush.bf16.msra.mxu0 %v4651_v22  ;;  %384 = vmatmul.bf16.gmra.mxu1 %v3919_v17 }
  0x61   :  { %795 = vmatpush.bf16.msra.mxu1 %v4654_v26  ;;  %413 = vmatmul.bf16.gmra.mxu2 %v3919_v17 }
  0x62   :  { %808 = vmatpush.bf16.msra.mxu2 %v4657_v32  ;;  %442 = vmatmul.bf16.gmra.mxu3 %v3919_v17 }
  0x63   :  { %821 = vmatpush.bf16.msra.mxu3 %v4661_v33 }
  0x64   :  { %783 = vmatpush.bf16.msra.mxu0 %v4663_v34 }
  0x65   :  { %796 = vmatpush.bf16.msra.mxu1 %v4666_v35 }
  0x66   :  { %809 = vmatpush.bf16.msra.mxu2 %v4678_v52 }
  0x67   :  { %822 = vmatpush.bf16.msra.mxu3 %v4671_v43 }
  0x68   :  { %784 = vmatpush.bf16.msra.mxu0 %v4673_v44 }
  0x69   :  { %797 = vmatpush.bf16.msra.mxu1 %v4676_v51 }
  0x6a   :  { %810 = vmatpush.bf16.msra.mxu2 %v4687_v4 }
  0x6b   :  { %823 = vmatpush.bf16.msra.mxu3 %v4683_v2 }
  0x6c   :  { %785 = vmatpush.bf16.msra.mxu0 %v4685_v3 }
  0x6d   :  { %798 = vmatpush.bf16.msra.mxu1 %v4690_v10 }
  0x6e   :  { %811 = vmatpush.bf16.msra.mxu2 %v4693_v14 }
  0x6f   :  { %824 = vmatpush.bf16.msra.mxu3 %v4697_v15  ;;  %658 = vmatmul.bf16.vlgmr.msrb.gmra.mxu0 %v489_v19 }
  0x70   :  { %671 = vmatmul.bf16.vlgmr.msrb.gmra.mxu1 %v489_v19  ;;  %907 = vmatpush.bf16.msrb.mxu0 %v4603_v37 }
  0x71   :  { %684 = vmatmul.bf16.vlgmr.msrb.gmra.mxu2 %v489_v19  ;;  %920 = vmatpush.bf16.msrb.mxu1 %v4605_v41 }
  0x72   :  { %697 = vmatmul.bf16.vlgmr.msrb.gmra.mxu3 %v489_v19  ;;  %933 = vmatpush.bf16.msrb.mxu2 %v4607_v47 }
  0x73   :  { %946 = vmatpush.bf16.msrb.mxu3 %v4610_v48 }
  0x74   :  { %908 = vmatpush.bf16.msrb.mxu0 %v4612_v49 }
  0x75   :  { %921 = vmatpush.bf16.msrb.mxu1 %v4615_v53 }
  0x76   :  { %934 = vmatpush.bf16.msrb.mxu2 %v4618_v59 }
  0x77   :  { %947 = vmatpush.bf16.msrb.mxu3 %v4622_v60 }
  0x78   :  { %909 = vmatpush.bf16.msrb.mxu0 %v4624_v61 }
  0x79   :  { %922 = vmatpush.bf16.msrb.mxu1 %v4627_v1 }
  0x7a   :  { %935 = vmatpush.bf16.msrb.mxu2 %v4630_v7 }
  0x7b   :  { %948 = vmatpush.bf16.msrb.mxu3 %v4634_v8 }
  0x7c   :  { %910 = vmatpush.bf16.msrb.mxu0 %v4636_v9 }
  0x7d   :  { %923 = vmatpush.bf16.msrb.mxu1 %v4639_v13 }
  0x7e   :  { %936 = vmatpush.bf16.msrb.mxu2 %v4645_v20 }
  0x7f   :  { %949 = vmatpush.bf16.msrb.mxu3 %v4649_v21 }
  0x80   :  { %911 = vmatpush.bf16.msrb.mxu0 %v4651_v22 }
  0x81   :  { %924 = vmatpush.bf16.msrb.mxu1 %v4654_v26 }
  0x82   :  { %937 = vmatpush.bf16.msrb.mxu2 %v4657_v32 }
  0x83   :  { %950 = vmatpush.bf16.msrb.mxu3 %v4661_v33 }
  0x84   :  { %912 = vmatpush.bf16.msrb.mxu0 %v4663_v34 }
  0x85   :  { %925 = vmatpush.bf16.msrb.mxu1 %v4666_v35 }
  0x86   :  { %938 = vmatpush.bf16.msrb.mxu2 %v4678_v52 }
  0x87   :  { %951 = vmatpush.bf16.msrb.mxu3 %v4671_v43 }
  0x88   :  { %913 = vmatpush.bf16.msrb.mxu0 %v4673_v44 }
  0x89   :  { %926 = vmatpush.bf16.msrb.mxu1 %v4676_v51 }
  0x8a   :  { %939 = vmatpush.bf16.msrb.mxu2 %v4687_v4 }
  0x8b   :  { %952 = vmatpush.bf16.msrb.mxu3 %v4683_v2 }
  0x8c   :  { %914 = vmatpush.bf16.msrb.mxu0 %v4685_v3 }
  0x8d   :  { %927 = vmatpush.bf16.msrb.mxu1 %v4690_v10 }
  0x8e   :  { %940 = vmatpush.bf16.msrb.mxu2 %v4693_v14 }
  0x8f   :  { %953 = vmatpush.bf16.msrb.mxu3 %v4697_v15 }
  0xac   :  { %v341_v23 = vpop.f32.mrf.mxu0 }
  0xad   :  { %v370_v24 = vpop.f32.mrf.mxu1 }
  0xb4   :  { %v399_v25 = vpop.f32.mrf.mxu2  ;;  %v4775_v28 = vpop.f32.mrf.mxu0 }
  0xb5   :  { %v428_v27 = vpop.f32.mrf.mxu3  ;;  %v4777_v29 = vpop.f32.mrf.mxu1 }
  0xbc   :  { %v4779_v30 = vpop.f32.mrf.mxu2  ;;  %v4783_v36 = vpop.f32.mrf.mxu0 }
  0xbd   :  { %v4781_v31 = vpop.f32.mrf.mxu3  ;;  %v4785_v38 = vpop.f32.mrf.mxu1 }
  0xc4   :  { %v4787_v39 = vpop.f32.mrf.mxu2  ;;  %v4791_v42 = vpop.f32.mrf.mxu0 }
  0xc5   :  { %v4789_v40 = vpop.f32.mrf.mxu3  ;;  %5666 = vst [vmem:[#allocation11_spill] sm:$0xff] %v4791_v42  ;;  %v4793_v45 = vpop.f32.mrf.mxu1 }
  0xc6   :  { %5667 = vst [vmem:[#allocation12_spill] sm:$0xff] %v4793_v45 }
  0xcc   :  { %v4795_v46 = vpop.f32.mrf.mxu2  ;;  %v4799_v54 = vpop.f32.mrf.mxu0 }
  0xcd   :  { %5668 = vst [vmem:[#allocation13_spill] sm:$0xff] %v4795_v46  ;;  %v4797_v50 = vpop.f32.mrf.mxu3  ;;  %v4801_v55 = vpop.f32.mrf.mxu1 }
  0xce   :  { %5669 = vst [vmem:[#allocation14_spill] sm:$0xff] %v4797_v50 }
  0xcf   :  { %5670 = vst [vmem:[#allocation15_spill] sm:$0xff] %v4799_v54 }
  0xd0   :  { %5671 = vst [vmem:[#allocation16_spill] sm:$0xff] %v4801_v55 }
  0xd4   :  { %v4803_v56 = vpop.f32.mrf.mxu2  ;;  %v4807_v58 = vpop.f32.mrf.mxu0 }
  0xd5   :  { %5672 = vst [vmem:[#allocation17_spill] sm:$0xff] %v4803_v56  ;;  %v4805_v57 = vpop.f32.mrf.mxu3  ;;  %v4809_v62 = vpop.f32.mrf.mxu1 }
  0xd6   :  { %5673 = vst [vmem:[#allocation18_spill] sm:$0xff] %v4805_v57 }
  0xd7   :  { %5674 = vst [vmem:[#allocation19_spill] sm:$0xff] %v4807_v58 }
  0xd8   :  { %5675 = vst [vmem:[#allocation20_spill] sm:$0xff] %v4809_v62 }
  0xdc   :  { %v4811_v63 = vpop.f32.mrf.mxu2  ;;  %v4815_v5 = vpop.f32.mrf.mxu0 }
  0xdd   :  { %5676 = vst [vmem:[#allocation21_spill] sm:$0xff] %v4811_v63  ;;  %v4813_v0 = vpop.f32.mrf.mxu3  ;;  %v4817_v6 = vpop.f32.mrf.mxu1 }
  0xde   :  { %5677 = vst [vmem:[#allocation22_spill] sm:$0xff] %v4813_v0 }
  0xdf   :  { %5678 = vst [vmem:[#allocation23_spill] sm:$0xff] %v4815_v5 }
  0xe0   :  { %5679 = vst [vmem:[#allocation24_spill] sm:$0xff] %v4817_v6 }
  0xe4   :  { %v4819_v11 = vpop.f32.mrf.mxu2  ;;  %v4823_v16 = vpop.f32.mrf.mxu0 }
  0xe5   :  { %5680 = vst [vmem:[#allocation25_spill] sm:$0xff] %v4819_v11  ;;  %v4821_v12 = vpop.f32.mrf.mxu3  ;;  %v4825_v17 = vpop.f32.mrf.mxu1 }
  0xe6   :  { %5681 = vst [vmem:[#allocation26_spill] sm:$0xff] %v4821_v12 }
  0xe7   :  { %5682 = vst [vmem:[#allocation27_spill] sm:$0xff] %v4823_v16 }
  0xe8   :  { %5683 = vst [vmem:[#allocation28_spill] sm:$0xff] %v4825_v17 }
  0xec   :  { %v4827_v18 = vpop.f32.mrf.mxu2  ;;  %v659_v62 = vpop.f32.mrf.mxu0 }
  0xed   :  { %5684 = vst [vmem:[#allocation29_spill] sm:$0xff] %v4827_v18  ;;  %v4829_v19 = vpop.f32.mrf.mxu3  ;;  %v702_v63 = vadd.f32 %v659_v62, %v341_v23  ;;  %v672_v58 = vpop.f32.mrf.mxu1 }
  0xee   :  { %5685 = vst [vmem:[#allocation30_spill] sm:$0xff] %v4829_v19  ;;  %v703_v0 = vadd.f32 %v672_v58, %v370_v24 }
  0xef   :  { %v3544_v56 = vmul.f32 -1.442695, %v702_v63 }
  0xf0   :  { %v3545_v5 = vmul.f32 -1.442695, %v703_v0 }
  0xf1   :  { %4012 = vpow2.f32 %v3544_v56 }
  0xf2   :  { %4014 = vpow2.f32 %v3545_v5 }
  0xf4   :  { %v685_v6 = vpop.f32.mrf.mxu2  ;;  %v661_v57 = vpop.f32.mrf.mxu0 }
  0xf5   :  { %v698_v11 = vpop.f32.mrf.mxu3  ;;  %v674_v55 = vpop.f32.mrf.mxu1  ;;  %v704_v63 = vadd.f32 %v685_v6, %v399_v25 }
  0xf6   :  { %v705_v12 = vadd.f32 %v698_v11, %v428_v27 }
  0xf7   :  { %v4013_v16 = vpop.eup %4012 }
  0xf8   :  { %v3546_v54 = vmul.f32 -1.442695, %v705_v12  ;;  %v4015_v17 = vpop.eup %4014  ;;  %v709_v46 = vadd.f32 1.0, %v4013_v16 }
  0xf9   :  { %v728_v18 = vadd.f32 1.0, %v4015_v17 }
  0xfa   :  { %4016 = vpow2.f32 %v3546_v54  ;;  %v721_v57 = vand.u32 2147483648, %v709_v46  ;;  %v719_v54 = vand.u32 2147483647, %v709_v46  ;;  %vm715_vm2 = vweird.f32 %v709_v46 }
  0xfb   :  { %4018 = vrcp.f32 %v709_v46  ;;  %v740_v11 = vand.u32 2147483648, %v728_v18  ;;  %v738_v17 = vand.u32 2147483647, %v728_v18  ;;  %vm734_vm3 = vweird.f32 %v728_v18 }
  0xfc   :  { %4020 = vrcp.f32 %v728_v18  ;;  %v687_v23 = vpop.f32.mrf.mxu2  ;;  %v722_v25 = vor.u32 1.1754944e-38, %v721_v57  ;;  %vm720_vm6 = vcmp.eq.f32.partialorder %v719_v54, 8.507059e+37 }
  0xfd   :  { %v700_v62 = vpop.f32.mrf.mxu3  ;;  %vm739_vm7 = vcmp.eq.f32.partialorder %v738_v17, 8.507059e+37 }
 0x100   :  { %v4017_v24 = vpop.eup %4016 }
 0x101   :  { %v4019_v58 = vpop.eup %4018  ;;  %v748_v56 = vadd.f32 1.0, %v4017_v24  ;;  %v741_v24 = vor.u32 1.1754944e-38, %v740_v11 }
 0x102   :  { %v4021_v0 = vpop.eup %4020  ;;  %v711_v5 = vmul.f32 %v4019_v58, %v709_v46  ;;  %vm716_vm0 = vweird.f32 %v4019_v58 }
 0x103   :  { %v730_v19 = vmul.f32 %v4021_v0, %v728_v18  ;;  %4022 = vrcp.f32 %v748_v56  ;;  %vm735_vm1 = vweird.f32 %v4021_v0  ;;  %vm717_vm4 = vmor %vm715_vm2, %vm716_vm0  ;;  %v760_v11 = vand.u32 2147483648, %v748_v56 }
 0x104   :  { %v712_v27 = vsub.f32 1.0, %v711_v5  ;;  %4024 = vtanh.f32 %v704_v63  ;;  %vm736_vm5 = vmor %vm734_vm3, %vm735_vm1  ;;  %vm754_vm9 = vweird.f32 %v748_v56 }
 0x105   :  { %v731_v55 = vsub.f32 1.0, %v730_v19  ;;  %v481_v19 = vld [vmem:[%s5658_s2] sm:$0xff] }
 0x106   :  { %v713_v12 = vmul.f32 %v4019_v58, %v712_v27 }
 0x107   :  { %v732_v16 = vmul.f32 %v4021_v0, %v731_v55 }
 0x108   :  { %v714_v23 = vadd.f32 %v4019_v58, %v713_v12 }
 0x109   :  { %v4023_v62 = vpop.eup %4022  ;;  %v733_v6 = vadd.f32 %v4021_v0, %v732_v16 }
 0x10a   :  { %v718_v63 = vsel %vm717_vm4, %v4019_v58, %v714_v23  ;;  %v750_v5 = vmul.f32 %v4023_v62, %v748_v56  ;;  %v4025_v27 = vpop.eup %4024  ;;  %vm755_vm8 = vweird.f32 %v4023_v62  ;;  %v758_v58 = vand.u32 2147483647, %v748_v56 }
 0x10b   :  { %v723_v55 = vsel %vm720_vm6, %v722_v25, %v718_v63  ;;  %v737_v50 = vsel %vm736_vm5, %v4021_v0, %v733_v6  ;;  %vm756_vm10 = vmor %vm754_vm9, %vm755_vm8  ;;  %v761_v23 = vor.u32 1.1754944e-38, %v760_v11 }
 0x10c   :  { %v742_v12 = vsel %vm739_vm7, %v741_v24, %v737_v50  ;;  %v765_v46 = vmul.f32 %v4025_v27, %v723_v55  ;;  %v751_v45 = vsub.f32 1.0, %v750_v5  ;;  %vm759_vm11 = vcmp.eq.f32.partialorder %v758_v58, 8.507059e+37 }
 0x10d   :  { %v764_v18 = vmul.f32 %v742_v12, %v481_v19 }
 0x10e   :  { %v752_v42 = vmul.f32 %v4023_v62, %v751_v45 }
 0x10f   :  { %v4834_v57 = vadd.f32 %v765_v46, %v764_v18 }
 0x110   :  { %v753_v16 = vadd.f32 %v4023_v62, %v752_v42 }
 0x111   :  { %4026 = vtanh.f32 %v4834_v57 }
 0x112   :  { %v757_v54 = vsel %vm756_vm10, %v4023_v62, %v753_v16 }
 0x113   :  { %v762_v17 = vsel %vm759_vm11, %v761_v23, %v757_v54 }
 0x117   :  { %v4027_v0 = vpop.eup %4026 }
 0x118   :  { %v4837_v50 = vmul.f32 %v4027_v0, %v762_v17 }
 0x11a   :  { %v777_v45 = vpack.c.bf16 %v4837_v50, %v4837_v50 }
 0x11c   :  { %786 = vmatmul.bf16.vlgmr.msra.gmra.mxu0 %v777_v45  ;;  %799 = vmatmul.bf16.vlgmr.msra.gmra.mxu1 %v777_v45 }
 0x11d   :  { %812 = vmatmul.bf16.vlgmr.msra.gmra.mxu2 %v777_v45  ;;  %825 = vmatmul.bf16.vlgmr.msra.gmra.mxu3 %v777_v45 }
 0x11e   :  { %1036 = vmatpush.bf16.msra.mxu0 %v4603_v37  ;;  %1049 = vmatpush.bf16.msra.mxu1 %v4605_v41 }
 0x11f   :  { %1062 = vmatpush.bf16.msra.mxu2 %v4607_v47  ;;  %1075 = vmatpush.bf16.msra.mxu3 %v4610_v48 }
 0x122   :  { %1037 = vmatpush.bf16.msra.mxu0 %v4612_v49  ;;  %1050 = vmatpush.bf16.msra.mxu1 %v4615_v53 }
 0x123   :  { %1063 = vmatpush.bf16.msra.mxu2 %v4618_v59  ;;  %1076 = vmatpush.bf16.msra.mxu3 %v4622_v60 }
 0x126   :  { %1038 = vmatpush.bf16.msra.mxu0 %v4624_v61  ;;  %1051 = vmatpush.bf16.msra.mxu1 %v4627_v1 }
 0x127   :  { %1064 = vmatpush.bf16.msra.mxu2 %v4630_v7  ;;  %1077 = vmatpush.bf16.msra.mxu3 %v4634_v8 }
 0x12a   :  { %1039 = vmatpush.bf16.msra.mxu0 %v4636_v9  ;;  %1052 = vmatpush.bf16.msra.mxu1 %v4639_v13 }
 0x12b   :  { %1065 = vmatpush.bf16.msra.mxu2 %v4645_v20  ;;  %1078 = vmatpush.bf16.msra.mxu3 %v4649_v21 }
 0x12e   :  { %1040 = vmatpush.bf16.msra.mxu0 %v4651_v22  ;;  %1053 = vmatpush.bf16.msra.mxu1 %v4654_v26 }
 0x12f   :  { %1066 = vmatpush.bf16.msra.mxu2 %v4657_v32  ;;  %1079 = vmatpush.bf16.msra.mxu3 %v4661_v33 }
 0x132   :  { %1041 = vmatpush.bf16.msra.mxu0 %v4663_v34  ;;  %1054 = vmatpush.bf16.msra.mxu1 %v4666_v35 }
 0x133   :  { %1067 = vmatpush.bf16.msra.mxu2 %v4678_v52  ;;  %1080 = vmatpush.bf16.msra.mxu3 %v4671_v43 }
 0x136   :  { %1042 = vmatpush.bf16.msra.mxu0 %v4673_v44  ;;  %1055 = vmatpush.bf16.msra.mxu1 %v4676_v51 }
 0x137   :  { %1068 = vmatpush.bf16.msra.mxu2 %v4687_v4  ;;  %1081 = vmatpush.bf16.msra.mxu3 %v4683_v2 }
 0x13a   :  { %1043 = vmatpush.bf16.msra.mxu0 %v4685_v3  ;;  %1056 = vmatpush.bf16.msra.mxu1 %v4690_v10 }
 0x13b   :  { %1069 = vmatpush.bf16.msra.mxu2 %v4693_v14  ;;  %1082 = vmatpush.bf16.msra.mxu3 %v4697_v15 }
 0x199   :  { %v787_v42 = vpop.f32.mrf.mxu0  ;;  %v800_v56 = vpop.f32.mrf.mxu1 }
 0x19a   :  { %v830_v62 = vadd.f32 %v787_v42, %v4775_v28  ;;  %v831_v25 = vadd.f32 %v800_v56, %v4777_v29 }
 0x19c   :  { %v3547_v6 = vmul.f32 -1.442695, %v830_v62  ;;  %v3548_v24 = vmul.f32 -1.442695, %v831_v25 }
 0x19e   :  { %4028 = vpow2.f32 %v3547_v6 }
 0x19f   :  { %4030 = vpow2.f32 %v3548_v24 }
 0x1a0   :  { %v813_v19 = vpop.f32.mrf.mxu2  ;;  %v826_v63 = vpop.f32.mrf.mxu3 }
 0x1a1   :  { %v833_v5 = vadd.f32 %v826_v63, %v4781_v31  ;;  %v789_v27 = vpop.f32.mrf.mxu0  ;;  %v802_v55 = vpop.f32.mrf.mxu1  ;;  %v832_v0 = vadd.f32 %v813_v19, %v4779_v30 }
 0x1a3   :  { %v3549_v12 = vmul.f32 -1.442695, %v833_v5 }
 0x1a4   :  { %v4029_v46 = vpop.eup %4028 }
 0x1a5   :  { %v4031_v18 = vpop.eup %4030  ;;  %v837_v16 = vadd.f32 1.0, %v4029_v46  ;;  %4032 = vpow2.f32 %v3549_v12 }
 0x1a6   :  { %v856_v11 = vadd.f32 1.0, %v4031_v18 }
 0x1a7   :  { %4034 = vrcp.f32 %v837_v16  ;;  %v849_v62 = vand.u32 2147483648, %v837_v16  ;;  %v847_v24 = vand.u32 2147483647, %v837_v16  ;;  %vm843_vm14 = vweird.f32 %v837_v16 }
 0x1a8   :  { %4036 = vrcp.f32 %v856_v11  ;;  %v815_v28 = vpop.f32.mrf.mxu2  ;;  %v828_v29 = vpop.f32.mrf.mxu3  ;;  %v868_v25 = vand.u32 2147483648, %v856_v11  ;;  %v866_v5 = vand.u32 2147483647, %v856_v11  ;;  %vm862_vm15 = vweird.f32 %v856_v11 }
 0x1a9   :  { %v850_v30 = vor.u32 1.1754944e-38, %v849_v62  ;;  %vm848_vm2 = vcmp.eq.f32.partialorder %v847_v24, 8.507059e+37 }
 0x1aa   :  { %v869_v46 = vor.u32 1.1754944e-38, %v868_v25  ;;  %vm867_vm3 = vcmp.eq.f32.partialorder %v866_v5, 8.507059e+37 }
 0x1ab   :  { %v4033_v58 = vpop.eup %4032 }
 0x1ac   :  { %v876_v54 = vadd.f32 1.0, %v4033_v58 }
 0x1ad   :  { %v4035_v23 = vpop.eup %4034 }
 0x1ae   :  { %v4037_v17 = vpop.eup %4036  ;;  %v839_v45 = vmul.f32 %v4035_v23, %v837_v16  ;;  %4038 = vrcp.f32 %v876_v54  ;;  %vm844_vm12 = vweird.f32 %v4035_v23  ;;  %v888_v62 = vand.u32 2147483648, %v876_v54 }
 0x1af   :  { %v858_v31 = vmul.f32 %v4037_v17, %v856_v11  ;;  %4040 = vtanh.f32 %v832_v0  ;;  %vm863_vm13 = vweird.f32 %v4037_v17  ;;  %vm845_vm0 = vmor %vm843_vm14, %vm844_vm12  ;;  %vm882_vm5 = vweird.f32 %v876_v54 }
 0x1b0   :  { %v840_v42 = vsub.f32 1.0, %v839_v45  ;;  %vm864_vm1 = vmor %vm862_vm15, %vm863_vm13 }
 0x1b1   :  { %v859_v56 = vsub.f32 1.0, %v858_v31 }
 0x1b2   :  { %v841_v6 = vmul.f32 %v4035_v23, %v840_v42 }
 0x1b3   :  { %v860_v63 = vmul.f32 %v4037_v17, %v859_v56 }
 0x1b4   :  { %v4039_v27 = vpop.eup %4038  ;;  %v842_v55 = vadd.f32 %v4035_v23, %v841_v6  ;;  %v889_v6 = vor.u32 1.1754944e-38, %v888_v62 }
 0x1b5   :  { %v861_v19 = vadd.f32 %v4037_v17, %v860_v63  ;;  %v878_v12 = vmul.f32 %v4039_v27, %v876_v54  ;;  %v4041_v28 = vpop.eup %4040  ;;  %vm883_vm4 = vweird.f32 %v4039_v27 }
 0x1b6   :  { %v846_v18 = vsel %vm845_vm0, %v4035_v23, %v842_v55  ;;  %v886_v23 = vand.u32 2147483647, %v876_v54  ;;  %vm884_vm6 = vmor %vm882_vm5, %vm883_vm4 }
 0x1b7   :  { %v851_v29 = vsel %vm848_vm2, %v850_v30, %v846_v18  ;;  %v865_v58 = vsel %vm864_vm1, %v4037_v17, %v861_v19  ;;  %v879_v0 = vsub.f32 1.0, %v878_v12 }
 0x1b8   :  { %v870_v45 = vsel %vm867_vm3, %v869_v46, %v865_v58  ;;  %v893_v31 = vmul.f32 %v4041_v28, %v851_v29  ;;  %vm887_vm7 = vcmp.eq.f32.partialorder %v886_v23, 8.507059e+37 }
 0x1b9   :  { %v892_v42 = vmul.f32 %v870_v45, %v4834_v57  ;;  %v880_v56 = vmul.f32 %v4039_v27, %v879_v0 }
 0x1bb   :  { %v4878_v16 = vadd.f32 %v893_v31, %v892_v42  ;;  %v881_v11 = vadd.f32 %v4039_v27, %v880_v56 }
 0x1bd   :  { %4042 = vtanh.f32 %v4878_v16  ;;  %v885_v25 = vsel %vm884_vm6, %v4039_v27, %v881_v11 }
 0x1be   :  { %v890_v24 = vsel %vm887_vm7, %v889_v6, %v885_v25 }
 0x1c3   :  { %v4043_v17 = vpop.eup %4042 }
 0x1c4   :  { %v4881_v63 = vmul.f32 %v4043_v17, %v890_v24 }
 0x1c6   :  { %v906_v57 = vpack.c.bf16 %v4881_v63, %v4881_v63 }
 0x1c8   :  { %915 = vmatmul.bf16.vlgmr.msrb.gmra.mxu0 %v906_v57  ;;  %928 = vmatmul.bf16.vlgmr.msrb.gmra.mxu1 %v906_v57 }
 0x1c9   :  { %941 = vmatmul.bf16.vlgmr.msrb.gmra.mxu2 %v906_v57  ;;  %954 = vmatmul.bf16.vlgmr.msrb.gmra.mxu3 %v906_v57 }
 0x1ca   :  { %1165 = vmatpush.bf16.msrb.mxu0 %v4603_v37  ;;  %1178 = vmatpush.bf16.msrb.mxu1 %v4605_v41 }
 0x1cb   :  { %1191 = vmatpush.bf16.msrb.mxu2 %v4607_v47  ;;  %1204 = vmatpush.bf16.msrb.mxu3 %v4610_v48 }
 0x1ce   :  { %1166 = vmatpush.bf16.msrb.mxu0 %v4612_v49  ;;  %1179 = vmatpush.bf16.msrb.mxu1 %v4615_v53 }
 0x1cf   :  { %1192 = vmatpush.bf16.msrb.mxu2 %v4618_v59  ;;  %1205 = vmatpush.bf16.msrb.mxu3 %v4622_v60 }
 0x1d2   :  { %1167 = vmatpush.bf16.msrb.mxu0 %v4624_v61  ;;  %1180 = vmatpush.bf16.msrb.mxu1 %v4627_v1 }
 0x1d3   :  { %1193 = vmatpush.bf16.msrb.mxu2 %v4630_v7  ;;  %1206 = vmatpush.bf16.msrb.mxu3 %v4634_v8 }
 0x1d6   :  { %1168 = vmatpush.bf16.msrb.mxu0 %v4636_v9  ;;  %1181 = vmatpush.bf16.msrb.mxu1 %v4639_v13 }
 0x1d7   :  { %1194 = vmatpush.bf16.msrb.mxu2 %v4645_v20  ;;  %1207 = vmatpush.bf16.msrb.mxu3 %v4649_v21 }
 0x1da   :  { %1169 = vmatpush.bf16.msrb.mxu0 %v4651_v22  ;;  %1182 = vmatpush.bf16.msrb.mxu1 %v4654_v26 }
 0x1db   :  { %1195 = vmatpush.bf16.msrb.mxu2 %v4657_v32  ;;  %1208 = vmatpush.bf16.msrb.mxu3 %v4661_v33 }
 0x1de   :  { %1170 = vmatpush.bf16.msrb.mxu0 %v4663_v34  ;;  %1183 = vmatpush.bf16.msrb.mxu1 %v4666_v35 }
 0x1df   :  { %1196 = vmatpush.bf16.msrb.mxu2 %v4678_v52  ;;  %1209 = vmatpush.bf16.msrb.mxu3 %v4671_v43 }
 0x1e2   :  { %1171 = vmatpush.bf16.msrb.mxu0 %v4673_v44  ;;  %1184 = vmatpush.bf16.msrb.mxu1 %v4676_v51 }
 0x1e3   :  { %1197 = vmatpush.bf16.msrb.mxu2 %v4687_v4  ;;  %1210 = vmatpush.bf16.msrb.mxu3 %v4683_v2 }
 0x1e6   :  { %1172 = vmatpush.bf16.msrb.mxu0 %v4685_v3  ;;  %1185 = vmatpush.bf16.msrb.mxu1 %v4690_v10 }
 0x1e7   :  { %1198 = vmatpush.bf16.msrb.mxu2 %v4693_v14  ;;  %1211 = vmatpush.bf16.msrb.mxu3 %v4697_v15 }
 0x245   :  { %v916_v54 = vpop.f32.mrf.mxu0  ;;  %v929_v5 = vpop.f32.mrf.mxu1 }
 0x246   :  { %v959_v27 = vadd.f32 %v916_v54, %v4783_v36  ;;  %v960_v55 = vadd.f32 %v929_v5, %v4785_v38 }
 0x248   :  { %v3550_v30 = vmul.f32 -1.442695, %v959_v27  ;;  %v3551_v19 = vmul.f32 -1.442695, %v960_v55 }
 0x24a   :  { %4044 = vpow2.f32 %v3550_v30 }
 0x24b   :  { %4046 = vpow2.f32 %v3551_v19 }
 0x24c   :  { %v942_v12 = vpop.f32.mrf.mxu2  ;;  %v955_v46 = vpop.f32.mrf.mxu3 }
 0x24d   :  { %v962_v18 = vadd.f32 %v955_v46, %v4789_v40  ;;  %v918_v28 = vpop.f32.mrf.mxu0  ;;  %v931_v29 = vpop.f32.mrf.mxu1  ;;  %v961_v23 = vadd.f32 %v942_v12, %v4787_v39 }
 0x24f   :  { %v3552_v58 = vmul.f32 -1.442695, %v962_v18 }
 0x250   :  { %v4045_v0 = vpop.eup %4044 }
 0x251   :  { %v4047_v45 = vpop.eup %4046  ;;  %v966_v31 = vadd.f32 1.0, %v4045_v0  ;;  %4048 = vpow2.f32 %v3552_v58 }
 0x252   :  { %v985_v42 = vadd.f32 1.0, %v4047_v45 }
 0x253   :  { %4050 = vrcp.f32 %v966_v31  ;;  %v978_v57 = vand.u32 2147483648, %v966_v31  ;;  %v976_v27 = vand.u32 2147483647, %v966_v31  ;;  %vm972_vm10 = vweird.f32 %v966_v31 }
 0x254   :  { %4052 = vrcp.f32 %v985_v42  ;;  %v944_v36 = vpop.f32.mrf.mxu2  ;;  %v957_v38 = vpop.f32.mrf.mxu3  ;;  %v997_v54 = vand.u32 2147483648, %v985_v42  ;;  %v995_v30 = vand.u32 2147483647, %v985_v42  ;;  %vm991_vm11 = vweird.f32 %v985_v42 }
 0x255   :  { %v979_v39 = vor.u32 1.1754944e-38, %v978_v57  ;;  %vm977_vm14 = vcmp.eq.f32.partialorder %v976_v27, 8.507059e+37  ;;  %v5686_v27 = vld [vmem:[#allocation11_spill] sm:$0xff] }
 0x256   :  { %v998_v28 = vor.u32 1.1754944e-38, %v997_v54  ;;  %vm996_vm15 = vcmp.eq.f32.partialorder %v995_v30, 8.507059e+37  ;;  %v5687_v30 = vld [vmem:[#allocation12_spill] sm:$0xff] }
 0x257   :  { %v4049_v56 = vpop.eup %4048 }
 0x258   :  { %v1005_v11 = vadd.f32 1.0, %v4049_v56 }
 0x259   :  { %v4051_v62 = vpop.eup %4050 }
 0x25a   :  { %v4053_v25 = vpop.eup %4052  ;;  %v968_v6 = vmul.f32 %v4051_v62, %v966_v31  ;;  %4054 = vrcp.f32 %v1005_v11  ;;  %vm973_vm8 = vweird.f32 %v4051_v62  ;;  %vm1011_vm1 = vweird.f32 %v1005_v11 }
 0x25b   :  { %v987_v40 = vmul.f32 %v4053_v25, %v985_v42  ;;  %4056 = vtanh.f32 %v961_v23  ;;  %vm992_vm9 = vweird.f32 %v4053_v25  ;;  %vm974_vm12 = vmor %vm972_vm10, %vm973_vm8 }
 0x25c   :  { %v969_v17 = vsub.f32 1.0, %v968_v6  ;;  %vm993_vm13 = vmor %vm991_vm11, %vm992_vm9 }
 0x25d   :  { %v988_v24 = vsub.f32 1.0, %v987_v40  ;;  %v1017_v40 = vand.u32 2147483648, %v1005_v11 }
 0x25e   :  { %v970_v5 = vmul.f32 %v4051_v62, %v969_v17 }
 0x25f   :  { %v989_v55 = vmul.f32 %v4053_v25, %v988_v24  ;;  %v1018_v24 = vor.u32 1.1754944e-38, %v1017_v40 }
 0x260   :  { %v4055_v19 = vpop.eup %4054  ;;  %v971_v46 = vadd.f32 %v4051_v62, %v970_v5 }
 0x261   :  { %v990_v12 = vadd.f32 %v4053_v25, %v989_v55  ;;  %v1007_v18 = vmul.f32 %v4055_v19, %v1005_v11  ;;  %v4057_v58 = vpop.eup %4056  ;;  %vm1012_vm0 = vweird.f32 %v4055_v19 }
 0x262   :  { %v975_v29 = vsel %vm974_vm12, %v4051_v62, %v971_v46  ;;  %v1015_v62 = vand.u32 2147483647, %v1005_v11  ;;  %vm1013_vm2 = vmor %vm1011_vm1, %vm1012_vm0 }
 0x263   :  { %v980_v0 = vsel %vm977_vm14, %v979_v39, %v975_v29  ;;  %v994_v45 = vsel %vm993_vm13, %v4053_v25, %v990_v12  ;;  %v1008_v36 = vsub.f32 1.0, %v1007_v18 }
 0x264   :  { %v999_v38 = vsel %vm996_vm15, %v998_v28, %v994_v45  ;;  %v1022_v56 = vmul.f32 %v4057_v58, %v980_v0  ;;  %vm1016_vm3 = vcmp.eq.f32.partialorder %v1015_v62, 8.507059e+37  ;;  %v5688_v28 = vld [vmem:[#allocation14_spill] sm:$0xff] }
 0x265   :  { %v1021_v23 = vmul.f32 %v999_v38, %v4878_v16  ;;  %v1009_v6 = vmul.f32 %v4055_v19, %v1008_v36 }
 0x267   :  { %v4922_v31 = vadd.f32 %v1022_v56, %v1021_v23  ;;  %v1010_v42 = vadd.f32 %v4055_v19, %v1009_v6 }
 0x269   :  { %4058 = vtanh.f32 %v4922_v31  ;;  %v1014_v17 = vsel %vm1013_vm2, %v4055_v19, %v1010_v42 }
 0x26a   :  { %v1019_v57 = vsel %vm1016_vm3, %v1018_v24, %v1014_v17  ;;  %v5689_v24 = vld [vmem:[#allocation13_spill] sm:$0xff] }
 0x26f   :  { %v4059_v25 = vpop.eup %4058 }
 0x270   :  { %v4925_v54 = vmul.f32 %v4059_v25, %v1019_v57 }
 0x272   :  { %v1035_v16 = vpack.c.bf16 %v4925_v54, %v4925_v54 }
 0x274   :  { %1044 = vmatmul.bf16.vlgmr.msra.gmra.mxu0 %v1035_v16  ;;  %1057 = vmatmul.bf16.vlgmr.msra.gmra.mxu1 %v1035_v16 }
 0x275   :  { %1070 = vmatmul.bf16.vlgmr.msra.gmra.mxu2 %v1035_v16  ;;  %1083 = vmatmul.bf16.vlgmr.msra.gmra.mxu3 %v1035_v16 }
 0x276   :  { %1294 = vmatpush.bf16.msra.mxu0 %v4603_v37  ;;  %1307 = vmatpush.bf16.msra.mxu1 %v4605_v41 }
 0x277   :  { %1320 = vmatpush.bf16.msra.mxu2 %v4607_v47  ;;  %1333 = vmatpush.bf16.msra.mxu3 %v4610_v48 }
 0x27a   :  { %1295 = vmatpush.bf16.msra.mxu0 %v4612_v49  ;;  %1308 = vmatpush.bf16.msra.mxu1 %v4615_v53 }
 0x27b   :  { %1321 = vmatpush.bf16.msra.mxu2 %v4618_v59  ;;  %1334 = vmatpush.bf16.msra.mxu3 %v4622_v60 }
 0x27e   :  { %1296 = vmatpush.bf16.msra.mxu0 %v4624_v61  ;;  %1309 = vmatpush.bf16.msra.mxu1 %v4627_v1 }
 0x27f   :  { %1322 = vmatpush.bf16.msra.mxu2 %v4630_v7  ;;  %1335 = vmatpush.bf16.msra.mxu3 %v4634_v8 }
 0x282   :  { %1297 = vmatpush.bf16.msra.mxu0 %v4636_v9  ;;  %1310 = vmatpush.bf16.msra.mxu1 %v4639_v13 }
 0x283   :  { %1323 = vmatpush.bf16.msra.mxu2 %v4645_v20  ;;  %1336 = vmatpush.bf16.msra.mxu3 %v4649_v21 }
 0x286   :  { %1298 = vmatpush.bf16.msra.mxu0 %v4651_v22  ;;  %1311 = vmatpush.bf16.msra.mxu1 %v4654_v26 }
 0x287   :  { %1324 = vmatpush.bf16.msra.mxu2 %v4657_v32  ;;  %1337 = vmatpush.bf16.msra.mxu3 %v4661_v33 }
 0x28a   :  { %1299 = vmatpush.bf16.msra.mxu0 %v4663_v34  ;;  %1312 = vmatpush.bf16.msra.mxu1 %v4666_v35 }
 0x28b   :  { %1325 = vmatpush.bf16.msra.mxu2 %v4678_v52  ;;  %1338 = vmatpush.bf16.msra.mxu3 %v4671_v43 }
 0x28e   :  { %1300 = vmatpush.bf16.msra.mxu0 %v4673_v44  ;;  %1313 = vmatpush.bf16.msra.mxu1 %v4676_v51 }
 0x28f   :  { %1326 = vmatpush.bf16.msra.mxu2 %v4687_v4  ;;  %1339 = vmatpush.bf16.msra.mxu3 %v4683_v2 }
 0x292   :  { %1301 = vmatpush.bf16.msra.mxu0 %v4685_v3  ;;  %1314 = vmatpush.bf16.msra.mxu1 %v4690_v10 }
 0x293   :  { %1327 = vmatpush.bf16.msra.mxu2 %v4693_v14  ;;  %1340 = vmatpush.bf16.msra.mxu3 %v4697_v15 }
 0x2f1   :  { %v1045_v11 = vpop.f32.mrf.mxu0  ;;  %v1058_v5 = vpop.f32.mrf.mxu1 }
 0x2f2   :  { %v1088_v55 = vadd.f32 %v1045_v11, %v5686_v27  ;;  %v1089_v19 = vadd.f32 %v1058_v5, %v5687_v30 }
 0x2f4   :  { %v3553_v46 = vmul.f32 -1.442695, %v1088_v55  ;;  %v3554_v39 = vmul.f32 -1.442695, %v1089_v19 }
 0x2f6   :  { %4060 = vpow2.f32 %v3553_v46 }
 0x2f7   :  { %4062 = vpow2.f32 %v3554_v39 }
 0x2f8   :  { %v1071_v12 = vpop.f32.mrf.mxu2  ;;  %v1084_v18 = vpop.f32.mrf.mxu3 }
 0x2f9   :  { %v1091_v29 = vadd.f32 %v1084_v18, %v5688_v28  ;;  %v1047_v58 = vpop.f32.mrf.mxu0  ;;  %v1060_v0 = vpop.f32.mrf.mxu1  ;;  %v1090_v25 = vadd.f32 %v1071_v12, %v5689_v24 }
 0x2fb   :  { %v3555_v45 = vmul.f32 -1.442695, %v1091_v29 }
 0x2fc   :  { %v4061_v36 = vpop.eup %4060 }
 0x2fd   :  { %v4063_v38 = vpop.eup %4062  ;;  %v1095_v56 = vadd.f32 1.0, %v4061_v36  ;;  %4064 = vpow2.f32 %v3555_v45 }
 0x2fe   :  { %v1114_v23 = vadd.f32 1.0, %v4063_v38 }
 0x2ff   :  { %4066 = vrcp.f32 %v1095_v56  ;;  %v1107_v55 = vand.u32 2147483648, %v1095_v56  ;;  %v1105_v46 = vand.u32 2147483647, %v1095_v56  ;;  %vm1101_vm6 = vweird.f32 %v1095_v56 }
 0x300   :  { %4068 = vrcp.f32 %v1114_v23  ;;  %v1073_v6 = vpop.f32.mrf.mxu2  ;;  %v1086_v42 = vpop.f32.mrf.mxu3  ;;  %v1126_v30 = vand.u32 2147483648, %v1114_v23  ;;  %v1124_v18 = vand.u32 2147483647, %v1114_v23  ;;  %vm1120_vm7 = vweird.f32 %v1114_v23 }
 0x301   :  { %v1108_v12 = vor.u32 1.1754944e-38, %v1107_v55  ;;  %vm1106_vm10 = vcmp.eq.f32.partialorder %v1105_v46, 8.507059e+37 }
 0x302   :  { %v1127_v45 = vor.u32 1.1754944e-38, %v1126_v30  ;;  %vm1125_vm11 = vcmp.eq.f32.partialorder %v1124_v18, 8.507059e+37 }
 0x303   :  { %v4065_v40 = vpop.eup %4064 }
 0x304   :  { %v1134_v62 = vadd.f32 1.0, %v4065_v40 }
 0x305   :  { %v4067_v17 = vpop.eup %4066 }
 0x306   :  { %v4069_v57 = vpop.eup %4068  ;;  %v1097_v16 = vmul.f32 %v4067_v17, %v1095_v56  ;;  %4070 = vrcp.f32 %v1134_v62  ;;  %vm1102_vm4 = vweird.f32 %v4067_v17  ;;  %vm1140_vm13 = vweird.f32 %v1134_v62 }
 0x307   :  { %v1116_v11 = vmul.f32 %v4069_v57, %v1114_v23  ;;  %4072 = vtanh.f32 %v1090_v25  ;;  %vm1121_vm5 = vweird.f32 %v4069_v57  ;;  %vm1103_vm8 = vmor %vm1101_vm6, %vm1102_vm4 }
 0x308   :  { %v1098_v5 = vsub.f32 1.0, %v1097_v16  ;;  %vm1122_vm9 = vmor %vm1120_vm7, %vm1121_vm5 }
 0x309   :  { %v1117_v27 = vsub.f32 1.0, %v1116_v11 }
 0x30a   :  { %v1099_v19 = vmul.f32 %v4067_v17, %v1098_v5  ;;  %v1146_v5 = vand.u32 2147483648, %v1134_v62 }
 0x30b   :  { %v1118_v39 = vmul.f32 %v4069_v57, %v1117_v27 }
 0x30c   :  { %v4071_v28 = vpop.eup %4070  ;;  %v1100_v29 = vadd.f32 %v4067_v17, %v1099_v19  ;;  %v1147_v55 = vor.u32 1.1754944e-38, %v1146_v5 }
 0x30d   :  { %v1119_v58 = vadd.f32 %v4069_v57, %v1118_v39  ;;  %v1136_v0 = vmul.f32 %v4071_v28, %v1134_v62  ;;  %v4073_v38 = vpop.eup %4072  ;;  %vm1141_vm12 = vweird.f32 %v4071_v28  ;;  %v5690_v39 = vld [vmem:[#allocation15_spill] sm:$0xff] }
 0x30e   :  { %v1104_v36 = vsel %vm1103_vm8, %v4067_v17, %v1100_v29  ;;  %v1144_v17 = vand.u32 2147483647, %v1134_v62  ;;  %vm1142_vm14 = vmor %vm1140_vm13, %vm1141_vm12 }
 0x30f   :  { %v1109_v6 = vsel %vm1106_vm10, %v1108_v12, %v1104_v36  ;;  %v1123_v42 = vsel %vm1122_vm9, %v4069_v57, %v1119_v58  ;;  %v1137_v40 = vsub.f32 1.0, %v1136_v0  ;;  %v5692_v36 = vld [vmem:[#allocation18_spill] sm:$0xff] }
 0x310   :  { %v1128_v24 = vsel %vm1125_vm11, %v1127_v45, %v1123_v42  ;;  %v1151_v25 = vmul.f32 %v4073_v38, %v1109_v6  ;;  %vm1145_vm15 = vcmp.eq.f32.partialorder %v1144_v17, 8.507059e+37 }
 0x311   :  { %v1150_v16 = vmul.f32 %v1128_v24, %v4922_v31  ;;  %v1138_v11 = vmul.f32 %v4071_v28, %v1137_v40 }
 0x313   :  { %v4966_v56 = vadd.f32 %v1151_v25, %v1150_v16  ;;  %v1139_v23 = vadd.f32 %v4071_v28, %v1138_v11 }
 0x315   :  { %4074 = vtanh.f32 %v4966_v56  ;;  %v1143_v27 = vsel %vm1142_vm14, %v4071_v28, %v1139_v23  ;;  %v5691_v28 = vld [vmem:[#allocation16_spill] sm:$0xff] }
 0x316   :  { %v1148_v30 = vsel %vm1145_vm15, %v1147_v55, %v1143_v27 }
 0x31b   :  { %v4075_v57 = vpop.eup %4074 }
 0x31c   :  { %v4969_v19 = vmul.f32 %v4075_v57, %v1148_v30  ;;  %v5693_v57 = vld [vmem:[#allocation17_spill] sm:$0xff] }
 0x31e   :  { %v1164_v31 = vpack.c.bf16 %v4969_v19, %v4969_v19 }
 0x320   :  { %1173 = vmatmul.bf16.vlgmr.msrb.gmra.mxu0 %v1164_v31  ;;  %1186 = vmatmul.bf16.vlgmr.msrb.gmra.mxu1 %v1164_v31 }
 0x321   :  { %1199 = vmatmul.bf16.vlgmr.msrb.gmra.mxu2 %v1164_v31  ;;  %1212 = vmatmul.bf16.vlgmr.msrb.gmra.mxu3 %v1164_v31 }
 0x322   :  { %1423 = vmatpush.bf16.msrb.mxu0 %v4603_v37  ;;  %1436 = vmatpush.bf16.msrb.mxu1 %v4605_v41 }
 0x323   :  { %1449 = vmatpush.bf16.msrb.mxu2 %v4607_v47  ;;  %1462 = vmatpush.bf16.msrb.mxu3 %v4610_v48 }
 0x326   :  { %1424 = vmatpush.bf16.msrb.mxu0 %v4612_v49  ;;  %1437 = vmatpush.bf16.msrb.mxu1 %v4615_v53 }
 0x327   :  { %1450 = vmatpush.bf16.msrb.mxu2 %v4618_v59  ;;  %1463 = vmatpush.bf16.msrb.mxu3 %v4622_v60 }
 0x32a   :  { %1425 = vmatpush.bf16.msrb.mxu0 %v4624_v61  ;;  %1438 = vmatpush.bf16.msrb.mxu1 %v4627_v1 }
 0x32b   :  { %1451 = vmatpush.bf16.msrb.mxu2 %v4630_v7  ;;  %1464 = vmatpush.bf16.msrb.mxu3 %v4634_v8 }
 0x32e   :  { %1426 = vmatpush.bf16.msrb.mxu0 %v4636_v9  ;;  %1439 = vmatpush.bf16.msrb.mxu1 %v4639_v13 }
 0x32f   :  { %1452 = vmatpush.bf16.msrb.mxu2 %v4645_v20  ;;  %1465 = vmatpush.bf16.msrb.mxu3 %v4649_v21 }
 0x332   :  { %1427 = vmatpush.bf16.msrb.mxu0 %v4651_v22  ;;  %1440 = vmatpush.bf16.msrb.mxu1 %v4654_v26 }
 0x333   :  { %1453 = vmatpush.bf16.msrb.mxu2 %v4657_v32  ;;  %1466 = vmatpush.bf16.msrb.mxu3 %v4661_v33 }
 0x336   :  { %1428 = vmatpush.bf16.msrb.mxu0 %v4663_v34  ;;  %1441 = vmatpush.bf16.msrb.mxu1 %v4666_v35 }
 0x337   :  { %1454 = vmatpush.bf16.msrb.mxu2 %v4678_v52  ;;  %1467 = vmatpush.bf16.msrb.mxu3 %v4671_v43 }
 0x33a   :  { %1429 = vmatpush.bf16.msrb.mxu0 %v4673_v44  ;;  %1442 = vmatpush.bf16.msrb.mxu1 %v4676_v51 }
 0x33b   :  { %1455 = vmatpush.bf16.msrb.mxu2 %v4687_v4  ;;  %1468 = vmatpush.bf16.msrb.mxu3 %v4683_v2 }
 0x33e   :  { %1430 = vmatpush.bf16.msrb.mxu0 %v4685_v3  ;;  %1443 = vmatpush.bf16.msrb.mxu1 %v4690_v10 }
 0x33f   :  { %1456 = vmatpush.bf16.msrb.mxu2 %v4693_v14  ;;  %1469 = vmatpush.bf16.msrb.mxu3 %v4697_v15 }
 0x39d   :  { %v1174_v62 = vpop.f32.mrf.mxu0  ;;  %v1187_v46 = vpop.f32.mrf.mxu1 }
 0x39e   :  { %v1217_v18 = vadd.f32 %v1174_v62, %v5690_v39  ;;  %v1218_v29 = vadd.f32 %v1187_v46, %v5691_v28 }
 0x3a0   :  { %v3556_v12 = vmul.f32 -1.442695, %v1217_v18  ;;  %v3557_v58 = vmul.f32 -1.442695, %v1218_v29 }
 0x3a2   :  { %4076 = vpow2.f32 %v3556_v12 }
 0x3a3   :  { %4078 = vpow2.f32 %v3557_v58 }
 0x3a4   :  { %v1200_v0 = vpop.f32.mrf.mxu2  ;;  %v1213_v45 = vpop.f32.mrf.mxu3 }
 0x3a5   :  { %v1220_v38 = vadd.f32 %v1213_v45, %v5692_v36  ;;  %v1176_v6 = vpop.f32.mrf.mxu0  ;;  %v1189_v42 = vpop.f32.mrf.mxu1  ;;  %v1219_v30 = vadd.f32 %v1200_v0, %v5693_v57 }
 0x3a7   :  { %v3558_v40 = vmul.f32 -1.442695, %v1220_v38 }
 0x3a8   :  { %v4077_v24 = vpop.eup %4076 }
 0x3a9   :  { %v4079_v25 = vpop.eup %4078  ;;  %v1224_v16 = vadd.f32 1.0, %v4077_v24  ;;  %4080 = vpow2.f32 %v3558_v40 }
 0x3aa   :  { %v1243_v11 = vadd.f32 1.0, %v4079_v25 }
 0x3ab   :  { %4082 = vrcp.f32 %v1224_v16  ;;  %v1236_v28 = vand.u32 2147483648, %v1224_v16  ;;  %v1234_v58 = vand.u32 2147483647, %v1224_v16  ;;  %vm1230_vm2 = vweird.f32 %v1224_v16 }
 0x3ac   :  { %4084 = vrcp.f32 %v1243_v11  ;;  %v1202_v23 = vpop.f32.mrf.mxu2  ;;  %v1215_v5 = vpop.f32.mrf.mxu3  ;;  %v1255_v29 = vand.u32 2147483648, %v1243_v11  ;;  %v1253_v36 = vand.u32 2147483647, %v1243_v11  ;;  %vm1249_vm3 = vweird.f32 %v1243_v11 }
 0x3ad   :  { %v1237_v0 = vor.u32 1.1754944e-38, %v1236_v28  ;;  %vm1235_vm6 = vcmp.eq.f32.partialorder %v1234_v58, 8.507059e+37 }
 0x3ae   :  { %v1256_v24 = vor.u32 1.1754944e-38, %v1255_v29  ;;  %vm1254_vm7 = vcmp.eq.f32.partialorder %v1253_v36, 8.507059e+37 }
 0x3af   :  { %v4081_v17 = vpop.eup %4080 }
 0x3b0   :  { %v1263_v27 = vadd.f32 1.0, %v4081_v17 }
 0x3b1   :  { %v4083_v55 = vpop.eup %4082 }
 0x3b2   :  { %v4085_v31 = vpop.eup %4084  ;;  %v1226_v62 = vmul.f32 %v4083_v55, %v1224_v16  ;;  %4086 = vrcp.f32 %v1263_v27  ;;  %vm1231_vm0 = vweird.f32 %v4083_v55  ;;  %vm1269_vm9 = vweird.f32 %v1263_v27 }
 0x3b3   :  { %v1245_v46 = vmul.f32 %v4085_v31, %v1243_v11  ;;  %4088 = vtanh.f32 %v1219_v30  ;;  %vm1250_vm1 = vweird.f32 %v4085_v31  ;;  %vm1232_vm4 = vmor %vm1230_vm2, %vm1231_vm0 }
 0x3b4   :  { %v1227_v39 = vsub.f32 1.0, %v1226_v62  ;;  %vm1251_vm5 = vmor %vm1249_vm3, %vm1250_vm1 }
 0x3b5   :  { %v1246_v18 = vsub.f32 1.0, %v1245_v46 }
 0x3b6   :  { %v1228_v12 = vmul.f32 %v4083_v55, %v1227_v39 }
 0x3b7   :  { %v1247_v45 = vmul.f32 %v4085_v31, %v1246_v18  ;;  %v1275_v18 = vand.u32 2147483648, %v1263_v27 }
 0x3b8   :  { %v4087_v38 = vpop.eup %4086  ;;  %v1229_v6 = vadd.f32 %v4083_v55, %v1228_v12 }
 0x3b9   :  { %v1248_v42 = vadd.f32 %v4085_v31, %v1247_v45  ;;  %v1265_v40 = vmul.f32 %v4087_v38, %v1263_v27  ;;  %v4089_v23 = vpop.eup %4088  ;;  %vm1270_vm8 = vweird.f32 %v4087_v38  ;;  %v1276_v29 = vor.u32 1.1754944e-38, %v1275_v18 }
 0x3ba   :  { %v1233_v25 = vsel %vm1232_vm4, %v4083_v55, %v1229_v6  ;;  %v1273_v55 = vand.u32 2147483647, %v1263_v27  ;;  %vm1271_vm10 = vmor %vm1269_vm9, %vm1270_vm8 }
 0x3bb   :  { %v1238_v5 = vsel %vm1235_vm6, %v1237_v0, %v1233_v25  ;;  %v1252_v17 = vsel %vm1251_vm5, %v4085_v31, %v1248_v42  ;;  %v1266_v57 = vsub.f32 1.0, %v1265_v40 }
 0x3bc   :  { %v1257_v30 = vsel %vm1254_vm7, %v1256_v24, %v1252_v17  ;;  %v1280_v62 = vmul.f32 %v4089_v23, %v1238_v5  ;;  %vm1274_vm11 = vcmp.eq.f32.partialorder %v1273_v55, 8.507059e+37 }
 0x3bd   :  { %v1279_v46 = vmul.f32 %v1257_v30, %v4966_v56  ;;  %v1267_v39 = vmul.f32 %v4087_v38, %v1266_v57 }
 0x3bf   :  { %v5010_v16 = vadd.f32 %v1280_v62, %v1279_v46  ;;  %v1268_v11 = vadd.f32 %v4087_v38, %v1267_v39 }
 0x3c1   :  { %4090 = vtanh.f32 %v5010_v16  ;;  %v1272_v28 = vsel %vm1271_vm10, %v4087_v38, %v1268_v11 }
 0x3c2   :  { %v1277_v12 = vsel %vm1274_vm11, %v1276_v29, %v1272_v28 }
 0x3c7   :  { %v4091_v31 = vpop.eup %4090 }
 0x3c8   :  { %v5013_v58 = vmul.f32 %v4091_v31, %v1277_v12 }
 0x3ca   :  { %v1293_v56 = vpack.c.bf16 %v5013_v58, %v5013_v58 }
 0x3cc   :  { %1302 = vmatmul.bf16.vlgmr.msra.gmra.mxu0 %v1293_v56  ;;  %1315 = vmatmul.bf16.vlgmr.msra.gmra.mxu1 %v1293_v56 }
 0x3cd   :  { %1328 = vmatmul.bf16.vlgmr.msra.gmra.mxu2 %v1293_v56  ;;  %1341 = vmatmul.bf16.vlgmr.msra.gmra.mxu3 %v1293_v56 }
 0x3ce   :  { %1552 = vmatpush.bf16.msra.mxu0 %v4603_v37  ;;  %1565 = vmatpush.bf16.msra.mxu1 %v4605_v41 }
 0x3cf   :  { %1578 = vmatpush.bf16.msra.mxu2 %v4607_v47  ;;  %1591 = vmatpush.bf16.msra.mxu3 %v4610_v48  ;;  %v5694_v47 = vld [vmem:[#allocation19_spill] sm:$0xff] }
 0x3d2   :  { %1553 = vmatpush.bf16.msra.mxu0 %v4612_v49  ;;  %1566 = vmatpush.bf16.msra.mxu1 %v4615_v53  ;;  %v5695_v49 = vld [vmem:[#allocation20_spill] sm:$0xff] }
 0x3d3   :  { %1579 = vmatpush.bf16.msra.mxu2 %v4618_v59  ;;  %1592 = vmatpush.bf16.msra.mxu3 %v4622_v60 }
 0x3d6   :  { %1554 = vmatpush.bf16.msra.mxu0 %v4624_v61  ;;  %1567 = vmatpush.bf16.msra.mxu1 %v4627_v1 }
 0x3d7   :  { %1580 = vmatpush.bf16.msra.mxu2 %v4630_v7  ;;  %1593 = vmatpush.bf16.msra.mxu3 %v4634_v8  ;;  %v5696_v7 = vld [vmem:[#allocation22_spill] sm:$0xff] }
 0x3da   :  { %1555 = vmatpush.bf16.msra.mxu0 %v4636_v9  ;;  %1568 = vmatpush.bf16.msra.mxu1 %v4639_v13 }
 0x3db   :  { %1581 = vmatpush.bf16.msra.mxu2 %v4645_v20  ;;  %1594 = vmatpush.bf16.msra.mxu3 %v4649_v21 }
 0x3de   :  { %1556 = vmatpush.bf16.msra.mxu0 %v4651_v22  ;;  %1569 = vmatpush.bf16.msra.mxu1 %v4654_v26 }
 0x3df   :  { %1582 = vmatpush.bf16.msra.mxu2 %v4657_v32  ;;  %1595 = vmatpush.bf16.msra.mxu3 %v4661_v33 }
 0x3e2   :  { %1557 = vmatpush.bf16.msra.mxu0 %v4663_v34  ;;  %1570 = vmatpush.bf16.msra.mxu1 %v4666_v35 }
 0x3e3   :  { %1583 = vmatpush.bf16.msra.mxu2 %v4678_v52  ;;  %1596 = vmatpush.bf16.msra.mxu3 %v4671_v43 }
 0x3e6   :  { %1558 = vmatpush.bf16.msra.mxu0 %v4673_v44  ;;  %1571 = vmatpush.bf16.msra.mxu1 %v4676_v51  ;;  %v5697_v51 = vld [vmem:[#allocation21_spill] sm:$0xff] }
 0x3e7   :  { %1584 = vmatpush.bf16.msra.mxu2 %v4687_v4  ;;  %1597 = vmatpush.bf16.msra.mxu3 %v4683_v2 }
 0x3ea   :  { %1559 = vmatpush.bf16.msra.mxu0 %v4685_v3  ;;  %1572 = vmatpush.bf16.msra.mxu1 %v4690_v10 }
 0x3eb   :  { %1585 = vmatpush.bf16.msra.mxu2 %v4693_v14  ;;  %1598 = vmatpush.bf16.msra.mxu3 %v4697_v15 }
 0x449   :  { %v1303_v37 = vpop.f32.mrf.mxu0  ;;  %v1316_v41 = vpop.f32.mrf.mxu1 }
 0x44a   :  { %v1346_v48 = vadd.f32 %v1303_v37, %v5694_v47  ;;  %v1347_v53 = vadd.f32 %v1316_v41, %v5695_v49  ;;  %v3950_v49 = vld [vmem:[#allocation6 + $0xec] sm:$0xf0] }
 0x44c   :  { %v3559_v59 = vmul.f32 -1.442695, %v1346_v48  ;;  %v3560_v60 = vmul.f32 -1.442695, %v1347_v53  ;;  %v3682_v48 = vld [vmem:[#allocation6 + $0xe0] sm:$0xf] }
 0x44d   :  { %v3948_v53 = vld [vmem:[#allocation6 + $0xe4] sm:$0xf] }
 0x44e   :  { %4092 = vpow2.f32 %v3559_v59  ;;  %v3683_v59 = vor.u32 %v3950_v49, %v3682_v48 }
 0x44f   :  { %4094 = vpow2.f32 %v3560_v60  ;;  %v3684_v60 = vld [vmem:[#allocation6 + $0xf0] sm:$0xf0] }
 0x450   :  { %v1329_v61 = vpop.f32.mrf.mxu2  ;;  %v1342_v1 = vpop.f32.mrf.mxu3 }
 0x451   :  { %v1349_v8 = vadd.f32 %v1342_v1, %v5696_v7  ;;  %v1305_v9 = vpop.f32.mrf.mxu0  ;;  %v1318_v13 = vpop.f32.mrf.mxu1  ;;  %v1348_v52 = vadd.f32 %v1329_v61, %v5697_v51  ;;  %v3690_v61 = vld [vmem:[#allocation6 + $0xe8] sm:$0xf]  ;;  %v3951_v1 = vld [vmem:[#allocation6 + $0xf4] sm:$0xf0]  ;;  %v3687_v7 = vor.u32 %v3948_v53, %v3684_v60  ;;  %v3937_v53 = vld [vmem:[#allocation6 + $0x8c] sm:$0xf] }
 0x452   :  { %v3949_v9 = vld [vmem:[#allocation6 + $0xec] sm:$0xf]  ;;  %v3692_v13 = vld [vmem:[#allocation6 + $0xf8] sm:$0xf0] }
 0x453   :  { %v3561_v20 = vmul.f32 -1.442695, %v1349_v8  ;;  %v3691_v8 = vor.u32 %v3951_v1, %v3690_v61 }
 0x454   :  { %v4093_v21 = vpop.eup %4092 }
 0x455   :  { %v4095_v22 = vpop.eup %4094  ;;  %v1353_v26 = vadd.f32 1.0, %v4093_v21  ;;  %4096 = vpow2.f32 %v3561_v20 }
 0x456   :  { %v1372_v32 = vadd.f32 1.0, %v4095_v22  ;;  %v3695_v22 = vor.u32 %v3949_v9, %v3692_v13  ;;  %v3618_v13 = vld [vmem:[#allocation6 + $0x60] sm:$0xf] }
 0x457   :  { %4098 = vrcp.f32 %v1353_v26  ;;  %v1365_v15 = vand.u32 2147483648, %v1353_v26  ;;  %v1363_v36 = vand.u32 2147483647, %v1353_v26  ;;  %vm1359_vm14 = vweird.f32 %v1353_v26 }
 0x458   :  { %4100 = vrcp.f32 %v1372_v32  ;;  %v1331_v33 = vpop.f32.mrf.mxu2  ;;  %v1344_v34 = vpop.f32.mrf.mxu3  ;;  %v1384_v27 = vand.u32 2147483648, %v1372_v32  ;;  %v1382_v6 = vand.u32 2147483647, %v1372_v32  ;;  %vm1378_vm15 = vweird.f32 %v1372_v32 }
 0x459   :  { %v1366_v40 = vor.u32 1.1754944e-38, %v1365_v15  ;;  %vm1364_vm2 = vcmp.eq.f32.partialorder %v1363_v36, 8.507059e+37  ;;  %v5699_v33 = vld [vmem:[#allocation24_spill] sm:$0xff]  ;;  %v3650_v36 = vld [vmem:[#allocation6 + $0xa0] sm:$0xf] }
 0x45a   :  { %v1385_v23 = vor.u32 1.1754944e-38, %v1384_v27  ;;  %vm1383_vm3 = vcmp.eq.f32.partialorder %v1382_v6, 8.507059e+37  ;;  %v3945_v27 = vld [vmem:[#allocation6 + $0xcc] sm:$0xf] }
 0x45b   :  { %v4097_v35 = vpop.eup %4096 }
 0x45c   :  { %v1392_v43 = vadd.f32 1.0, %v4097_v35  ;;  %v3666_v35 = vld [vmem:[#allocation6 + $0xc0] sm:$0xf] }
 0x45d   :  { %v4099_v44 = vpop.eup %4098 }
 0x45e   :  { %v4101_v2 = vpop.eup %4100  ;;  %v1355_v3 = vmul.f32 %v4099_v44, %v1353_v26  ;;  %4102 = vrcp.f32 %v1392_v43  ;;  %vm1360_vm12 = vweird.f32 %v4099_v44  ;;  %v1404_v29 = vand.u32 2147483648, %v1392_v43  ;;  %v5698_v26 = vld [vmem:[#allocation23_spill] sm:$0xff] }
 0x45f   :  { %v1374_v4 = vmul.f32 %v4101_v2, %v1372_v32  ;;  %4104 = vtanh.f32 %v1348_v52  ;;  %vm1379_vm13 = vweird.f32 %v4101_v2  ;;  %vm1361_vm0 = vmor %vm1359_vm14, %vm1360_vm12  ;;  %vm1398_vm5 = vweird.f32 %v1392_v43  ;;  %v3668_v52 = vld [vmem:[#allocation6 + $0xd0] sm:$0xf0] }
 0x460   :  { %v1356_v10 = vsub.f32 1.0, %v1355_v3  ;;  %vm1380_vm1 = vmor %vm1378_vm15, %vm1379_vm13  ;;  %v1402_v31 = vand.u32 2147483647, %v1392_v43  ;;  %v1405_v56 = vor.u32 1.1754944e-38, %v1404_v29  ;;  %v3947_v3 = vld [vmem:[#allocation6 + $0xd4] sm:$0xf0] }
 0x461   :  { %v1375_v14 = vsub.f32 1.0, %v1374_v4 }
 0x462   :  { %v1357_v45 = vmul.f32 %v4099_v44, %v1356_v10  ;;  %vm1403_vm7 = vcmp.eq.f32.partialorder %v1402_v31, 8.507059e+37 }
 0x463   :  { %v1376_v38 = vmul.f32 %v4101_v2, %v1375_v14 }
 0x464   :  { %v4103_v0 = vpop.eup %4102  ;;  %v1358_v42 = vadd.f32 %v4099_v44, %v1357_v45  ;;  %v3676_v45 = vld [vmem:[#allocation6 + $0xd8] sm:$0xf0] }
 0x465   :  { %v1377_v24 = vadd.f32 %v4101_v2, %v1376_v38  ;;  %v1394_v25 = vmul.f32 %v4103_v0, %v1392_v43  ;;  %v4105_v17 = vpop.eup %4104  ;;  %vm1399_vm4 = vweird.f32 %v4103_v0  ;;  %v3946_v43 = vld [vmem:[#allocation6 + $0xcc] sm:$0xf0]  ;;  %v3679_v6 = vor.u32 %v3945_v27, %v3676_v45 }
 0x466   :  { %v1362_v5 = vsel %vm1361_vm0, %v4099_v44, %v1358_v42  ;;  %vm1400_vm6 = vmor %vm1398_vm5, %vm1399_vm4  ;;  %v3944_v44 = vld [vmem:[#allocation6 + $0xc4] sm:$0xf]  ;;  %v3667_v51 = vor.u32 %v3946_v43, %v3666_v35  ;;  %v3942_v38 = vld [vmem:[#allocation6 + $0xac] sm:$0xf0] }
 0x467   :  { %v1367_v57 = vsel %vm1364_vm2, %v1366_v40, %v1362_v5  ;;  %v1381_v30 = vsel %vm1380_vm1, %v4101_v2, %v1377_v24  ;;  %v1395_v62 = vsub.f32 1.0, %v1394_v25  ;;  %v3674_v2 = vld [vmem:[#allocation6 + $0xc8] sm:$0xf]  ;;  %v3671_v14 = vor.u32 %v3944_v44, %v3668_v52  ;;  %v3940_v42 = vld [vmem:[#allocation6 + $0xa4] sm:$0xf]  ;;  %v5701_v52 = vld [vmem:[#allocation25_spill] sm:$0xff] }
 0x468   :  { %v1386_v46 = vsel %vm1383_vm3, %v1385_v23, %v1381_v30  ;;  %v1409_v39 = vmul.f32 %v4105_v17, %v1367_v57  ;;  %v3675_v15 = vor.u32 %v3947_v3, %v3674_v2  ;;  %v3652_v40 = vld [vmem:[#allocation6 + $0xb0] sm:$0xf0]  ;;  %v3658_v24 = vld [vmem:[#allocation6 + $0xa8] sm:$0xf]  ;;  %v3943_v23 = vld [vmem:[#allocation6 + $0xb4] sm:$0xf0] }
 0x469   :  { %v1408_v11 = vmul.f32 %v1386_v46, %v5010_v16  ;;  %v1396_v18 = vmul.f32 %v4103_v0, %v1395_v62  ;;  %v3655_v25 = vor.u32 %v3940_v42, %v3652_v40  ;;  %v3941_v5 = vld [vmem:[#allocation6 + $0xac] sm:$0xf]  ;;  %v3660_v17 = vld [vmem:[#allocation6 + $0xb8] sm:$0xf0]  ;;  %v3659_v62 = vor.u32 %v3943_v23, %v3658_v24  ;;  %v3626_v43 = vld [vmem:[#allocation6 + $0x68] sm:$0xf] }
 0x46a   :  { %v3663_v46 = vor.u32 %v3941_v5, %v3660_v17  ;;  %v3935_v44 = vld [vmem:[#allocation6 + $0x74] sm:$0xf0]  ;;  %v3930_v45 = vld [vmem:[#allocation6 + $0x4c] sm:$0xf0]  ;;  %v3610_v42 = vld [vmem:[#allocation6 + $0x48] sm:$0xf] }
 0x46b   :  { %v5054_v55 = vadd.f32 %v1409_v39, %v1408_v11  ;;  %v1397_v28 = vadd.f32 %v4103_v0, %v1396_v18  ;;  %v3634_v39 = vld [vmem:[#allocation6 + $0x80] sm:$0xf]  ;;  %v3938_v11 = vld [vmem:[#allocation6 + $0x8c] sm:$0xf0]  ;;  %v3936_v18 = vld [vmem:[#allocation6 + $0x84] sm:$0xf]  ;;  %v3627_v3 = vor.u32 %v3935_v44, %v3626_v43 }
 0x46c   :  { %v3931_v40 = vld [vmem:[#allocation6 + $0x54] sm:$0xf0]  ;;  %v3929_v23 = vld [vmem:[#allocation6 + $0x4c] sm:$0xf]  ;;  %v3612_v5 = vld [vmem:[#allocation6 + $0x58] sm:$0xf0] }
 0x46d   :  { %4106 = vtanh.f32 %v5054_v55  ;;  %v1401_v12 = vsel %vm1400_vm6, %v4103_v0, %v1397_v28  ;;  %v3651_v0 = vor.u32 %v3942_v38, %v3650_v36  ;;  %v5700_v28 = vld [vmem:[#allocation26_spill] sm:$0xff]  ;;  %v3928_v36 = vld [vmem:[#allocation6 + $0x44] sm:$0xf]  ;;  %v3586_v17 = vld [vmem:[#allocation6 + $0x20] sm:$0xf] }
 0x46e   :  { %v1406_v41 = vsel %vm1403_vm7, %v1405_v56, %v1401_v12  ;;  %v3635_v56 = vor.u32 %v3938_v11, %v3634_v39 }
 0x473   :  { %v4107_v37 = vpop.eup %4106 }
 0x474   :  { %v5057_v47 = vmul.f32 %v4107_v37, %v1406_v41  ;;  %v3636_v37 = vld [vmem:[#allocation6 + $0x90] sm:$0xf0]  ;;  %v3642_v41 = vld [vmem:[#allocation6 + $0x88] sm:$0xf] }
 0x475   :  { %v3639_v48 = vor.u32 %v3936_v18, %v3636_v37  ;;  %v3611_v18 = vor.u32 %v3931_v40, %v3610_v42 }
 0x476   :  { %v1422_v16 = vpack.c.bf16 %v5057_v47, %v5057_v47 }
 0x478   :  { %1431 = vmatmul.bf16.vlgmr.msrb.gmra.mxu0 %v1422_v16  ;;  %1444 = vmatmul.bf16.vlgmr.msrb.gmra.mxu1 %v1422_v16 }
 0x479   :  { %1457 = vmatmul.bf16.vlgmr.msrb.gmra.mxu2 %v1422_v16  ;;  %1470 = vmatmul.bf16.vlgmr.msrb.gmra.mxu3 %v1422_v16  ;;  %v3939_v16 = vld [vmem:[#allocation6 + $0x94] sm:$0xf0] }
 0x47a   :  { %1911 = vmatpush.bf16.msrb.mxu0 %v3683_v59  ;;  %1940 = vmatpush.bf16.msrb.mxu1 %v3687_v7  ;;  %v3643_v49 = vor.u32 %v3939_v16, %v3642_v41  ;;  %v3644_v59 = vld [vmem:[#allocation6 + $0x98] sm:$0xf0]  ;;  %v3594_v16 = vld [vmem:[#allocation6 + $0x28] sm:$0xf] }
 0x47b   :  { %1969 = vmatpush.bf16.msrb.mxu2 %v3691_v8  ;;  %1998 = vmatpush.bf16.msrb.mxu3 %v3695_v22  ;;  %v3647_v1 = vor.u32 %v3937_v53, %v3644_v59  ;;  %v3934_v22 = vld [vmem:[#allocation6 + $0x6c] sm:$0xf0]  ;;  %v3927_v53 = vld [vmem:[#allocation6 + $0x34] sm:$0xf0]  ;;  %v3925_v59 = vld [vmem:[#allocation6 + $0x2c] sm:$0xf] }
 0x47e   :  { %1912 = vmatpush.bf16.msrb.mxu0 %v3667_v51  ;;  %1941 = vmatpush.bf16.msrb.mxu1 %v3671_v14  ;;  %v3602_v14 = vld [vmem:[#allocation6 + $0x40] sm:$0xf] }
 0x47f   :  { %1970 = vmatpush.bf16.msrb.mxu2 %v3675_v15  ;;  %1999 = vmatpush.bf16.msrb.mxu3 %v3679_v6  ;;  %v3603_v6 = vor.u32 %v3930_v45, %v3602_v14 }
 0x482   :  { %1913 = vmatpush.bf16.msrb.mxu0 %v3651_v0  ;;  %1942 = vmatpush.bf16.msrb.mxu1 %v3655_v25  ;;  %v3604_v0 = vld [vmem:[#allocation6 + $0x50] sm:$0xf0] }
 0x483   :  { %1971 = vmatpush.bf16.msrb.mxu2 %v3659_v62  ;;  %2000 = vmatpush.bf16.msrb.mxu3 %v3663_v46  ;;  %v3926_v46 = vld [vmem:[#allocation6 + $0x2c] sm:$0xf0]  ;;  %v3607_v11 = vor.u32 %v3928_v36, %v3604_v0 }
 0x484   :  { %v3587_v41 = vor.u32 %v3926_v46, %v3586_v17  ;;  %v1747_v46 = vpack.c.bf16 %v4881_v63, %v4837_v50  ;;  %v1749_v50 = vpack.c.bf16 %v5057_v47, %v5013_v58  ;;  %v3981_v63 = vld [vmem:[#allocation8 + $0xec] sm:$0xf] }
 0x485   :  { %v5705_v47 = vld [vmem:[#allocation28_spill] sm:$0xff] }
 0x486   :  { %1914 = vmatpush.bf16.msrb.mxu0 %v3635_v56  ;;  %1943 = vmatpush.bf16.msrb.mxu1 %v3639_v48 }
 0x487   :  { %1972 = vmatpush.bf16.msrb.mxu2 %v3643_v49  ;;  %2001 = vmatpush.bf16.msrb.mxu3 %v3647_v1  ;;  %v3595_v1 = vor.u32 %v3927_v53, %v3594_v16  ;;  %v3796_v53 = vld [vmem:[#allocation8 + $0xc0] sm:$0xf] }
 0x48b   :  { %1973 = vmatpush.bf16.msrb.mxu2 %v3627_v3  ;;  %v3921_v3 = vld [vmem:[#allocation6 + $0xc] sm:$0xf] }
 0x48f   :  { %1974 = vmatpush.bf16.msrb.mxu2 %v3611_v18 }
 0x493   :  { %1975 = vmatpush.bf16.msrb.mxu2 %v3595_v1  ;;  %v3798_v1 = vld [vmem:[#allocation8 + $0xd0] sm:$0xf0] }
 0x4f5   :  { %v1432_v20 = vpop.f32.mrf.mxu0  ;;  %v1445_v21 = vpop.f32.mrf.mxu1 }
 0x4f6   :  { %v1475_v32 = vadd.f32 %v1432_v20, %v5698_v26  ;;  %v1476_v34 = vadd.f32 %v1445_v21, %v5699_v33  ;;  %v3619_v26 = vor.u32 %v3934_v22, %v3618_v13  ;;  %v3620_v33 = vld [vmem:[#allocation6 + $0x70] sm:$0xf0]  ;;  %v3570_v13 = vld [vmem:[#allocation6] sm:$0xf] }
 0x4f8   :  { %v3562_v4 = vmul.f32 -1.442695, %v1475_v32  ;;  %v3563_v10 = vmul.f32 -1.442695, %v1476_v34  ;;  %v3932_v32 = vld [vmem:[#allocation6 + $0x64] sm:$0xf]  ;;  %1915 = vmatpush.bf16.msrb.mxu0 %v3619_v26 }
 0x4f9   :  { %v3623_v35 = vor.u32 %v3932_v32, %v3620_v33  ;;  %v3572_v33 = vld [vmem:[#allocation6 + $0x10] sm:$0xf0] }
 0x4fa   :  { %4108 = vpow2.f32 %v3562_v4  ;;  %v3933_v4 = vld [vmem:[#allocation6 + $0x6c] sm:$0xf] }
 0x4fb   :  { %4110 = vpow2.f32 %v3563_v10  ;;  %v3628_v10 = vld [vmem:[#allocation6 + $0x78] sm:$0xf0]  ;;  %1944 = vmatpush.bf16.msrb.mxu1 %v3623_v35  ;;  %v3923_v35 = vld [vmem:[#allocation6 + $0x14] sm:$0xf0] }
 0x4fc   :  { %v1458_v57 = vpop.f32.mrf.mxu2  ;;  %v1471_v30 = vpop.f32.mrf.mxu3  ;;  %v3631_v27 = vor.u32 %v3933_v4, %v3628_v10  ;;  %1916 = vmatpush.bf16.msrb.mxu0 %v3603_v6  ;;  %v3580_v4 = vld [vmem:[#allocation6 + $0x18] sm:$0xf0] }
 0x4fd   :  { %v1478_v29 = vadd.f32 %v1471_v30, %v5700_v28  ;;  %v1434_v31 = vpop.f32.mrf.mxu0  ;;  %v1447_v12 = vpop.f32.mrf.mxu1  ;;  %v1477_v2 = vadd.f32 %v1458_v57, %v5701_v52  ;;  %v3615_v28 = vor.u32 %v3929_v23, %v3612_v5  ;;  %v3583_v6 = vor.u32 %v3921_v3, %v3580_v4  ;;  %v3979_v4 = vld [vmem:[#allocation8 + $0xd4] sm:$0xf0] }
 0x4fe   :  { %2002 = vmatpush.bf16.msrb.mxu3 %v3631_v27  ;;  %v3588_v31 = vld [vmem:[#allocation6 + $0x30] sm:$0xf0] }
 0x4ff   :  { %v3564_v60 = vmul.f32 -1.442695, %v1478_v29  ;;  %v3924_v29 = vld [vmem:[#allocation6 + $0x24] sm:$0xf]  ;;  %1945 = vmatpush.bf16.msrb.mxu1 %v3607_v11 }
 0x500   :  { %v4109_v61 = vpop.eup %4108  ;;  %v3591_v49 = vor.u32 %v3924_v29, %v3588_v31  ;;  %1917 = vmatpush.bf16.msrb.mxu0 %v3587_v41  ;;  %v3980_v11 = vld [vmem:[#allocation8 + $0xe4] sm:$0xf]  ;;  %v1748_v31 = vpack.c.bf16 %v4969_v19, %v4925_v54  ;;  %v3983_v41 = vld [vmem:[#allocation8 + $0xf4] sm:$0xf0] }
 0x501   :  { %v4111_v7 = vpop.eup %4110  ;;  %v5064_v8 = vadd.f32 1.0, %v4109_v61  ;;  %4112 = vpow2.f32 %v3564_v60  ;;  %v3596_v60 = vld [vmem:[#allocation6 + $0x38] sm:$0xf0] }
 0x502   :  { %v5066_v9 = vadd.f32 1.0, %v4111_v7  ;;  %2003 = vmatpush.bf16.msrb.mxu3 %v3615_v28  ;;  %v3599_v7 = vor.u32 %v3925_v59, %v3596_v60  ;;  %v3814_v28 = vld [vmem:[#allocation8 + $0xf0] sm:$0xf0]  ;;  %v3978_v59 = vld [vmem:[#allocation8 + $0xcc] sm:$0xf0] }
 0x503   :  { %4114 = vrcp.f32 %v5064_v8  ;;  %v1492_v34 = vand.u32 2147483647, %v5064_v8  ;;  %v1494_v62 = vand.u32 2147483648, %v5064_v8  ;;  %vm1488_vm12 = vweird.f32 %v5064_v8  ;;  %1946 = vmatpush.bf16.msrb.mxu1 %v3591_v49  ;;  %v3976_v60 = vld [vmem:[#allocation8 + $0xc4] sm:$0xf] }
 0x504   :  { %4116 = vrcp.f32 %v5066_v9  ;;  %v1460_v20 = vpop.f32.mrf.mxu2  ;;  %v1473_v21 = vpop.f32.mrf.mxu3  ;;  %v1513_v30 = vand.u32 2147483648, %v5066_v9  ;;  %v1511_v37 = vand.u32 2147483647, %v5066_v9  ;;  %vm1507_vm11 = vweird.f32 %v5066_v9 }
 0x505   :  { %vm5085_vm8 = vcmp.eq.f32.partialorder %v1492_v34, 8.507059e+37  ;;  %v3922_v20 = vld [vmem:[#allocation6 + $0xc] sm:$0xf0]  ;;  %v3920_v21 = vld [vmem:[#allocation6 + $0x4] sm:$0xf]  ;;  %v5124_v29 = vor.u32 %v3980_v11, %v3814_v28 }
 0x506   :  { %v3571_v32 = vor.u32 %v3922_v20, %v3570_v13  ;;  %v3578_v34 = vld [vmem:[#allocation6 + $0x8] sm:$0xf]  ;;  %v1514_v44 = vor.u32 1.1754944e-38, %v1513_v30  ;;  %vm1512_vm15 = vcmp.eq.f32.partialorder %v1511_v37, 8.507059e+37  ;;  %v3575_v10 = vor.u32 %v3920_v21, %v3572_v33  ;;  %2004 = vmatpush.bf16.msrb.mxu3 %v3599_v7  ;;  %v3977_v7 = vld [vmem:[#allocation8 + $0xcc] sm:$0xf] }
 0x507   :  { %v4113_v51 = vpop.eup %4112  ;;  %v3579_v14 = vor.u32 %v3923_v35, %v3578_v34  ;;  %v3820_v37 = vld [vmem:[#allocation8 + $0xe8] sm:$0xf]  ;;  %v3806_v13 = vld [vmem:[#allocation8 + $0xd8] sm:$0xf0]  ;;  %v3780_v33 = vld [vmem:[#allocation8 + $0xa0] sm:$0xf] }
 0x508   :  { %v5072_v15 = vadd.f32 1.0, %v4113_v51  ;;  %v1495_v51 = vor.u32 1.1754944e-38, %v1494_v62  ;;  %1918 = vmatpush.bf16.msrb.mxu0 %v3571_v32  ;;  %1947 = vmatpush.bf16.msrb.mxu1 %v3575_v10  ;;  %v5135_v54 = vor.u32 %v3983_v41, %v3820_v37  ;;  %v3804_v32 = vld [vmem:[#allocation8 + $0xc8] sm:$0xf]  ;;  %v3974_v34 = vld [vmem:[#allocation8 + $0xac] sm:$0xf0] }
 0x509   :  { %v5074_v38 = vpop.eup %4114  ;;  %1976 = vmatpush.bf16.msrb.mxu2 %v3579_v14  ;;  %v3972_v35 = vld [vmem:[#allocation8 + $0xa4] sm:$0xf]  ;;  %v3970_v10 = vld [vmem:[#allocation8 + $0x8c] sm:$0xf0]  ;;  %v3750_v28 = vld [vmem:[#allocation8 + $0x70] sm:$0xf0] }
 0x50a   :  { %v5076_v24 = vpop.eup %4116  ;;  %v1484_v25 = vmul.f32 %v5074_v38, %v5064_v8  ;;  %4118 = vrcp.f32 %v5072_v15  ;;  %vm1489_vm9 = vweird.f32 %v5074_v38  ;;  %2005 = vmatpush.bf16.msrb.mxu3 %v3583_v6  ;;  %vm1527_vm1 = vweird.f32 %v5072_v15  ;;  %v3766_v6 = vld [vmem:[#allocation8 + $0x90] sm:$0xf0]  ;;  %v3971_v37 = vld [vmem:[#allocation8 + $0x94] sm:$0xf0] }
 0x50b   :  { %v1503_v57 = vmul.f32 %v5076_v24, %v5066_v9  ;;  %4120 = vtanh.f32 %v1477_v2  ;;  %vm1508_vm10 = vweird.f32 %v5076_v24  ;;  %vm1490_vm13 = vmor %vm1488_vm12, %vm1489_vm9  ;;  %v1531_v23 = vand.u32 2147483647, %v5072_v15 }
 0x50c   :  { %v1485_v39 = vsub.f32 1.0, %v1484_v25  ;;  %vm1509_vm14 = vmor %vm1507_vm11, %vm1508_vm10 }
 0x50d   :  { %v1504_v12 = vsub.f32 1.0, %v1503_v57  ;;  %vm1532_vm3 = vcmp.eq.f32.partialorder %v1531_v23, 8.507059e+37  ;;  %v3774_v23 = vld [vmem:[#allocation8 + $0x98] sm:$0xf0] }
 0x50e   :  { %v1486_v48 = vmul.f32 %v5074_v38, %v1485_v39  ;;  %v3982_v39 = vld [vmem:[#allocation8 + $0xec] sm:$0xf0] }
 0x50f   :  { %v1505_v61 = vmul.f32 %v5076_v24, %v1504_v12  ;;  %v3822_v12 = vld [vmem:[#allocation8 + $0xf8] sm:$0xf0] }
 0x510   :  { %v4119_v22 = vpop.eup %4118  ;;  %v1487_v26 = vadd.f32 %v5074_v38, %v1486_v48  ;;  %v5132_v56 = vor.u32 %v3981_v63, %v3822_v12  ;;  %v5704_v48 = vld [vmem:[#allocation27_spill] sm:$0xff]  ;;  %v3758_v63 = vld [vmem:[#allocation8 + $0x78] sm:$0xf0]  ;;  %v3772_v12 = vld [vmem:[#allocation8 + $0x88] sm:$0xf] }
 0x511   :  { %v4121_v43 = vpop.eup %4120  ;;  %v1506_v52 = vadd.f32 %v5076_v24, %v1505_v61  ;;  %v1523_v2 = vmul.f32 %v4119_v22, %v5072_v15  ;;  %vm1528_vm0 = vweird.f32 %v4119_v22  ;;  %v5140_v61 = vor.u32 %v3978_v59, %v3796_v53  ;;  %v3962_v53 = vld [vmem:[#allocation8 + $0x4c] sm:$0xf0] }
 0x512   :  { %v1491_v8 = vsel %vm1490_vm13, %v5074_v38, %v1487_v26  ;;  %vm1529_vm2 = vmor %vm1527_vm1, %vm1528_vm0  ;;  %v5144_v26 = vor.u32 %v3977_v7, %v3806_v13  ;;  %v5187_v59 = vor.u32 %v3971_v37, %v3772_v12  ;;  %v3961_v7 = vld [vmem:[#allocation8 + $0x4c] sm:$0xf]  ;;  %v3954_v12 = vld [vmem:[#allocation8 + $0xc] sm:$0xf0] }
 0x513   :  { %v1496_v27 = vsel %vm5085_vm8, %v1495_v51, %v1491_v8  ;;  %v1510_v45 = vsel %vm1509_vm14, %v5076_v24, %v1506_v52  ;;  %v1524_v36 = vsub.f32 1.0, %v1523_v2  ;;  %v1533_v24 = vand.u32 2147483648, %v5072_v15  ;;  %v3812_v15 = vld [vmem:[#allocation8 + $0xe0] sm:$0xf]  ;;  %v3973_v51 = vld [vmem:[#allocation8 + $0xac] sm:$0xf] }
 0x514   :  { %v1515_v0 = vsel %vm1512_vm15, %v1514_v44, %v1510_v45  ;;  %v1538_v42 = vmul.f32 %v4121_v43, %v1496_v27  ;;  %v5122_v18 = vor.u32 %v3982_v39, %v3812_v15  ;;  %v5149_v43 = vor.u32 %v3974_v34, %v3780_v33  ;;  %v3782_v44 = vld [vmem:[#allocation8 + $0xb0] sm:$0xf0]  ;;  %v3790_v52 = vld [vmem:[#allocation8 + $0xb8] sm:$0xf0]  ;;  %v3764_v8 = vld [vmem:[#allocation8 + $0x80] sm:$0xf] }
 0x515   :  { %v1537_v9 = vmul.f32 %v1515_v0, %v5054_v55  ;;  %v1525_v40 = vmul.f32 %v4119_v22, %v1524_v36  ;;  %v1534_v17 = vor.u32 1.1754944e-38, %v1533_v24  ;;  %v5151_v2 = vor.u32 %v3972_v35, %v3782_v44  ;;  %v3968_v36 = vld [vmem:[#allocation8 + $0x84] sm:$0xf]  ;;  %v3969_v0 = vld [vmem:[#allocation8 + $0x8c] sm:$0xf] }
 0x516   :  { %v5153_v3 = vor.u32 %v3973_v51, %v3790_v52  ;;  %v5157_v45 = vor.u32 %v3979_v4, %v3804_v32  ;;  %v5161_v24 = vor.u32 %v3970_v10, %v3764_v8  ;;  %v3964_v15 = vld [vmem:[#allocation8 + $0x64] sm:$0xf]  ;;  %v3756_v33 = vld [vmem:[#allocation8 + $0x68] sm:$0xf]  ;;  %v3967_v34 = vld [vmem:[#allocation8 + $0x74] sm:$0xf0] }
 0x517   :  { %v5110_v38 = vadd.f32 %v1538_v42, %v1537_v9  ;;  %v1526_v25 = vadd.f32 %v4119_v22, %v1525_v40  ;;  %v5706_v42 = vld [vmem:[#allocation30_spill] sm:$0xff]  ;;  %v3716_v51 = vld [vmem:[#allocation8 + $0x20] sm:$0xf]  ;;  %v3958_v52 = vld [vmem:[#allocation8 + $0x2c] sm:$0xf0]  ;;  %v5200_v8 = vor.u32 %v3967_v34, %v3756_v33 }
 0x518   :  { %v3956_v10 = vld [vmem:[#allocation8 + $0x24] sm:$0xf] }
 0x519   :  { %4122 = vtanh.f32 %v5110_v38  ;;  %v1530_v5 = vsel %vm1529_vm2, %v4119_v22, %v1526_v25  ;;  %v5142_v22 = vor.u32 %v3976_v60, %v3798_v1  ;;  %v3960_v60 = vld [vmem:[#allocation8 + $0x44] sm:$0xf]  ;;  %v3734_v1 = vld [vmem:[#allocation8 + $0x50] sm:$0xf0] }
 0x51a   :  { %v1535_v57 = vsel %vm1532_vm3, %v1534_v17, %v1530_v5  ;;  %v3788_v5 = vld [vmem:[#allocation8 + $0xa8] sm:$0xf]  ;;  %v3975_v17 = vld [vmem:[#allocation8 + $0xb4] sm:$0xf0]  ;;  %v5195_v35 = vor.u32 %v3960_v60, %v3734_v1  ;;  %v3952_v60 = vld [vmem:[#allocation8 + $0x4] sm:$0xf] }
 0x51b   :  { %v5170_v11 = vor.u32 %v3975_v17, %v3788_v5  ;;  %v3726_v5 = vld [vmem:[#allocation8 + $0x38] sm:$0xf0] }
 0x51f   :  { %v4123_v55 = vpop.eup %4122 }
 0x520   :  { %v5116_v30 = vmul.f32 %v4123_v55, %v1535_v57  ;;  %v5165_v55 = vor.u32 %v3968_v36, %v3766_v6  ;;  %v5167_v57 = vor.u32 %v3969_v0, %v3774_v23  ;;  %v5707_v36 = vld [vmem:[#allocation29_spill] sm:$0xff]  ;;  %v3957_v23 = vld [vmem:[#allocation8 + $0x2c] sm:$0xf] }
 0x522   :  { %v1551_v62 = vpack.c.bf16 %v5116_v30, %v5116_v30 }
 0x524   :  { %1560 = vmatmul.bf16.vlgmr.msra.gmra.mxu0 %v1551_v62  ;;  %1573 = vmatmul.bf16.vlgmr.msra.gmra.mxu1 %v1551_v62 }
 0x525   :  { %1586 = vmatmul.bf16.vlgmr.msra.gmra.mxu2 %v1551_v62  ;;  %1599 = vmatmul.bf16.vlgmr.msra.gmra.mxu3 %v1551_v62  ;;  %v3748_v62 = vld [vmem:[#allocation8 + $0x60] sm:$0xf] }
 0x526   :  { %2228 = vmatpush.bf16.msra.mxu0 %v5122_v18  ;;  %2241 = vmatpush.bf16.msra.mxu1 %v5124_v29 }
 0x527   :  { %2267 = vmatpush.bf16.msra.mxu3 %v5132_v56  ;;  %2254 = vmatpush.bf16.msra.mxu2 %v5135_v54 }
 0x52a   :  { %2229 = vmatpush.bf16.msra.mxu0 %v5140_v61  ;;  %2242 = vmatpush.bf16.msra.mxu1 %v5142_v22 }
 0x52b   :  { %2268 = vmatpush.bf16.msra.mxu3 %v5144_v26  ;;  %2255 = vmatpush.bf16.msra.mxu2 %v5157_v45 }
 0x52e   :  { %2230 = vmatpush.bf16.msra.mxu0 %v5149_v43  ;;  %2243 = vmatpush.bf16.msra.mxu1 %v5151_v2 }
 0x52f   :  { %2269 = vmatpush.bf16.msra.mxu3 %v5153_v3  ;;  %2256 = vmatpush.bf16.msra.mxu2 %v5170_v11 }
 0x532   :  { %2231 = vmatpush.bf16.msra.mxu0 %v5161_v24  ;;  %2244 = vmatpush.bf16.msra.mxu1 %v5165_v55 }
 0x533   :  { %2270 = vmatpush.bf16.msra.mxu3 %v5167_v57  ;;  %2257 = vmatpush.bf16.msra.mxu2 %v5187_v59 }
 0x534   :  { %1919 = vmatmul.bf16.vlgmr.msrb.gmra.mxu0 %v1747_v46  ;;  %1948 = vmatmul.bf16.vlgmr.msrb.gmra.mxu1 %v1747_v46 }
 0x535   :  { %1977 = vmatmul.bf16.vlgmr.msrb.gmra.mxu2 %v1747_v46  ;;  %2006 = vmatmul.bf16.vlgmr.msrb.gmra.mxu3 %v1747_v46  ;;  %v3966_v46 = vld [vmem:[#allocation8 + $0x6c] sm:$0xf0] }
 0x537   :  { %2258 = vmatpush.bf16.msra.mxu2 %v5200_v8 }
 0x544   :  { %1924 = vmatmul.bf16.gmra.mxu0 %v1748_v31  ;;  %1953 = vmatmul.bf16.gmra.mxu1 %v1748_v31 }
 0x545   :  { %1982 = vmatmul.bf16.gmra.mxu2 %v1748_v31  ;;  %2011 = vmatmul.bf16.gmra.mxu3 %v1748_v31  ;;  %v3965_v31 = vld [vmem:[#allocation8 + $0x6c] sm:$0xf] }
 0x554   :  { %1929 = vmatmul.bf16.gmra.mxu0 %v1749_v50  ;;  %1958 = vmatmul.bf16.gmra.mxu1 %v1749_v50 }
 0x555   :  { %1987 = vmatmul.bf16.gmra.mxu2 %v1749_v50  ;;  %2016 = vmatmul.bf16.gmra.mxu3 %v1749_v50 }
 0x5a1   :  { %v1561_v19 = vpop.f32.mrf.mxu0  ;;  %v1574_v16 = vpop.f32.mrf.mxu1 }
 0x5a2   :  { %v1604_v58 = vadd.f32 %v1561_v19, %v5704_v48  ;;  %v1605_v49 = vadd.f32 %v1574_v16, %v5705_v47  ;;  %v5175_v16 = vor.u32 %v3966_v46, %v3748_v62  ;;  %v5183_v47 = vor.u32 %v3965_v31, %v3758_v63  ;;  %v3700_v63 = vld [vmem:[#allocation8] sm:$0xf] }
 0x5a4   :  { %v3565_v20 = vmul.f32 -1.442695, %v1604_v58  ;;  %v3566_v21 = vmul.f32 -1.442695, %v1605_v49  ;;  %v5181_v58 = vor.u32 %v3964_v15, %v3750_v28  ;;  %v3732_v49 = vld [vmem:[#allocation8 + $0x40] sm:$0xf]  ;;  %2232 = vmatpush.bf16.msra.mxu0 %v5175_v16  ;;  %2271 = vmatpush.bf16.msra.mxu3 %v5183_v47 }
 0x5a5   :  { %v5191_v32 = vor.u32 %v3962_v53, %v3732_v49  ;;  %v3724_v28 = vld [vmem:[#allocation8 + $0x28] sm:$0xf]  ;;  %v5231_v53 = vor.u32 %v3954_v12, %v3700_v63 }
 0x5a6   :  { %4124 = vpow2.f32 %v3565_v20  ;;  %2245 = vmatpush.bf16.msra.mxu1 %v5181_v58 }
 0x5a7   :  { %4126 = vpow2.f32 %v3566_v21  ;;  %v3742_v21 = vld [vmem:[#allocation8 + $0x58] sm:$0xf0] }
 0x5a8   :  { %v5155_v14 = vpop.f32.mrf.mxu2  ;;  %v1600_v27 = vpop.f32.mrf.mxu3  ;;  %v5197_v44 = vor.u32 %v3961_v7, %v3742_v21  ;;  %2233 = vmatpush.bf16.msra.mxu0 %v5191_v32 }
 0x5a9   :  { %v1607_v9 = vadd.f32 %v1600_v27, %v5706_v42  ;;  %v1563_v40 = vpop.f32.mrf.mxu0  ;;  %v1576_v25 = vpop.f32.mrf.mxu1  ;;  %v3718_v27 = vld [vmem:[#allocation8 + $0x30] sm:$0xf0]  ;;  %v1606_v6 = vadd.f32 %v5155_v14, %v5707_v36  ;;  %v3740_v42 = vld [vmem:[#allocation8 + $0x48] sm:$0xf]  ;;  %v3955_v36 = vld [vmem:[#allocation8 + $0x14] sm:$0xf0] }
 0x5aa   :  { %v5209_v25 = vor.u32 %v3958_v52, %v3716_v51  ;;  %2246 = vmatpush.bf16.msra.mxu1 %v5195_v35  ;;  %2272 = vmatpush.bf16.msra.mxu3 %v5197_v44  ;;  %v5218_v14 = vor.u32 %v3956_v10, %v3718_v27  ;;  %v3953_v51 = vld [vmem:[#allocation8 + $0xc] sm:$0xf]  ;;  %v3710_v52 = vld [vmem:[#allocation8 + $0x18] sm:$0xf0]  ;;  %v3708_v27 = vld [vmem:[#allocation8 + $0x8] sm:$0xf] }
 0x5ab   :  { %v3567_v39 = vmul.f32 -1.442695, %v1607_v9  ;;  %v3963_v9 = vld [vmem:[#allocation8 + $0x54] sm:$0xf0] }
 0x5ac   :  { %v4125_v50 = vpop.eup %4124  ;;  %2234 = vmatpush.bf16.msra.mxu0 %v5209_v25 }
 0x5ad   :  { %v4127_v41 = vpop.eup %4126  ;;  %v5172_v19 = vadd.f32 1.0, %v4125_v50  ;;  %4128 = vpow2.f32 %v3567_v39  ;;  %v5224_v39 = vor.u32 %v3963_v9, %v3740_v42  ;;  %v5226_v50 = vor.u32 %v3957_v23, %v3726_v5 }
 0x5ae   :  { %v5177_v48 = vadd.f32 1.0, %v4127_v41  ;;  %2247 = vmatpush.bf16.msra.mxu1 %v5218_v14 }
 0x5af   :  { %4130 = vrcp.f32 %v5172_v19  ;;  %v1621_v15 = vand.u32 2147483647, %v5172_v19  ;;  %v1623_v49 = vand.u32 2147483648, %v5172_v19  ;;  %2273 = vmatpush.bf16.msra.mxu3 %v5226_v50  ;;  %2259 = vmatpush.bf16.msra.mxu2 %v5224_v39  ;;  %vm1617_vm6 = vweird.f32 %v5172_v19 }
 0x5b0   :  { %4132 = vrcp.f32 %v5177_v48  ;;  %v1589_v13 = vpop.f32.mrf.mxu2  ;;  %v1602_v20 = vpop.f32.mrf.mxu3  ;;  %v1642_v41 = vand.u32 2147483648, %v5177_v48  ;;  %v1640_v7 = vand.u32 2147483647, %v5177_v48  ;;  %vm1636_vm7 = vweird.f32 %v5177_v48  ;;  %2235 = vmatpush.bf16.msra.mxu0 %v5231_v53 }
 0x5b1   :  { %v3702_v13 = vld [vmem:[#allocation8 + $0x10] sm:$0xf0]  ;;  %v3959_v20 = vld [vmem:[#allocation8 + $0x34] sm:$0xf0]  ;;  %v1624_v42 = vor.u32 1.1754944e-38, %v1623_v49  ;;  %vm1622_vm10 = vcmp.eq.f32.partialorder %v1621_v15, 8.507059e+37 }
 0x5b2   :  { %v5241_v33 = vor.u32 %v3952_v60, %v3702_v13  ;;  %v5243_v34 = vor.u32 %v3959_v20, %v3724_v28  ;;  %vm1641_vm11 = vcmp.eq.f32.partialorder %v1640_v7, 8.507059e+37 }
 0x5b3   :  { %v4129_v4 = vpop.eup %4128 }
 0x5b4   :  { %v5204_v0 = vadd.f32 1.0, %v4129_v4  ;;  %2248 = vmatpush.bf16.msra.mxu1 %v5241_v33  ;;  %2260 = vmatpush.bf16.msra.mxu2 %v5243_v34 }
 0x5b5   :  { %v5206_v40 = vpop.eup %4130  ;;  %2353 = vmatpush.bf16.msrb.mxu0 %v5122_v18 }
 0x5b6   :  { %v5211_v17 = vpop.eup %4132  ;;  %v1613_v62 = vmul.f32 %v5206_v40, %v5172_v19  ;;  %4134 = vrcp.f32 %v5204_v0  ;;  %vm1618_vm4 = vweird.f32 %v5206_v40  ;;  %v1643_v19 = vor.u32 1.1754944e-38, %v1642_v41 }
 0x5b7   :  { %v1632_v46 = vmul.f32 %v5211_v17, %v5177_v48  ;;  %4136 = vtanh.f32 %v1606_v6  ;;  %vm1637_vm5 = vweird.f32 %v5211_v17  ;;  %v5247_v6 = vor.u32 %v3953_v51, %v3710_v52  ;;  %vm1619_vm8 = vmor %vm1617_vm6, %vm1618_vm4  ;;  %v1949_v51 = vpop.f32.mrf.mxu1 }
 0x5b8   :  { %v1614_v31 = vsub.f32 1.0, %v1613_v62  ;;  %vm1638_vm9 = vmor %vm1636_vm7, %vm1637_vm5  ;;  %2366 = vmatpush.bf16.msrb.mxu1 %v5124_v29  ;;  %v1662_v41 = vand.u32 2147483648, %v5204_v0  ;;  %vm1656_vm13 = vweird.f32 %v5204_v0  ;;  %v1978_v52 = vpop.f32.mrf.mxu2 }
 0x5b9   :  { %v1633_v37 = vsub.f32 1.0, %v1632_v46  ;;  %2274 = vmatpush.bf16.msra.mxu3 %v5247_v6  ;;  %2354 = vmatpush.bf16.msrb.mxu0 %v5140_v61 }
 0x5ba   :  { %v1615_v1 = vmul.f32 %v5206_v40, %v1614_v31  ;;  %v5262_v31 = vor.u32 %v3955_v36, %v3708_v27  ;;  %v1663_v60 = vor.u32 1.1754944e-38, %v1662_v41 }
 0x5bb   :  { %v1634_v21 = vmul.f32 %v5211_v17, %v1633_v37 }
 0x5bc   :  { %v4135_v4 = vpop.eup %4134  ;;  %v1616_v10 = vadd.f32 %v5206_v40, %v1615_v1  ;;  %2261 = vmatpush.bf16.msra.mxu2 %v5262_v31  ;;  %2367 = vmatpush.bf16.msrb.mxu1 %v5142_v22 }
 0x5bd   :  { %v1635_v9 = vadd.f32 %v5211_v17, %v1634_v21  ;;  %v1652_v23 = vmul.f32 %v4135_v4, %v5204_v0  ;;  %v4137_v5 = vpop.eup %4136  ;;  %2392 = vmatpush.bf16.msrb.mxu3 %v5132_v56  ;;  %vm1657_vm12 = vweird.f32 %v4135_v4  ;;  %2355 = vmatpush.bf16.msrb.mxu0 %v5149_v43  ;;  %v1920_v21 = vpop.f32.mrf.mxu0 }
 0x5be   :  { %v1620_v62 = vsel %vm1619_vm8, %v5206_v40, %v1616_v10  ;;  %vm1658_vm14 = vmor %vm1656_vm13, %vm1657_vm12 }
 0x5bf   :  { %v1625_v48 = vsel %vm1622_vm10, %v1624_v42, %v1620_v62  ;;  %v1639_v46 = vsel %vm1638_vm9, %v5211_v17, %v1635_v9  ;;  %v1653_v28 = vsub.f32 1.0, %v1652_v23  ;;  %v5345_v27 = vpop.f32.mrf.mxu1 }
 0x5c0   :  { %v1644_v63 = vsel %vm1641_vm11, %v1643_v19, %v1639_v46  ;;  %v1667_v12 = vmul.f32 %v4137_v5, %v1625_v48  ;;  %2379 = vmatpush.bf16.msrb.mxu2 %v5135_v54  ;;  %2368 = vmatpush.bf16.msrb.mxu1 %v5151_v2  ;;  %v5347_v36 = vpop.f32.mrf.mxu2 }
 0x5c1   :  { %v1666_v40 = vmul.f32 %v1644_v63, %v5110_v38  ;;  %v1654_v15 = vmul.f32 %v4135_v4, %v1653_v28  ;;  %2393 = vmatpush.bf16.msrb.mxu3 %v5144_v26  ;;  %v1660_v38 = vand.u32 2147483647, %v5204_v0  ;;  %2356 = vmatpush.bf16.msrb.mxu0 %v5161_v24 }
 0x5c3   :  { %v1668_v37 = vadd.f32 %v1667_v12, %v1666_v40  ;;  %v1655_v17 = vadd.f32 %v4135_v4, %v1654_v15  ;;  %vm1661_vm15 = vcmp.eq.f32.partialorder %v1660_v38, 8.507059e+37 }
 0x5c4   :  { %2380 = vmatpush.bf16.msrb.mxu2 %v5157_v45  ;;  %2369 = vmatpush.bf16.msrb.mxu1 %v5165_v55 }
 0x5c5   :  { %4138 = vtanh.f32 %v1668_v37  ;;  %1674 = vst [vmem:[%s5665_s9] sm:$0xff] %v1668_v37  ;;  %v1659_v49 = vsel %vm1658_vm14, %v4135_v4, %v1655_v17  ;;  %2394 = vmatpush.bf16.msrb.mxu3 %v5153_v3  ;;  %2357 = vmatpush.bf16.msrb.mxu0 %v5175_v16  ;;  %v2007_v4 = vpop.f32.mrf.mxu3  ;;  %v5343_v10 = vpop.f32.mrf.mxu0 }
 0x5c6   :  { %v1664_v7 = vsel %vm1661_vm15, %v1663_v60, %v1659_v49 }
 0x5c7   :  { %v5353_v23 = vpop.f32.mrf.mxu1 }
 0x5c8   :  { %2381 = vmatpush.bf16.msrb.mxu2 %v5170_v11  ;;  %2370 = vmatpush.bf16.msrb.mxu1 %v5181_v58  ;;  %v5355_v5 = vpop.f32.mrf.mxu2 }
 0x5c9   :  { %2395 = vmatpush.bf16.msrb.mxu3 %v5167_v57  ;;  %2358 = vmatpush.bf16.msrb.mxu0 %v5191_v32  ;;  %5708 = vst [vmem:[#allocation11_spill] sm:$0xff] %v5355_v5 }
 0x5cb   :  { %v4139_v1 = vpop.eup %4138 }
 0x5cc   :  { %v1670_v13 = vmul.f32 %v4139_v1, %v1664_v7  ;;  %2382 = vmatpush.bf16.msrb.mxu2 %v5187_v59  ;;  %2371 = vmatpush.bf16.msrb.mxu1 %v5195_v35 }
 0x5cd   :  { %2396 = vmatpush.bf16.msrb.mxu3 %v5183_v47  ;;  %2359 = vmatpush.bf16.msrb.mxu0 %v5209_v25  ;;  %v5349_v42 = vpop.f32.mrf.mxu3  ;;  %v5351_v9 = vpop.f32.mrf.mxu0 }
 0x5ce   :  { %1673 = vst [vmem:[%s5664_s8] sm:$0xff] %v1670_v13  ;;  %v1750_v0 = vpack.c.bf16 %v1670_v13, %v5116_v30 }
 0x5cf   :  { %v5361_v48 = vpop.f32.mrf.mxu1 }
 0x5d0   :  { %1934 = vmatmul.bf16.gmra.mxu0 %v1750_v0  ;;  %1963 = vmatmul.bf16.gmra.mxu1 %v1750_v0  ;;  %5710 = vst [vmem:[#allocation14_spill] sm:$0xff] %v5361_v48  ;;  %v5363_v46 = vpop.f32.mrf.mxu2 }
 0x5d1   :  { %1992 = vmatmul.bf16.gmra.mxu2 %v1750_v0  ;;  %2021 = vmatmul.bf16.gmra.mxu3 %v1750_v0  ;;  %5711 = vst [vmem:[#allocation13_spill] sm:$0xff] %v5363_v46 }
 0x5d2   :  { %2383 = vmatpush.bf16.msrb.mxu2 %v5200_v8  ;;  %2397 = vmatpush.bf16.msrb.mxu3 %v5197_v44 }
 0x5d3   :  { %2372 = vmatpush.bf16.msrb.mxu1 %v5218_v14  ;;  %2360 = vmatpush.bf16.msrb.mxu0 %v5231_v53 }
 0x5d5   :  { %v3696_v30 = vld [vmem:[%s5657_s1 + $0x8] sm:$0xff]  ;;  %v5357_v19 = vpop.f32.mrf.mxu3  ;;  %v5359_v62 = vpop.f32.mrf.mxu0 }
 0x5d6   :  { %2384 = vmatpush.bf16.msrb.mxu2 %v5224_v39  ;;  %2398 = vmatpush.bf16.msrb.mxu3 %v5226_v50  ;;  %v2067_v20 = vpack.c.bf16 %v3696_v30, %v3696_v30  ;;  %5709 = vst [vmem:[#allocation12_spill] sm:$0xff] %v5359_v62 }
 0x5d7   :  { %2373 = vmatpush.bf16.msrb.mxu1 %v5241_v33  ;;  %v5369_v12 = vpop.f32.mrf.mxu1 }
 0x5d8   :  { %5714 = vst [vmem:[#allocation18_spill] sm:$0xff] %v5369_v12  ;;  %v5371_v40 = vpop.f32.mrf.mxu2 }
 0x5d9   :  { %5715 = vst [vmem:[#allocation17_spill] sm:$0xff] %v5371_v40 }
 0x5da   :  { %2385 = vmatpush.bf16.msrb.mxu2 %v5243_v34  ;;  %2399 = vmatpush.bf16.msrb.mxu3 %v5247_v6 }
 0x5dd   :  { %v5365_v28 = vpop.f32.mrf.mxu3  ;;  %v5367_v63 = vpop.f32.mrf.mxu0 }
 0x5de   :  { %2386 = vmatpush.bf16.msrb.mxu2 %v5262_v31  ;;  %5712 = vst [vmem:[#allocation15_spill] sm:$0xff] %v5365_v28 }
 0x5df   :  { %5713 = vst [vmem:[#allocation16_spill] sm:$0xff] %v5367_v63  ;;  %v5377_v17 = vpop.f32.mrf.mxu1 }
 0x5e0   :  { %2236 = vmatmul.bf16.vlgmr.msra.gmra.mxu0 %v2067_v20  ;;  %2249 = vmatmul.bf16.vlgmr.msra.gmra.mxu1 %v2067_v20  ;;  %5718 = vst [vmem:[#allocation22_spill] sm:$0xff] %v5377_v17  ;;  %v5379_v41 = vpop.f32.mrf.mxu2 }
 0x5e1   :  { %2262 = vmatmul.bf16.vlgmr.msra.gmra.mxu2 %v2067_v20  ;;  %2275 = vmatmul.bf16.vlgmr.msra.gmra.mxu3 %v2067_v20  ;;  %5719 = vst [vmem:[#allocation21_spill] sm:$0xff] %v5379_v41 }
 0x5e2   :  { %2478 = vmatpush.bf16.msra.mxu0 %v5122_v18  ;;  %2491 = vmatpush.bf16.msra.mxu1 %v5124_v29 }
 0x5e3   :  { %2504 = vmatpush.bf16.msra.mxu2 %v5135_v54  ;;  %2517 = vmatpush.bf16.msra.mxu3 %v5132_v56 }
 0x5e5   :  { %v5373_v15 = vpop.f32.mrf.mxu3  ;;  %v5375_v37 = vpop.f32.mrf.mxu0 }
 0x5e6   :  { %2479 = vmatpush.bf16.msra.mxu0 %v5140_v61  ;;  %2492 = vmatpush.bf16.msra.mxu1 %v5142_v22  ;;  %5716 = vst [vmem:[#allocation19_spill] sm:$0xff] %v5373_v15 }
 0x5e7   :  { %2505 = vmatpush.bf16.msra.mxu2 %v5157_v45  ;;  %2518 = vmatpush.bf16.msra.mxu3 %v5144_v26  ;;  %5717 = vst [vmem:[#allocation20_spill] sm:$0xff] %v5375_v37 }
 0x5ea   :  { %2480 = vmatpush.bf16.msra.mxu0 %v5149_v43  ;;  %2493 = vmatpush.bf16.msra.mxu1 %v5151_v2 }
 0x5eb   :  { %2506 = vmatpush.bf16.msra.mxu2 %v5170_v11  ;;  %2519 = vmatpush.bf16.msra.mxu3 %v5153_v3 }
 0x5ed   :  { %v5381_v38 = vpop.f32.mrf.mxu3 }
 0x5ee   :  { %2481 = vmatpush.bf16.msra.mxu0 %v5161_v24  ;;  %2494 = vmatpush.bf16.msra.mxu1 %v5165_v55  ;;  %5720 = vst [vmem:[#allocation23_spill] sm:$0xff] %v5381_v38 }
 0x5ef   :  { %2507 = vmatpush.bf16.msra.mxu2 %v5187_v59  ;;  %2520 = vmatpush.bf16.msra.mxu3 %v5167_v57 }
 0x5f2   :  { %2482 = vmatpush.bf16.msra.mxu0 %v5175_v16  ;;  %2495 = vmatpush.bf16.msra.mxu1 %v5181_v58 }
 0x5f3   :  { %2508 = vmatpush.bf16.msra.mxu2 %v5200_v8  ;;  %2521 = vmatpush.bf16.msra.mxu3 %v5183_v47 }
 0x5f6   :  { %2483 = vmatpush.bf16.msra.mxu0 %v5191_v32  ;;  %2496 = vmatpush.bf16.msra.mxu1 %v5195_v35 }
 0x5f7   :  { %2509 = vmatpush.bf16.msra.mxu2 %v5224_v39  ;;  %2522 = vmatpush.bf16.msra.mxu3 %v5197_v44 }
 0x5fa   :  { %2484 = vmatpush.bf16.msra.mxu0 %v5209_v25  ;;  %2497 = vmatpush.bf16.msra.mxu1 %v5218_v14 }
 0x5fb   :  { %2510 = vmatpush.bf16.msra.mxu2 %v5243_v34  ;;  %2523 = vmatpush.bf16.msra.mxu3 %v5226_v50 }
 0x5fe   :  { %2485 = vmatpush.bf16.msra.mxu0 %v5231_v53  ;;  %2498 = vmatpush.bf16.msra.mxu1 %v5241_v33 }
 0x5ff   :  { %2511 = vmatpush.bf16.msra.mxu2 %v5262_v31  ;;  %2524 = vmatpush.bf16.msra.mxu3 %v5247_v6 }
 0x64d   :  { %v5383_v49 = vpop.f32.mrf.mxu0  ;;  %v5385_v60 = vpop.f32.mrf.mxu1 }
 0x64e   :  { %5721 = vst [vmem:[#allocation24_spill] sm:$0xff] %v5383_v49 }
 0x64f   :  { %5722 = vst [vmem:[#allocation26_spill] sm:$0xff] %v5385_v60 }
 0x654   :  { %v5387_v1 = vpop.f32.mrf.mxu2  ;;  %v5389_v7 = vpop.f32.mrf.mxu3 }
 0x655   :  { %5723 = vst [vmem:[#allocation25_spill] sm:$0xff] %v5387_v1  ;;  %v5391_v13 = vpop.f32.mrf.mxu0  ;;  %v5393_v0 = vpop.f32.mrf.mxu1 }
 0x656   :  { %5724 = vst [vmem:[#allocation27_spill] sm:$0xff] %v5389_v7 }
 0x657   :  { %5725 = vst [vmem:[#allocation28_spill] sm:$0xff] %v5391_v13 }
 0x658   :  { %5726 = vst [vmem:[#allocation30_spill] sm:$0xff] %v5393_v0 }
 0x65c   :  { %v5395_v30 = vpop.f32.mrf.mxu2  ;;  %v5397_v20 = vpop.f32.mrf.mxu3 }
 0x65d   :  { %5727 = vst [vmem:[#allocation29_spill] sm:$0xff] %v5395_v30  ;;  %v2237_v17 = vpop.f32.mrf.mxu0  ;;  %v2250_v41 = vpop.f32.mrf.mxu1 }
 0x65e   :  { %5728 = vst [vmem:[#allocation31_spill] sm:$0xff] %v5397_v20  ;;  %v2280_v37 = vadd.f32 %v2237_v17, %v1920_v21  ;;  %v2281_v38 = vadd.f32 %v2250_v41, %v1949_v51 }
 0x660   :  { %v3826_v40 = vmul.f32 -1.442695, %v2280_v37  ;;  %v3827_v49 = vmul.f32 -1.442695, %v2281_v38 }
 0x662   :  { %4140 = vpow2.f32 %v3826_v40 }
 0x663   :  { %4142 = vpow2.f32 %v3827_v49 }
 0x664   :  { %v2263_v60 = vpop.f32.mrf.mxu2  ;;  %v2276_v1 = vpop.f32.mrf.mxu3 }
 0x665   :  { %v2283_v15 = vadd.f32 %v2276_v1, %v2007_v4  ;;  %v2239_v7 = vpop.f32.mrf.mxu0  ;;  %v2252_v12 = vpop.f32.mrf.mxu1  ;;  %v2282_v40 = vadd.f32 %v2263_v60, %v1978_v52 }
 0x667   :  { %v3828_v13 = vmul.f32 -1.442695, %v2283_v15 }
 0x668   :  { %v4141_v63 = vpop.eup %4140 }
 0x669   :  { %v4143_v0 = vpop.eup %4142  ;;  %v2287_v46 = vadd.f32 1.0, %v4141_v63  ;;  %4144 = vpow2.f32 %v3828_v13 }
 0x66a   :  { %v2306_v30 = vadd.f32 1.0, %v4143_v0 }
 0x66b   :  { %4146 = vrcp.f32 %v2287_v46  ;;  %v2299_v15 = vand.u32 2147483648, %v2287_v46  ;;  %v2297_v7 = vand.u32 2147483647, %v2287_v46  ;;  %vm2293_vm2 = vweird.f32 %v2287_v46 }
 0x66c   :  { %4148 = vrcp.f32 %v2306_v30  ;;  %v2278_v20 = vpop.f32.mrf.mxu3  ;;  %v2265_v21 = vpop.f32.mrf.mxu2  ;;  %v2318_v1 = vand.u32 2147483648, %v2306_v30  ;;  %v2316_v0 = vand.u32 2147483647, %v2306_v30  ;;  %vm2312_vm3 = vweird.f32 %v2306_v30 }
 0x66d   :  { %v2300_v52 = vor.u32 1.1754944e-38, %v2299_v15  ;;  %vm2298_vm6 = vcmp.eq.f32.partialorder %v2297_v7, 8.507059e+37 }
 0x66e   :  { %vm2317_vm7 = vcmp.eq.f32.partialorder %v2316_v0, 8.507059e+37 }
 0x66f   :  { %v4145_v51 = vpop.eup %4144 }
 0x670   :  { %v2326_v37 = vadd.f32 1.0, %v4145_v51 }
 0x671   :  { %v4147_v17 = vpop.eup %4146 }
 0x672   :  { %v4149_v41 = vpop.eup %4148  ;;  %v2289_v38 = vmul.f32 %v4147_v17, %v2287_v46  ;;  %4150 = vrcp.f32 %v2326_v37  ;;  %vm2294_vm0 = vweird.f32 %v4147_v17  ;;  %vm2332_vm9 = vweird.f32 %v2326_v37 }
 0x673   :  { %v2308_v4 = vmul.f32 %v4149_v41, %v2306_v30  ;;  %4152 = vtanh.f32 %v2282_v40  ;;  %vm2313_vm1 = vweird.f32 %v4149_v41  ;;  %vm2295_vm4 = vmor %vm2293_vm2, %vm2294_vm0  ;;  %v3697_v40 = vld [vmem:[%s5658_s2 + $0x8] sm:$0xff]  ;;  %v2336_v5 = vand.u32 2147483647, %v2326_v37 }
 0x674   :  { %v2290_v49 = vsub.f32 1.0, %v2289_v38  ;;  %vm2314_vm5 = vmor %vm2312_vm3, %vm2313_vm1  ;;  %v2319_v38 = vor.u32 1.1754944e-38, %v2318_v1  ;;  %v2338_v1 = vand.u32 2147483648, %v2326_v37 }
 0x675   :  { %v2309_v12 = vsub.f32 1.0, %v2308_v4  ;;  %vm2337_vm11 = vcmp.eq.f32.partialorder %v2336_v5, 8.507059e+37 }
 0x676   :  { %v2291_v63 = vmul.f32 %v4147_v17, %v2290_v49  ;;  %v2339_v7 = vor.u32 1.1754944e-38, %v2338_v1 }
 0x677   :  { %v2310_v13 = vmul.f32 %v4149_v41, %v2309_v12 }
 0x678   :  { %v4151_v20 = vpop.eup %4150  ;;  %v2292_v21 = vadd.f32 %v4147_v17, %v2291_v63 }
 0x679   :  { %v2311_v60 = vadd.f32 %v4149_v41, %v2310_v13  ;;  %v2328_v51 = vmul.f32 %v4151_v20, %v2326_v37  ;;  %v4153_v49 = vpop.eup %4152  ;;  %vm2333_vm8 = vweird.f32 %v4151_v20 }
 0x67a   :  { %v2296_v4 = vsel %vm2295_vm4, %v4147_v17, %v2292_v21  ;;  %vm2334_vm10 = vmor %vm2332_vm9, %vm2333_vm8 }
 0x67b   :  { %v2301_v12 = vsel %vm2298_vm6, %v2300_v52, %v2296_v4  ;;  %v2315_v28 = vsel %vm2314_vm5, %v4149_v41, %v2311_v60  ;;  %v2329_v48 = vsub.f32 1.0, %v2328_v51 }
 0x67c   :  { %v2320_v63 = vsel %vm2317_vm7, %v2319_v38, %v2315_v28  ;;  %v2343_v46 = vmul.f32 %v4153_v49, %v2301_v12 }
 0x67d   :  { %v2342_v30 = vmul.f32 %v3697_v40, %v2320_v63  ;;  %v2330_v62 = vmul.f32 %v4151_v20, %v2329_v48 }
 0x67f   :  { %v5402_v15 = vadd.f32 %v2343_v46, %v2342_v30  ;;  %v2331_v13 = vadd.f32 %v4151_v20, %v2330_v62 }
 0x681   :  { %4154 = vtanh.f32 %v5402_v15  ;;  %v2335_v17 = vsel %vm2334_vm10, %v4151_v20, %v2331_v13 }
 0x682   :  { %v2340_v0 = vsel %vm2337_vm11, %v2339_v7, %v2335_v17 }
 0x687   :  { %v4155_v41 = vpop.eup %4154 }
 0x688   :  { %v5405_v21 = vmul.f32 %v4155_v41, %v2340_v0 }
 0x68a   :  { %v2352_v48 = vpack.c.bf16 %v5405_v21, %v5405_v21 }
 0x68c   :  { %2361 = vmatmul.bf16.vlgmr.msrb.gmra.mxu0 %v2352_v48  ;;  %2374 = vmatmul.bf16.vlgmr.msrb.gmra.mxu1 %v2352_v48 }
 0x68d   :  { %2387 = vmatmul.bf16.vlgmr.msrb.gmra.mxu2 %v2352_v48  ;;  %2400 = vmatmul.bf16.vlgmr.msrb.gmra.mxu3 %v2352_v48 }
 0x68e   :  { %2603 = vmatpush.bf16.msrb.mxu0 %v5122_v18  ;;  %2616 = vmatpush.bf16.msrb.mxu1 %v5124_v29 }
 0x68f   :  { %2629 = vmatpush.bf16.msrb.mxu2 %v5135_v54  ;;  %2642 = vmatpush.bf16.msrb.mxu3 %v5132_v56 }
 0x692   :  { %2604 = vmatpush.bf16.msrb.mxu0 %v5140_v61  ;;  %2617 = vmatpush.bf16.msrb.mxu1 %v5142_v22 }
 0x693   :  { %2630 = vmatpush.bf16.msrb.mxu2 %v5157_v45  ;;  %2643 = vmatpush.bf16.msrb.mxu3 %v5144_v26 }
 0x696   :  { %2605 = vmatpush.bf16.msrb.mxu0 %v5149_v43  ;;  %2618 = vmatpush.bf16.msrb.mxu1 %v5151_v2 }
 0x697   :  { %2631 = vmatpush.bf16.msrb.mxu2 %v5170_v11  ;;  %2644 = vmatpush.bf16.msrb.mxu3 %v5153_v3 }
 0x69a   :  { %2606 = vmatpush.bf16.msrb.mxu0 %v5161_v24  ;;  %2619 = vmatpush.bf16.msrb.mxu1 %v5165_v55 }
 0x69b   :  { %2632 = vmatpush.bf16.msrb.mxu2 %v5187_v59  ;;  %2645 = vmatpush.bf16.msrb.mxu3 %v5167_v57 }
 0x69e   :  { %2607 = vmatpush.bf16.msrb.mxu0 %v5175_v16  ;;  %2620 = vmatpush.bf16.msrb.mxu1 %v5181_v58 }
 0x69f   :  { %2633 = vmatpush.bf16.msrb.mxu2 %v5200_v8  ;;  %2646 = vmatpush.bf16.msrb.mxu3 %v5183_v47 }
 0x6a2   :  { %2608 = vmatpush.bf16.msrb.mxu0 %v5191_v32  ;;  %2621 = vmatpush.bf16.msrb.mxu1 %v5195_v35 }
 0x6a3   :  { %2634 = vmatpush.bf16.msrb.mxu2 %v5224_v39  ;;  %2647 = vmatpush.bf16.msrb.mxu3 %v5197_v44 }
 0x6a6   :  { %2609 = vmatpush.bf16.msrb.mxu0 %v5209_v25  ;;  %2622 = vmatpush.bf16.msrb.mxu1 %v5218_v14 }
 0x6a7   :  { %2635 = vmatpush.bf16.msrb.mxu2 %v5243_v34  ;;  %2648 = vmatpush.bf16.msrb.mxu3 %v5226_v50 }
 0x6aa   :  { %2610 = vmatpush.bf16.msrb.mxu0 %v5231_v53  ;;  %2623 = vmatpush.bf16.msrb.mxu1 %v5241_v33 }
 0x6ab   :  { %2636 = vmatpush.bf16.msrb.mxu2 %v5262_v31  ;;  %2649 = vmatpush.bf16.msrb.mxu3 %v5247_v6 }
 0x709   :  { %v2362_v5 = vpop.f32.mrf.mxu0  ;;  %v2375_v62 = vpop.f32.mrf.mxu1 }
 0x70a   :  { %v2405_v28 = vadd.f32 %v2362_v5, %v5343_v10  ;;  %v2406_v37 = vadd.f32 %v2375_v62, %v5345_v27 }
 0x70c   :  { %v3829_v20 = vmul.f32 -1.442695, %v2405_v28  ;;  %v3830_v52 = vmul.f32 -1.442695, %v2406_v37 }
 0x70e   :  { %4156 = vpow2.f32 %v3829_v20 }
 0x70f   :  { %4158 = vpow2.f32 %v3830_v52 }
 0x710   :  { %v2388_v60 = vpop.f32.mrf.mxu2  ;;  %v2401_v51 = vpop.f32.mrf.mxu3 }
 0x711   :  { %v2408_v38 = vadd.f32 %v2401_v51, %v5349_v42  ;;  %v2364_v40 = vpop.f32.mrf.mxu0  ;;  %v2377_v4 = vpop.f32.mrf.mxu1  ;;  %v2407_v7 = vadd.f32 %v2388_v60, %v5347_v36 }
 0x713   :  { %v3831_v49 = vmul.f32 -1.442695, %v2408_v38 }
 0x714   :  { %v4157_v12 = vpop.eup %4156 }
 0x715   :  { %v4159_v63 = vpop.eup %4158  ;;  %v2412_v46 = vadd.f32 1.0, %v4157_v12  ;;  %4160 = vpow2.f32 %v3831_v49 }
 0x716   :  { %v2431_v30 = vadd.f32 1.0, %v4159_v63 }
 0x717   :  { %4162 = vrcp.f32 %v2412_v46  ;;  %v2424_v62 = vand.u32 2147483648, %v2412_v46  ;;  %v2422_v20 = vand.u32 2147483647, %v2412_v46  ;;  %vm2418_vm14 = vweird.f32 %v2412_v46 }
 0x718   :  { %4164 = vrcp.f32 %v2431_v30  ;;  %v2390_v10 = vpop.f32.mrf.mxu2  ;;  %v2403_v27 = vpop.f32.mrf.mxu3  ;;  %v2443_v28 = vand.u32 2147483648, %v2431_v30  ;;  %v2441_v51 = vand.u32 2147483647, %v2431_v30  ;;  %vm2437_vm15 = vweird.f32 %v2431_v30 }
 0x719   :  { %v2425_v36 = vor.u32 1.1754944e-38, %v2424_v62  ;;  %vm2423_vm2 = vcmp.eq.f32.partialorder %v2422_v20, 8.507059e+37 }
 0x71a   :  { %v2444_v49 = vor.u32 1.1754944e-38, %v2443_v28  ;;  %vm2442_vm3 = vcmp.eq.f32.partialorder %v2441_v51, 8.507059e+37 }
 0x71b   :  { %v4161_v13 = vpop.eup %4160 }
 0x71c   :  { %v2451_v1 = vadd.f32 1.0, %v4161_v13 }
 0x71d   :  { %v4163_v17 = vpop.eup %4162 }
 0x71e   :  { %v4165_v41 = vpop.eup %4164  ;;  %v2414_v0 = vmul.f32 %v4163_v17, %v2412_v46  ;;  %4166 = vrcp.f32 %v2451_v1  ;;  %vm2419_vm12 = vweird.f32 %v4163_v17  ;;  %vm2457_vm5 = vweird.f32 %v2451_v1 }
 0x71f   :  { %v2433_v42 = vmul.f32 %v4165_v41, %v2431_v30  ;;  %4168 = vtanh.f32 %v2407_v7  ;;  %vm2438_vm13 = vweird.f32 %v4165_v41  ;;  %vm2420_vm0 = vmor %vm2418_vm14, %vm2419_vm12 }
 0x720   :  { %v2415_v48 = vsub.f32 1.0, %v2414_v0  ;;  %vm2439_vm1 = vmor %vm2437_vm15, %vm2438_vm13 }
 0x721   :  { %v2434_v5 = vsub.f32 1.0, %v2433_v42 }
 0x722   :  { %v2416_v37 = vmul.f32 %v4163_v17, %v2415_v48 }
 0x723   :  { %v2435_v52 = vmul.f32 %v4165_v41, %v2434_v5  ;;  %v2463_v5 = vand.u32 2147483648, %v2451_v1 }
 0x724   :  { %v4167_v38 = vpop.eup %4166  ;;  %v2417_v40 = vadd.f32 %v4163_v17, %v2416_v37 }
 0x725   :  { %v2436_v60 = vadd.f32 %v4165_v41, %v2435_v52  ;;  %v2453_v4 = vmul.f32 %v4167_v38, %v2451_v1  ;;  %v4169_v63 = vpop.eup %4168  ;;  %vm2458_vm4 = vweird.f32 %v4167_v38  ;;  %v2464_v28 = vor.u32 1.1754944e-38, %v2463_v5  ;;  %v5729_v5 = vld [vmem:[#allocation11_spill] sm:$0xff] }
 0x726   :  { %v2421_v12 = vsel %vm2420_vm0, %v4163_v17, %v2417_v40  ;;  %v2461_v17 = vand.u32 2147483647, %v2451_v1  ;;  %vm2459_vm6 = vmor %vm2457_vm5, %vm2458_vm4 }
 0x727   :  { %v2426_v10 = vsel %vm2423_vm2, %v2425_v36, %v2421_v12  ;;  %v2440_v27 = vsel %vm2439_vm1, %v4165_v41, %v2436_v60  ;;  %v2454_v13 = vsub.f32 1.0, %v2453_v4 }
 0x728   :  { %v2445_v7 = vsel %vm2442_vm3, %v2444_v49, %v2440_v27  ;;  %v2468_v0 = vmul.f32 %v4169_v63, %v2426_v10  ;;  %vm2462_vm7 = vcmp.eq.f32.partialorder %v2461_v17, 8.507059e+37 }
 0x729   :  { %v2467_v42 = vmul.f32 %v2445_v7, %v5402_v15  ;;  %v2455_v48 = vmul.f32 %v4167_v38, %v2454_v13 }
 0x72b   :  { %v5446_v46 = vadd.f32 %v2468_v0, %v2467_v42  ;;  %v2456_v30 = vadd.f32 %v4167_v38, %v2455_v48 }
 0x72d   :  { %4170 = vtanh.f32 %v5446_v46  ;;  %v2460_v62 = vsel %vm2459_vm6, %v4167_v38, %v2456_v30 }
 0x72e   :  { %v2465_v37 = vsel %vm2462_vm7, %v2464_v28, %v2460_v62 }
 0x733   :  { %v4171_v41 = vpop.eup %4170 }
 0x734   :  { %v2471_v20 = vmul.f32 %v4171_v41, %v2465_v37 }
 0x736   :  { %v2477_v52 = vpack.c.bf16 %v2471_v20, %v2471_v20  ;;  %v3987_v15 = vpack.c.bf16 %v2471_v20, %v5405_v21 }
 0x738   :  { %2486 = vmatmul.bf16.vlgmr.msra.gmra.mxu0 %v2477_v52  ;;  %3988 = vst [vmem:[%s5663_s7] sm:$0xff] %v3987_v15   ;;  %2499 = vmatmul.bf16.vlgmr.msra.gmra.mxu1 %v2477_v52 }
 0x739   :  { %2512 = vmatmul.bf16.vlgmr.msra.gmra.mxu2 %v2477_v52  ;;  %2525 = vmatmul.bf16.vlgmr.msra.gmra.mxu3 %v2477_v52 }
 0x73a   :  { %2728 = vmatpush.bf16.msra.mxu0 %v5122_v18  ;;  %2741 = vmatpush.bf16.msra.mxu1 %v5124_v29 }
 0x73b   :  { %2754 = vmatpush.bf16.msra.mxu2 %v5135_v54  ;;  %2767 = vmatpush.bf16.msra.mxu3 %v5132_v56 }
 0x73e   :  { %2729 = vmatpush.bf16.msra.mxu0 %v5140_v61  ;;  %2742 = vmatpush.bf16.msra.mxu1 %v5142_v22 }
 0x73f   :  { %2755 = vmatpush.bf16.msra.mxu2 %v5157_v45  ;;  %2768 = vmatpush.bf16.msra.mxu3 %v5144_v26 }
 0x742   :  { %2730 = vmatpush.bf16.msra.mxu0 %v5149_v43  ;;  %2743 = vmatpush.bf16.msra.mxu1 %v5151_v2 }
 0x743   :  { %2756 = vmatpush.bf16.msra.mxu2 %v5170_v11  ;;  %2769 = vmatpush.bf16.msra.mxu3 %v5153_v3 }
 0x746   :  { %2731 = vmatpush.bf16.msra.mxu0 %v5161_v24  ;;  %2744 = vmatpush.bf16.msra.mxu1 %v5165_v55 }
 0x747   :  { %2757 = vmatpush.bf16.msra.mxu2 %v5187_v59  ;;  %2770 = vmatpush.bf16.msra.mxu3 %v5167_v57 }
 0x74a   :  { %2732 = vmatpush.bf16.msra.mxu0 %v5175_v16  ;;  %2745 = vmatpush.bf16.msra.mxu1 %v5181_v58 }
 0x74b   :  { %2758 = vmatpush.bf16.msra.mxu2 %v5200_v8  ;;  %2771 = vmatpush.bf16.msra.mxu3 %v5183_v47 }
 0x74e   :  { %2733 = vmatpush.bf16.msra.mxu0 %v5191_v32  ;;  %2746 = vmatpush.bf16.msra.mxu1 %v5195_v35 }
 0x74f   :  { %2759 = vmatpush.bf16.msra.mxu2 %v5224_v39  ;;  %2772 = vmatpush.bf16.msra.mxu3 %v5197_v44 }
 0x752   :  { %2734 = vmatpush.bf16.msra.mxu0 %v5209_v25  ;;  %2747 = vmatpush.bf16.msra.mxu1 %v5218_v14 }
 0x753   :  { %2760 = vmatpush.bf16.msra.mxu2 %v5243_v34  ;;  %2773 = vmatpush.bf16.msra.mxu3 %v5226_v50 }
 0x756   :  { %2735 = vmatpush.bf16.msra.mxu0 %v5231_v53  ;;  %2748 = vmatpush.bf16.msra.mxu1 %v5241_v33 }
 0x757   :  { %2761 = vmatpush.bf16.msra.mxu2 %v5262_v31  ;;  %2774 = vmatpush.bf16.msra.mxu3 %v5247_v6 }
 0x7b5   :  { %v2487_v21 = vpop.f32.mrf.mxu0  ;;  %v2500_v1 = vpop.f32.mrf.mxu1 }
 0x7b6   :  { %v2530_v51 = vadd.f32 %v2487_v21, %v5351_v9  ;;  %v2531_v38 = vadd.f32 %v2500_v1, %v5353_v23 }
 0x7b8   :  { %v3832_v40 = vmul.f32 -1.442695, %v2530_v51  ;;  %v3833_v36 = vmul.f32 -1.442695, %v2531_v38 }
 0x7ba   :  { %4172 = vpow2.f32 %v3832_v40 }
 0x7bb   :  { %4174 = vpow2.f32 %v3833_v36 }
 0x7bc   :  { %v2513_v60 = vpop.f32.mrf.mxu2  ;;  %v2526_v4 = vpop.f32.mrf.mxu3 }
 0x7bd   :  { %v2533_v49 = vadd.f32 %v2526_v4, %v5357_v19  ;;  %v2489_v12 = vpop.f32.mrf.mxu0  ;;  %v2502_v63 = vpop.f32.mrf.mxu1  ;;  %v2532_v17 = vadd.f32 %v2513_v60, %v5729_v5 }
 0x7bf   :  { %v3834_v10 = vmul.f32 -1.442695, %v2533_v49 }
 0x7c0   :  { %v4173_v27 = vpop.eup %4172 }
 0x7c1   :  { %v4175_v13 = vpop.eup %4174  ;;  %v2537_v7 = vadd.f32 1.0, %v4173_v27  ;;  %4176 = vpow2.f32 %v3834_v10 }
 0x7c2   :  { %v2556_v0 = vadd.f32 1.0, %v4175_v13 }
 0x7c3   :  { %4178 = vrcp.f32 %v2537_v7  ;;  %v2549_v20 = vand.u32 2147483648, %v2537_v7  ;;  %v2547_v21 = vand.u32 2147483647, %v2537_v7  ;;  %vm2543_vm10 = vweird.f32 %v2537_v7 }
 0x7c4   :  { %4180 = vrcp.f32 %v2556_v0  ;;  %v2515_v9 = vpop.f32.mrf.mxu2  ;;  %v2528_v23 = vpop.f32.mrf.mxu3  ;;  %v2568_v52 = vand.u32 2147483648, %v2556_v0  ;;  %v2566_v51 = vand.u32 2147483647, %v2556_v0  ;;  %vm2562_vm11 = vweird.f32 %v2556_v0 }
 0x7c5   :  { %v2550_v36 = vor.u32 1.1754944e-38, %v2549_v20  ;;  %vm2548_vm14 = vcmp.eq.f32.partialorder %v2547_v21, 8.507059e+37  ;;  %v5731_v21 = vld [vmem:[#allocation14_spill] sm:$0xff] }
 0x7c6   :  { %v2569_v49 = vor.u32 1.1754944e-38, %v2568_v52  ;;  %vm2567_vm15 = vcmp.eq.f32.partialorder %v2566_v51, 8.507059e+37  ;;  %v5730_v52 = vld [vmem:[#allocation12_spill] sm:$0xff] }
 0x7c7   :  { %v4177_v42 = vpop.eup %4176 }
 0x7c8   :  { %v2576_v48 = vadd.f32 1.0, %v4177_v42 }
 0x7c9   :  { %v4179_v30 = vpop.eup %4178 }
 0x7ca   :  { %v4181_v62 = vpop.eup %4180  ;;  %v2539_v28 = vmul.f32 %v4179_v30, %v2537_v7  ;;  %4182 = vrcp.f32 %v2576_v48  ;;  %vm2544_vm8 = vweird.f32 %v4179_v30  ;;  %vm2582_vm1 = vweird.f32 %v2576_v48 }
 0x7cb   :  { %v2558_v19 = vmul.f32 %v4181_v62, %v2556_v0  ;;  %4184 = vtanh.f32 %v2532_v17  ;;  %vm2563_vm9 = vweird.f32 %v4181_v62  ;;  %vm2545_vm12 = vmor %vm2543_vm10, %vm2544_vm8  ;;  %v2588_v17 = vand.u32 2147483648, %v2576_v48 }
 0x7cc   :  { %v2540_v41 = vsub.f32 1.0, %v2539_v28  ;;  %vm2564_vm13 = vmor %vm2562_vm11, %vm2563_vm9 }
 0x7cd   :  { %v2559_v37 = vsub.f32 1.0, %v2558_v19  ;;  %v2589_v19 = vor.u32 1.1754944e-38, %v2588_v17 }
 0x7ce   :  { %v2541_v15 = vmul.f32 %v4179_v30, %v2540_v41 }
 0x7cf   :  { %v2560_v1 = vmul.f32 %v4181_v62, %v2559_v37 }
 0x7d0   :  { %v4183_v38 = vpop.eup %4182  ;;  %v2542_v40 = vadd.f32 %v4179_v30, %v2541_v15 }
 0x7d1   :  { %v2561_v60 = vadd.f32 %v4181_v62, %v2560_v1  ;;  %v2578_v4 = vmul.f32 %v4183_v38, %v2576_v48  ;;  %v4185_v63 = vpop.eup %4184  ;;  %vm2583_vm0 = vweird.f32 %v4183_v38 }
 0x7d2   :  { %v2546_v12 = vsel %vm2545_vm12, %v4179_v30, %v2542_v40  ;;  %v2586_v30 = vand.u32 2147483647, %v2576_v48  ;;  %vm2584_vm2 = vmor %vm2582_vm1, %vm2583_vm0 }
 0x7d3   :  { %v2551_v10 = vsel %vm2548_vm14, %v2550_v36, %v2546_v12  ;;  %v2565_v27 = vsel %vm2564_vm13, %v4181_v62, %v2561_v60  ;;  %v2579_v13 = vsub.f32 1.0, %v2578_v4  ;;  %v5732_v60 = vld [vmem:[#allocation15_spill] sm:$0xff] }
 0x7d4   :  { %v2570_v9 = vsel %vm2567_vm15, %v2569_v49, %v2565_v27  ;;  %v2593_v23 = vmul.f32 %v4185_v63, %v2551_v10  ;;  %vm2587_vm3 = vcmp.eq.f32.partialorder %v2586_v30, 8.507059e+37  ;;  %v5733_v30 = vld [vmem:[#allocation13_spill] sm:$0xff] }
 0x7d5   :  { %v2592_v42 = vmul.f32 %v2570_v9, %v5446_v46  ;;  %v2580_v5 = vmul.f32 %v4183_v38, %v2579_v13 }
 0x7d7   :  { %v5490_v7 = vadd.f32 %v2593_v23, %v2592_v42  ;;  %v2581_v0 = vadd.f32 %v4183_v38, %v2580_v5 }
 0x7d9   :  { %4186 = vtanh.f32 %v5490_v7  ;;  %v2585_v28 = vsel %vm2584_vm2, %v4183_v38, %v2581_v0 }
 0x7da   :  { %v2590_v41 = vsel %vm2587_vm3, %v2589_v19, %v2585_v28 }
 0x7df   :  { %v4187_v62 = vpop.eup %4186 }
 0x7e0   :  { %v5493_v37 = vmul.f32 %v4187_v62, %v2590_v41 }
 0x7e2   :  { %v2602_v46 = vpack.c.bf16 %v5493_v37, %v5493_v37 }
 0x7e4   :  { %2611 = vmatmul.bf16.vlgmr.msrb.gmra.mxu0 %v2602_v46  ;;  %2624 = vmatmul.bf16.vlgmr.msrb.gmra.mxu1 %v2602_v46 }
 0x7e5   :  { %2637 = vmatmul.bf16.vlgmr.msrb.gmra.mxu2 %v2602_v46  ;;  %2650 = vmatmul.bf16.vlgmr.msrb.gmra.mxu3 %v2602_v46 }
 0x7e6   :  { %2853 = vmatpush.bf16.msrb.mxu0 %v5122_v18  ;;  %2866 = vmatpush.bf16.msrb.mxu1 %v5124_v29 }
 0x7e7   :  { %2879 = vmatpush.bf16.msrb.mxu2 %v5135_v54  ;;  %2892 = vmatpush.bf16.msrb.mxu3 %v5132_v56 }
 0x7ea   :  { %2854 = vmatpush.bf16.msrb.mxu0 %v5140_v61  ;;  %2867 = vmatpush.bf16.msrb.mxu1 %v5142_v22 }
 0x7eb   :  { %2880 = vmatpush.bf16.msrb.mxu2 %v5157_v45  ;;  %2893 = vmatpush.bf16.msrb.mxu3 %v5144_v26 }
 0x7ee   :  { %2855 = vmatpush.bf16.msrb.mxu0 %v5149_v43  ;;  %2868 = vmatpush.bf16.msrb.mxu1 %v5151_v2 }
 0x7ef   :  { %2881 = vmatpush.bf16.msrb.mxu2 %v5170_v11  ;;  %2894 = vmatpush.bf16.msrb.mxu3 %v5153_v3 }
 0x7f2   :  { %2856 = vmatpush.bf16.msrb.mxu0 %v5161_v24  ;;  %2869 = vmatpush.bf16.msrb.mxu1 %v5165_v55 }
 0x7f3   :  { %2882 = vmatpush.bf16.msrb.mxu2 %v5187_v59  ;;  %2895 = vmatpush.bf16.msrb.mxu3 %v5167_v57 }
 0x7f6   :  { %2857 = vmatpush.bf16.msrb.mxu0 %v5175_v16  ;;  %2870 = vmatpush.bf16.msrb.mxu1 %v5181_v58 }
 0x7f7   :  { %2883 = vmatpush.bf16.msrb.mxu2 %v5200_v8  ;;  %2896 = vmatpush.bf16.msrb.mxu3 %v5183_v47 }
 0x7fa   :  { %2858 = vmatpush.bf16.msrb.mxu0 %v5191_v32  ;;  %2871 = vmatpush.bf16.msrb.mxu1 %v5195_v35 }
 0x7fb   :  { %2884 = vmatpush.bf16.msrb.mxu2 %v5224_v39  ;;  %2897 = vmatpush.bf16.msrb.mxu3 %v5197_v44 }
 0x7fe   :  { %2859 = vmatpush.bf16.msrb.mxu0 %v5209_v25  ;;  %2872 = vmatpush.bf16.msrb.mxu1 %v5218_v14 }
 0x7ff   :  { %2885 = vmatpush.bf16.msrb.mxu2 %v5243_v34  ;;  %2898 = vmatpush.bf16.msrb.mxu3 %v5226_v50 }
 0x802   :  { %2860 = vmatpush.bf16.msrb.mxu0 %v5231_v53  ;;  %2873 = vmatpush.bf16.msrb.mxu1 %v5241_v33 }
 0x803   :  { %2886 = vmatpush.bf16.msrb.mxu2 %v5262_v31  ;;  %2899 = vmatpush.bf16.msrb.mxu3 %v5247_v6 }
 0x861   :  { %v2612_v48 = vpop.f32.mrf.mxu0  ;;  %v2625_v20 = vpop.f32.mrf.mxu1 }
 0x862   :  { %v2655_v15 = vadd.f32 %v2612_v48, %v5730_v52  ;;  %v2656_v1 = vadd.f32 %v2625_v20, %v5731_v21 }
 0x864   :  { %v3835_v51 = vmul.f32 -1.442695, %v2655_v15  ;;  %v3836_v38 = vmul.f32 -1.442695, %v2656_v1 }
 0x866   :  { %4188 = vpow2.f32 %v3835_v51 }
 0x867   :  { %4190 = vpow2.f32 %v3836_v38 }
 0x868   :  { %v2638_v40 = vpop.f32.mrf.mxu2  ;;  %v2651_v36 = vpop.f32.mrf.mxu3 }
 0x869   :  { %v2658_v4 = vadd.f32 %v2651_v36, %v5732_v60  ;;  %v2614_v49 = vpop.f32.mrf.mxu0  ;;  %v2627_v12 = vpop.f32.mrf.mxu1  ;;  %v2657_v28 = vadd.f32 %v2638_v40, %v5733_v30 }
 0x86b   :  { %v3837_v63 = vmul.f32 -1.442695, %v2658_v4 }
 0x86c   :  { %v4189_v10 = vpop.eup %4188 }
 0x86d   :  { %v4191_v27 = vpop.eup %4190  ;;  %v2662_v13 = vadd.f32 1.0, %v4189_v10  ;;  %4192 = vpow2.f32 %v3837_v63 }
 0x86e   :  { %v2681_v9 = vadd.f32 1.0, %v4191_v27 }
 0x86f   :  { %4194 = vrcp.f32 %v2662_v13  ;;  %v2674_v20 = vand.u32 2147483648, %v2662_v13  ;;  %v2672_v21 = vand.u32 2147483647, %v2662_v13  ;;  %vm2668_vm6 = vweird.f32 %v2662_v13 }
 0x870   :  { %4196 = vrcp.f32 %v2681_v9  ;;  %v2640_v23 = vpop.f32.mrf.mxu2  ;;  %v2653_v42 = vpop.f32.mrf.mxu3  ;;  %v2693_v52 = vand.u32 2147483648, %v2681_v9  ;;  %v2691_v51 = vand.u32 2147483647, %v2681_v9  ;;  %vm2687_vm7 = vweird.f32 %v2681_v9 }
 0x871   :  { %v2675_v40 = vor.u32 1.1754944e-38, %v2674_v20  ;;  %vm2673_vm10 = vcmp.eq.f32.partialorder %v2672_v21, 8.507059e+37 }
 0x872   :  { %v2694_v49 = vor.u32 1.1754944e-38, %v2693_v52  ;;  %vm2692_vm11 = vcmp.eq.f32.partialorder %v2691_v51, 8.507059e+37 }
 0x873   :  { %v4193_v5 = vpop.eup %4192 }
 0x874   :  { %v2701_v0 = vadd.f32 1.0, %v4193_v5 }
 0x875   :  { %v4195_v17 = vpop.eup %4194 }
 0x876   :  { %v4197_v19 = vpop.eup %4196  ;;  %v2664_v62 = vmul.f32 %v4195_v17, %v2662_v13  ;;  %4198 = vrcp.f32 %v2701_v0  ;;  %vm2669_vm4 = vweird.f32 %v4195_v17  ;;  %vm2707_vm13 = vweird.f32 %v2701_v0 }
 0x877   :  { %v2683_v41 = vmul.f32 %v4197_v19, %v2681_v9  ;;  %4200 = vtanh.f32 %v2657_v28  ;;  %vm2688_vm5 = vweird.f32 %v4197_v19  ;;  %vm2670_vm8 = vmor %vm2668_vm6, %vm2669_vm4 }
 0x878   :  { %v2665_v46 = vsub.f32 1.0, %v2664_v62  ;;  %vm2689_vm9 = vmor %vm2687_vm7, %vm2688_vm5  ;;  %v2713_v62 = vand.u32 2147483648, %v2701_v0 }
 0x879   :  { %v2684_v48 = vsub.f32 1.0, %v2683_v41 }
 0x87a   :  { %v2666_v15 = vmul.f32 %v4195_v17, %v2665_v46  ;;  %v2714_v46 = vor.u32 1.1754944e-38, %v2713_v62 }
 0x87b   :  { %v2685_v1 = vmul.f32 %v4197_v19, %v2684_v48 }
 0x87c   :  { %v4199_v38 = vpop.eup %4198  ;;  %v2667_v36 = vadd.f32 %v4195_v17, %v2666_v15  ;;  %v5734_v15 = vld [vmem:[#allocation16_spill] sm:$0xff] }
 0x87d   :  { %v2686_v60 = vadd.f32 %v4197_v19, %v2685_v1  ;;  %v2703_v4 = vmul.f32 %v4199_v38, %v2701_v0  ;;  %v4201_v63 = vpop.eup %4200  ;;  %vm2708_vm12 = vweird.f32 %v4199_v38  ;;  %v5735_v1 = vld [vmem:[#allocation18_spill] sm:$0xff] }
 0x87e   :  { %v2671_v12 = vsel %vm2670_vm8, %v4195_v17, %v2667_v36  ;;  %v2711_v17 = vand.u32 2147483647, %v2701_v0  ;;  %vm2709_vm14 = vmor %vm2707_vm13, %vm2708_vm12 }
 0x87f   :  { %v2676_v10 = vsel %vm2673_vm10, %v2675_v40, %v2671_v12  ;;  %v2690_v27 = vsel %vm2689_vm9, %v4197_v19, %v2686_v60  ;;  %v2704_v23 = vsub.f32 1.0, %v2703_v4  ;;  %v5736_v4 = vld [vmem:[#allocation19_spill] sm:$0xff] }
 0x880   :  { %v2695_v42 = vsel %vm2692_vm11, %v2694_v49, %v2690_v27  ;;  %v2718_v5 = vmul.f32 %v4201_v63, %v2676_v10  ;;  %vm2712_vm15 = vcmp.eq.f32.partialorder %v2711_v17, 8.507059e+37 }
 0x881   :  { %v2717_v30 = vmul.f32 %v2695_v42, %v5490_v7  ;;  %v2705_v28 = vmul.f32 %v4199_v38, %v2704_v23 }
 0x883   :  { %v5534_v13 = vadd.f32 %v2718_v5, %v2717_v30  ;;  %v2706_v9 = vadd.f32 %v4199_v38, %v2705_v28 }
 0x885   :  { %4202 = vtanh.f32 %v5534_v13  ;;  %v2710_v41 = vsel %vm2709_vm14, %v4199_v38, %v2706_v9 }
 0x886   :  { %v2715_v48 = vsel %vm2712_vm15, %v2714_v46, %v2710_v41  ;;  %v5737_v41 = vld [vmem:[#allocation17_spill] sm:$0xff] }
 0x88b   :  { %v4203_v19 = vpop.eup %4202 }
 0x88c   :  { %v2721_v20 = vmul.f32 %v4203_v19, %v2715_v48 }
 0x88e   :  { %v2727_v52 = vpack.c.bf16 %v2721_v20, %v2721_v20  ;;  %v3992_v7 = vpack.c.bf16 %v2721_v20, %v5493_v37 }
 0x890   :  { %2736 = vmatmul.bf16.vlgmr.msra.gmra.mxu0 %v2727_v52  ;;  %4004 = vst [vmem:[%s5663_s7 + $0x8] sm:$0xff] %v3992_v7   ;;  %2749 = vmatmul.bf16.vlgmr.msra.gmra.mxu1 %v2727_v52 }
 0x891   :  { %2762 = vmatmul.bf16.vlgmr.msra.gmra.mxu2 %v2727_v52  ;;  %2775 = vmatmul.bf16.vlgmr.msra.gmra.mxu3 %v2727_v52 }
 0x892   :  { %2978 = vmatpush.bf16.msra.mxu0 %v5122_v18  ;;  %2991 = vmatpush.bf16.msra.mxu1 %v5124_v29 }
 0x893   :  { %3004 = vmatpush.bf16.msra.mxu2 %v5135_v54  ;;  %3017 = vmatpush.bf16.msra.mxu3 %v5132_v56 }
 0x896   :  { %2979 = vmatpush.bf16.msra.mxu0 %v5140_v61  ;;  %2992 = vmatpush.bf16.msra.mxu1 %v5142_v22 }
 0x897   :  { %3005 = vmatpush.bf16.msra.mxu2 %v5157_v45  ;;  %3018 = vmatpush.bf16.msra.mxu3 %v5144_v26 }
 0x89a   :  { %2980 = vmatpush.bf16.msra.mxu0 %v5149_v43  ;;  %2993 = vmatpush.bf16.msra.mxu1 %v5151_v2 }
 0x89b   :  { %3006 = vmatpush.bf16.msra.mxu2 %v5170_v11  ;;  %3019 = vmatpush.bf16.msra.mxu3 %v5153_v3 }
 0x89e   :  { %2981 = vmatpush.bf16.msra.mxu0 %v5161_v24  ;;  %2994 = vmatpush.bf16.msra.mxu1 %v5165_v55 }
 0x89f   :  { %3007 = vmatpush.bf16.msra.mxu2 %v5187_v59  ;;  %3020 = vmatpush.bf16.msra.mxu3 %v5167_v57 }
 0x8a2   :  { %2982 = vmatpush.bf16.msra.mxu0 %v5175_v16  ;;  %2995 = vmatpush.bf16.msra.mxu1 %v5181_v58 }
 0x8a3   :  { %3008 = vmatpush.bf16.msra.mxu2 %v5200_v8  ;;  %3021 = vmatpush.bf16.msra.mxu3 %v5183_v47 }
 0x8a6   :  { %2983 = vmatpush.bf16.msra.mxu0 %v5191_v32  ;;  %2996 = vmatpush.bf16.msra.mxu1 %v5195_v35 }
 0x8a7   :  { %3009 = vmatpush.bf16.msra.mxu2 %v5224_v39  ;;  %3022 = vmatpush.bf16.msra.mxu3 %v5197_v44 }
 0x8aa   :  { %2984 = vmatpush.bf16.msra.mxu0 %v5209_v25  ;;  %2997 = vmatpush.bf16.msra.mxu1 %v5218_v14 }
 0x8ab   :  { %3010 = vmatpush.bf16.msra.mxu2 %v5243_v34  ;;  %3023 = vmatpush.bf16.msra.mxu3 %v5226_v50 }
 0x8ae   :  { %2985 = vmatpush.bf16.msra.mxu0 %v5231_v53  ;;  %2998 = vmatpush.bf16.msra.mxu1 %v5241_v33 }
 0x8af   :  { %3011 = vmatpush.bf16.msra.mxu2 %v5262_v31  ;;  %3024 = vmatpush.bf16.msra.mxu3 %v5247_v6 }
 0x90d   :  { %v2737_v37 = vpop.f32.mrf.mxu0  ;;  %v2750_v0 = vpop.f32.mrf.mxu1 }
 0x90e   :  { %v2780_v21 = vadd.f32 %v2737_v37, %v5734_v15  ;;  %v2781_v51 = vadd.f32 %v2750_v0, %v5735_v1 }
 0x910   :  { %v3838_v38 = vmul.f32 -1.442695, %v2780_v21  ;;  %v3839_v36 = vmul.f32 -1.442695, %v2781_v51 }
 0x912   :  { %4204 = vpow2.f32 %v3838_v38 }
 0x913   :  { %4206 = vpow2.f32 %v3839_v36 }
 0x914   :  { %v2763_v40 = vpop.f32.mrf.mxu2  ;;  %v2776_v60 = vpop.f32.mrf.mxu3 }
 0x915   :  { %v2783_v49 = vadd.f32 %v2776_v60, %v5736_v4  ;;  %v2739_v12 = vpop.f32.mrf.mxu0  ;;  %v2752_v63 = vpop.f32.mrf.mxu1  ;;  %v2782_v46 = vadd.f32 %v2763_v40, %v5737_v41 }
 0x917   :  { %v3840_v10 = vmul.f32 -1.442695, %v2783_v49 }
 0x918   :  { %v4205_v27 = vpop.eup %4204 }
 0x919   :  { %v4207_v23 = vpop.eup %4206  ;;  %v2787_v42 = vadd.f32 1.0, %v4205_v27  ;;  %4208 = vpow2.f32 %v3840_v10 }
 0x91a   :  { %v2806_v5 = vadd.f32 1.0, %v4207_v23 }
 0x91b   :  { %4210 = vrcp.f32 %v2787_v42  ;;  %v2799_v37 = vand.u32 2147483648, %v2787_v42  ;;  %v2797_v21 = vand.u32 2147483647, %v2787_v42  ;;  %vm2793_vm2 = vweird.f32 %v2787_v42 }
 0x91c   :  { %4212 = vrcp.f32 %v2806_v5  ;;  %v2765_v30 = vpop.f32.mrf.mxu2  ;;  %v2778_v28 = vpop.f32.mrf.mxu3  ;;  %v2818_v0 = vand.u32 2147483648, %v2806_v5  ;;  %v2816_v51 = vand.u32 2147483647, %v2806_v5  ;;  %vm2812_vm3 = vweird.f32 %v2806_v5 }
 0x91d   :  { %v2800_v40 = vor.u32 1.1754944e-38, %v2799_v37  ;;  %vm2798_vm6 = vcmp.eq.f32.partialorder %v2797_v21, 8.507059e+37 }
 0x91e   :  { %v2819_v49 = vor.u32 1.1754944e-38, %v2818_v0  ;;  %vm2817_vm7 = vcmp.eq.f32.partialorder %v2816_v51, 8.507059e+37 }
 0x91f   :  { %v4209_v9 = vpop.eup %4208 }
 0x920   :  { %v2826_v62 = vadd.f32 1.0, %v4209_v9 }
 0x921   :  { %v4211_v17 = vpop.eup %4210 }
 0x922   :  { %v4213_v19 = vpop.eup %4212  ;;  %v2789_v48 = vmul.f32 %v4211_v17, %v2787_v42  ;;  %4214 = vrcp.f32 %v2826_v62  ;;  %vm2794_vm0 = vweird.f32 %v4211_v17  ;;  %vm2832_vm9 = vweird.f32 %v2826_v62 }
 0x923   :  { %v2808_v20 = vmul.f32 %v4213_v19, %v2806_v5  ;;  %4216 = vtanh.f32 %v2782_v46  ;;  %vm2813_vm1 = vweird.f32 %v4213_v19  ;;  %vm2795_vm4 = vmor %vm2793_vm2, %vm2794_vm0  ;;  %v2838_v46 = vand.u32 2147483648, %v2826_v62 }
 0x924   :  { %v2790_v52 = vsub.f32 1.0, %v2789_v48  ;;  %vm2814_vm5 = vmor %vm2812_vm3, %vm2813_vm1 }
 0x925   :  { %v2809_v7 = vsub.f32 1.0, %v2808_v20  ;;  %v2839_v20 = vor.u32 1.1754944e-38, %v2838_v46 }
 0x926   :  { %v2791_v15 = vmul.f32 %v4211_v17, %v2790_v52 }
 0x927   :  { %v2810_v1 = vmul.f32 %v4213_v19, %v2809_v7 }
 0x928   :  { %v4215_v38 = vpop.eup %4214  ;;  %v2792_v36 = vadd.f32 %v4211_v17, %v2791_v15 }
 0x929   :  { %v2811_v60 = vadd.f32 %v4213_v19, %v2810_v1  ;;  %v2828_v4 = vmul.f32 %v4215_v38, %v2826_v62  ;;  %v4217_v63 = vpop.eup %4216  ;;  %vm2833_vm8 = vweird.f32 %v4215_v38 }
 0x92a   :  { %v2796_v12 = vsel %vm2795_vm4, %v4211_v17, %v2792_v36  ;;  %v2836_v17 = vand.u32 2147483647, %v2826_v62  ;;  %vm2834_vm10 = vmor %vm2832_vm9, %vm2833_vm8 }
 0x92b   :  { %v2801_v10 = vsel %vm2798_vm6, %v2800_v40, %v2796_v12  ;;  %v2815_v27 = vsel %vm2814_vm5, %v4213_v19, %v2811_v60  ;;  %v2829_v23 = vsub.f32 1.0, %v2828_v4 }
 0x92c   :  { %v2820_v30 = vsel %vm2817_vm7, %v2819_v49, %v2815_v27  ;;  %v2843_v28 = vmul.f32 %v4217_v63, %v2801_v10  ;;  %vm2837_vm11 = vcmp.eq.f32.partialorder %v2836_v17, 8.507059e+37 }
 0x92d   :  { %v2842_v9 = vmul.f32 %v2820_v30, %v5534_v13  ;;  %v2830_v41 = vmul.f32 %v4215_v38, %v2829_v23 }
 0x92f   :  { %v5578_v42 = vadd.f32 %v2843_v28, %v2842_v9  ;;  %v2831_v5 = vadd.f32 %v4215_v38, %v2830_v41 }
 0x931   :  { %4218 = vtanh.f32 %v5578_v42  ;;  %v2835_v48 = vsel %vm2834_vm10, %v4215_v38, %v2831_v5 }
 0x932   :  { %v2840_v52 = vsel %vm2837_vm11, %v2839_v20, %v2835_v48 }
 0x937   :  { %v4219_v19 = vpop.eup %4218 }
 0x938   :  { %v5581_v7 = vmul.f32 %v4219_v19, %v2840_v52 }
 0x93a   :  { %v2852_v13 = vpack.c.bf16 %v5581_v7, %v5581_v7 }
 0x93c   :  { %2861 = vmatmul.bf16.vlgmr.msrb.gmra.mxu0 %v2852_v13  ;;  %2874 = vmatmul.bf16.vlgmr.msrb.gmra.mxu1 %v2852_v13 }
 0x93d   :  { %2887 = vmatmul.bf16.vlgmr.msrb.gmra.mxu2 %v2852_v13  ;;  %2900 = vmatmul.bf16.vlgmr.msrb.gmra.mxu3 %v2852_v13 }
 0x93e   :  { %3103 = vmatpush.bf16.msrb.mxu0 %v5122_v18  ;;  %3116 = vmatpush.bf16.msrb.mxu1 %v5124_v29 }
 0x93f   :  { %3129 = vmatpush.bf16.msrb.mxu2 %v5135_v54  ;;  %3142 = vmatpush.bf16.msrb.mxu3 %v5132_v56  ;;  %v5738_v56 = vld [vmem:[#allocation20_spill] sm:$0xff] }
 0x942   :  { %3104 = vmatpush.bf16.msrb.mxu0 %v5140_v61  ;;  %3117 = vmatpush.bf16.msrb.mxu1 %v5142_v22  ;;  %v5739_v61 = vld [vmem:[#allocation22_spill] sm:$0xff] }
 0x943   :  { %3130 = vmatpush.bf16.msrb.mxu2 %v5157_v45  ;;  %3143 = vmatpush.bf16.msrb.mxu3 %v5144_v26  ;;  %v5740_v45 = vld [vmem:[#allocation23_spill] sm:$0xff] }
 0x946   :  { %3105 = vmatpush.bf16.msrb.mxu0 %v5149_v43  ;;  %3118 = vmatpush.bf16.msrb.mxu1 %v5151_v2 }
 0x947   :  { %3131 = vmatpush.bf16.msrb.mxu2 %v5170_v11  ;;  %3144 = vmatpush.bf16.msrb.mxu3 %v5153_v3 }
 0x94a   :  { %3106 = vmatpush.bf16.msrb.mxu0 %v5161_v24  ;;  %3119 = vmatpush.bf16.msrb.mxu1 %v5165_v55 }
 0x94b   :  { %3132 = vmatpush.bf16.msrb.mxu2 %v5187_v59  ;;  %3145 = vmatpush.bf16.msrb.mxu3 %v5167_v57 }
 0x94e   :  { %3107 = vmatpush.bf16.msrb.mxu0 %v5175_v16  ;;  %3120 = vmatpush.bf16.msrb.mxu1 %v5181_v58 }
 0x94f   :  { %3133 = vmatpush.bf16.msrb.mxu2 %v5200_v8  ;;  %3146 = vmatpush.bf16.msrb.mxu3 %v5183_v47 }
 0x952   :  { %3108 = vmatpush.bf16.msrb.mxu0 %v5191_v32  ;;  %3121 = vmatpush.bf16.msrb.mxu1 %v5195_v35 }
 0x953   :  { %3134 = vmatpush.bf16.msrb.mxu2 %v5224_v39  ;;  %3147 = vmatpush.bf16.msrb.mxu3 %v5197_v44 }
 0x956   :  { %3109 = vmatpush.bf16.msrb.mxu0 %v5209_v25  ;;  %3122 = vmatpush.bf16.msrb.mxu1 %v5218_v14  ;;  %v5741_v14 = vld [vmem:[#allocation21_spill] sm:$0xff] }
 0x957   :  { %3135 = vmatpush.bf16.msrb.mxu2 %v5243_v34  ;;  %3148 = vmatpush.bf16.msrb.mxu3 %v5226_v50 }
 0x95a   :  { %3110 = vmatpush.bf16.msrb.mxu0 %v5231_v53  ;;  %3123 = vmatpush.bf16.msrb.mxu1 %v5241_v33 }
 0x95b   :  { %3136 = vmatpush.bf16.msrb.mxu2 %v5262_v31  ;;  %3149 = vmatpush.bf16.msrb.mxu3 %v5247_v6 }
 0x9b9   :  { %v2862_v18 = vpop.f32.mrf.mxu0  ;;  %v2875_v29 = vpop.f32.mrf.mxu1 }
 0x9ba   :  { %v2905_v54 = vadd.f32 %v2862_v18, %v5738_v56  ;;  %v2906_v22 = vadd.f32 %v2875_v29, %v5739_v61  ;;  %v5742_v56 = vld [vmem:[#allocation24_spill] sm:$0xff]  ;;  %v5743_v61 = vld [vmem:[#allocation26_spill] sm:$0xff] }
 0x9bc   :  { %v3841_v26 = vmul.f32 -1.442695, %v2905_v54  ;;  %v3842_v43 = vmul.f32 -1.442695, %v2906_v22 }
 0x9be   :  { %4220 = vpow2.f32 %v3841_v26 }
 0x9bf   :  { %4222 = vpow2.f32 %v3842_v43 }
 0x9c0   :  { %v2888_v2 = vpop.f32.mrf.mxu2  ;;  %v2901_v3 = vpop.f32.mrf.mxu3 }
 0x9c1   :  { %v2908_v24 = vadd.f32 %v2901_v3, %v5740_v45  ;;  %v2864_v55 = vpop.f32.mrf.mxu0  ;;  %v2877_v57 = vpop.f32.mrf.mxu1  ;;  %v2907_v39 = vadd.f32 %v2888_v2, %v5741_v14  ;;  %v5744_v3 = vld [vmem:[#allocation27_spill] sm:$0xff] }
 0x9c3   :  { %v3843_v11 = vmul.f32 -1.442695, %v2908_v24 }
 0x9c4   :  { %v4221_v16 = vpop.eup %4220 }
 0x9c5   :  { %v4223_v58 = vpop.eup %4222  ;;  %v2912_v47 = vadd.f32 1.0, %v4221_v16  ;;  %4224 = vpow2.f32 %v3843_v11 }
 0x9c6   :  { %v2931_v59 = vadd.f32 1.0, %v4223_v58 }
 0x9c7   :  { %4226 = vrcp.f32 %v2912_v47  ;;  %v2924_v31 = vand.u32 2147483648, %v2912_v47  ;;  %v2922_v0 = vand.u32 2147483647, %v2912_v47  ;;  %vm2918_vm14 = vweird.f32 %v2912_v47 }
 0x9c8   :  { %4228 = vrcp.f32 %v2931_v59  ;;  %v2890_v32 = vpop.f32.mrf.mxu2  ;;  %v2903_v35 = vpop.f32.mrf.mxu3  ;;  %v2943_v62 = vand.u32 2147483648, %v2931_v59  ;;  %v2941_v21 = vand.u32 2147483647, %v2931_v59  ;;  %vm2937_vm15 = vweird.f32 %v2931_v59 }
 0x9c9   :  { %v2925_v38 = vor.u32 1.1754944e-38, %v2924_v31  ;;  %vm2923_vm2 = vcmp.eq.f32.partialorder %v2922_v0, 8.507059e+37 }
 0x9ca   :  { %v2944_v60 = vor.u32 1.1754944e-38, %v2943_v62  ;;  %vm2942_vm3 = vcmp.eq.f32.partialorder %v2941_v21, 8.507059e+37 }
 0x9cb   :  { %v4225_v44 = vpop.eup %4224 }
 0x9cc   :  { %v2951_v8 = vadd.f32 1.0, %v4225_v44 }
 0x9cd   :  { %v4227_v25 = vpop.eup %4226 }
 0x9ce   :  { %v4229_v50 = vpop.eup %4228  ;;  %v2914_v53 = vmul.f32 %v4227_v25, %v2912_v47  ;;  %4230 = vrcp.f32 %v2951_v8  ;;  %vm2919_vm12 = vweird.f32 %v4227_v25  ;;  %v2963_v5 = vand.u32 2147483648, %v2951_v8 }
 0x9cf   :  { %v2933_v33 = vmul.f32 %v4229_v50, %v2931_v59  ;;  %4232 = vtanh.f32 %v2907_v39  ;;  %vm2938_vm13 = vweird.f32 %v4229_v50  ;;  %vm2920_vm0 = vmor %vm2918_vm14, %vm2919_vm12  ;;  %vm2957_vm5 = vweird.f32 %v2951_v8 }
 0x9d0   :  { %v2915_v34 = vsub.f32 1.0, %v2914_v53  ;;  %vm2939_vm1 = vmor %vm2937_vm15, %vm2938_vm13  ;;  %v2961_v46 = vand.u32 2147483647, %v2951_v8  ;;  %v2964_v48 = vor.u32 1.1754944e-38, %v2963_v5 }
 0x9d1   :  { %v2934_v6 = vsub.f32 1.0, %v2933_v33 }
 0x9d2   :  { %v2916_v37 = vmul.f32 %v4227_v25, %v2915_v34  ;;  %vm2962_vm7 = vcmp.eq.f32.partialorder %v2961_v46, 8.507059e+37 }
 0x9d3   :  { %v2935_v15 = vmul.f32 %v4229_v50, %v2934_v6 }
 0x9d4   :  { %v4231_v1 = vpop.eup %4230  ;;  %v2917_v51 = vadd.f32 %v4227_v25, %v2916_v37 }
 0x9d5   :  { %v2936_v36 = vadd.f32 %v4229_v50, %v2935_v15  ;;  %v2953_v40 = vmul.f32 %v4231_v1, %v2951_v8  ;;  %v4233_v49 = vpop.eup %4232  ;;  %vm2958_vm4 = vweird.f32 %v4231_v1 }
 0x9d6   :  { %v2921_v4 = vsel %vm2920_vm0, %v4227_v25, %v2917_v51  ;;  %vm2959_vm6 = vmor %vm2957_vm5, %vm2958_vm4  ;;  %v5745_v25 = vld [vmem:[#allocation25_spill] sm:$0xff] }
 0x9d7   :  { %v2926_v12 = vsel %vm2923_vm2, %v2925_v38, %v2921_v4  ;;  %v2940_v63 = vsel %vm2939_vm1, %v4229_v50, %v2936_v36  ;;  %v2954_v10 = vsub.f32 1.0, %v2953_v40 }
 0x9d8   :  { %v2945_v27 = vsel %vm2942_vm3, %v2944_v60, %v2940_v63  ;;  %v2968_v23 = vmul.f32 %v4233_v49, %v2926_v12 }
 0x9d9   :  { %v2967_v30 = vmul.f32 %v2945_v27, %v5578_v42  ;;  %v2955_v28 = vmul.f32 %v4231_v1, %v2954_v10 }
 0x9db   :  { %v5622_v9 = vadd.f32 %v2968_v23, %v2967_v30  ;;  %v2956_v41 = vadd.f32 %v4231_v1, %v2955_v28 }
 0x9dd   :  { %4234 = vtanh.f32 %v5622_v9  ;;  %v2960_v17 = vsel %vm2959_vm6, %v4231_v1, %v2956_v41 }
 0x9de   :  { %v2965_v19 = vsel %vm2962_vm7, %v2964_v48, %v2960_v17 }
 0x9e3   :  { %v4235_v20 = vpop.eup %4234 }
 0x9e4   :  { %v2971_v52 = vmul.f32 %v4235_v20, %v2965_v19 }
 0x9e6   :  { %v2977_v13 = vpack.c.bf16 %v2971_v52, %v2971_v52  ;;  %v3997_v42 = vpack.c.bf16 %v2971_v52, %v5581_v7 }
 0x9e8   :  { %2986 = vmatmul.bf16.vlgmr.msra.gmra.mxu0 %v2977_v13  ;;  %4005 = vst [vmem:[%s5663_s7 + $0x10] sm:$0xff] %v3997_v42   ;;  %2999 = vmatmul.bf16.vlgmr.msra.gmra.mxu1 %v2977_v13 }
 0x9e9   :  { %3012 = vmatmul.bf16.vlgmr.msra.gmra.mxu2 %v2977_v13  ;;  %3025 = vmatmul.bf16.vlgmr.msra.gmra.mxu3 %v2977_v13 }
 0xa65   :  { %v2987_v18 = vpop.f32.mrf.mxu0  ;;  %v3000_v29 = vpop.f32.mrf.mxu1 }
 0xa66   :  { %v3030_v54 = vadd.f32 %v2987_v18, %v5742_v56  ;;  %v3031_v22 = vadd.f32 %v3000_v29, %v5743_v61  ;;  %v5746_v18 = vld [vmem:[#allocation28_spill] sm:$0xff]  ;;  %v5747_v56 = vld [vmem:[#allocation30_spill] sm:$0xff] }
 0xa68   :  { %v3844_v26 = vmul.f32 -1.442695, %v3030_v54  ;;  %v3845_v43 = vmul.f32 -1.442695, %v3031_v22 }
 0xa6a   :  { %4236 = vpow2.f32 %v3844_v26 }
 0xa6b   :  { %4238 = vpow2.f32 %v3845_v43 }
 0xa6c   :  { %v3013_v2 = vpop.f32.mrf.mxu2  ;;  %v3026_v7 = vpop.f32.mrf.mxu3 }
 0xa6d   :  { %v3033_v45 = vadd.f32 %v3026_v7, %v5744_v3  ;;  %v2989_v24 = vpop.f32.mrf.mxu0  ;;  %v3002_v55 = vpop.f32.mrf.mxu1  ;;  %v3032_v14 = vadd.f32 %v3013_v2, %v5745_v25  ;;  %v5748_v2 = vld [vmem:[#allocation31_spill] sm:$0xff] }
 0xa6f   :  { %v3846_v57 = vmul.f32 -1.442695, %v3033_v45 }
 0xa70   :  { %v4237_v11 = vpop.eup %4236 }
 0xa71   :  { %v4239_v16 = vpop.eup %4238  ;;  %v3037_v58 = vadd.f32 1.0, %v4237_v11  ;;  %4240 = vpow2.f32 %v3846_v57 }
 0xa72   :  { %v3056_v47 = vadd.f32 1.0, %v4239_v16 }
 0xa73   :  { %4242 = vrcp.f32 %v3037_v58  ;;  %v3049_v6 = vand.u32 2147483648, %v3037_v58  ;;  %v3047_v37 = vand.u32 2147483647, %v3037_v58  ;;  %vm3043_vm10 = vweird.f32 %v3037_v58 }
 0xa74   :  { %4244 = vrcp.f32 %v3056_v47  ;;  %v3015_v59 = vpop.f32.mrf.mxu2  ;;  %v3028_v32 = vpop.f32.mrf.mxu3  ;;  %v3068_v31 = vand.u32 2147483648, %v3056_v47  ;;  %v3066_v15 = vand.u32 2147483647, %v3056_v47  ;;  %vm3062_vm11 = vweird.f32 %v3056_v47 }
 0xa75   :  { %v3050_v51 = vor.u32 1.1754944e-38, %v3049_v6  ;;  %vm3048_vm14 = vcmp.eq.f32.partialorder %v3047_v37, 8.507059e+37 }
 0xa76   :  { %v3069_v40 = vor.u32 1.1754944e-38, %v3068_v31  ;;  %vm3067_vm15 = vcmp.eq.f32.partialorder %v3066_v15, 8.507059e+37 }
 0xa77   :  { %v4241_v35 = vpop.eup %4240 }
 0xa78   :  { %v3076_v44 = vadd.f32 1.0, %v4241_v35 }
 0xa79   :  { %v4243_v8 = vpop.eup %4242 }
 0xa7a   :  { %v4245_v39 = vpop.eup %4244  ;;  %v3039_v50 = vmul.f32 %v4243_v8, %v3037_v58  ;;  %4246 = vrcp.f32 %v3076_v44  ;;  %vm3044_vm8 = vweird.f32 %v4243_v8  ;;  %v3088_v5 = vand.u32 2147483648, %v3076_v44 }
 0xa7b   :  { %v3058_v53 = vmul.f32 %v4245_v39, %v3056_v47  ;;  %4248 = vtanh.f32 %v3032_v14  ;;  %vm3063_vm9 = vweird.f32 %v4245_v39  ;;  %vm3045_vm12 = vmor %vm3043_vm10, %vm3044_vm8  ;;  %vm3082_vm1 = vweird.f32 %v3076_v44 }
 0xa7c   :  { %v3040_v33 = vsub.f32 1.0, %v3039_v50  ;;  %vm3064_vm13 = vmor %vm3062_vm11, %vm3063_vm9  ;;  %v3086_v46 = vand.u32 2147483647, %v3076_v44  ;;  %v3089_v48 = vor.u32 1.1754944e-38, %v3088_v5 }
 0xa7d   :  { %v3059_v34 = vsub.f32 1.0, %v3058_v53 }
 0xa7e   :  { %v3041_v62 = vmul.f32 %v4243_v8, %v3040_v33  ;;  %vm3087_vm3 = vcmp.eq.f32.partialorder %v3086_v46, 8.507059e+37 }
 0xa7f   :  { %v3060_v0 = vmul.f32 %v4245_v39, %v3059_v34 }
 0xa80   :  { %v4247_v21 = vpop.eup %4246  ;;  %v3042_v1 = vadd.f32 %v4243_v8, %v3041_v62 }
 0xa81   :  { %v3061_v38 = vadd.f32 %v4245_v39, %v3060_v0  ;;  %v3078_v36 = vmul.f32 %v4247_v21, %v3076_v44  ;;  %v4249_v4 = vpop.eup %4248  ;;  %vm3083_vm0 = vweird.f32 %v4247_v21  ;;  %v5749_v44 = vld [vmem:[#allocation29_spill] sm:$0xff] }
 0xa82   :  { %v3046_v60 = vsel %vm3045_vm12, %v4243_v8, %v3042_v1  ;;  %vm3084_vm2 = vmor %vm3082_vm1, %vm3083_vm0 }
 0xa83   :  { %v3051_v49 = vsel %vm3048_vm14, %v3050_v51, %v3046_v60  ;;  %v3065_v12 = vsel %vm3064_vm13, %v4245_v39, %v3061_v38  ;;  %v3079_v63 = vsub.f32 1.0, %v3078_v36 }
 0xa84   :  { %v3070_v10 = vsel %vm3067_vm15, %v3069_v40, %v3065_v12  ;;  %v3093_v27 = vmul.f32 %v4249_v4, %v3051_v49 }
 0xa85   :  { %v3092_v23 = vmul.f32 %v3070_v10, %v5622_v9  ;;  %v3080_v30 = vmul.f32 %v4247_v21, %v3079_v63 }
 0xa87   :  { %v5634_v28 = vadd.f32 %v3093_v27, %v3092_v23  ;;  %v3081_v41 = vadd.f32 %v4247_v21, %v3080_v30 }
 0xa89   :  { %4250 = vtanh.f32 %v5634_v28  ;;  %v3085_v17 = vsel %vm3084_vm2, %v4247_v21, %v3081_v41 }
 0xa8a   :  { %v3090_v19 = vsel %vm3087_vm3, %v3089_v48, %v3085_v17 }
 0xa8f   :  { %v4251_v20 = vpop.eup %4250 }
 0xa90   :  { %v5637_v52 = vmul.f32 %v4251_v20, %v3090_v19 }
 0xa92   :  { %v3102_v9 = vpack.c.bf16 %v5637_v52, %v5637_v52 }
 0xa94   :  { %3111 = vmatmul.bf16.vlgmr.msrb.gmra.mxu0 %v3102_v9  ;;  %3124 = vmatmul.bf16.vlgmr.msrb.gmra.mxu1 %v3102_v9 }
 0xa95   :  { %3137 = vmatmul.bf16.vlgmr.msrb.gmra.mxu2 %v3102_v9  ;;  %3150 = vmatmul.bf16.vlgmr.msrb.gmra.mxu3 %v3102_v9 }
 0xb11   :  { %v3112_v13 = vpop.f32.mrf.mxu0  ;;  %v3125_v42 = vpop.f32.mrf.mxu1 }
 0xb12   :  { %v3155_v29 = vadd.f32 %v3112_v13, %v5746_v18  ;;  %v3156_v54 = vadd.f32 %v3125_v42, %v5747_v56 }
 0xb14   :  { %v3847_v61 = vmul.f32 -1.442695, %v3155_v29  ;;  %v3848_v22 = vmul.f32 -1.442695, %v3156_v54 }
 0xb16   :  { %4252 = vpow2.f32 %v3847_v61 }
 0xb17   :  { %4254 = vpow2.f32 %v3848_v22 }
 0xb18   :  { %v3138_v26 = vpop.f32.mrf.mxu2  ;;  %v3151_v43 = vpop.f32.mrf.mxu3 }
 0xb19   :  { %v3158_v7 = vadd.f32 %v3151_v43, %v5748_v2  ;;  %v3114_v3 = vpop.f32.mrf.mxu0  ;;  %v3127_v45 = vpop.f32.mrf.mxu1  ;;  %v3157_v8 = vadd.f32 %v3138_v26, %v5749_v44 }
 0xb1b   :  { %v3849_v24 = vmul.f32 -1.442695, %v3158_v7 }
 0xb1c   :  { %v4253_v55 = vpop.eup %4252 }
 0xb1d   :  { %v4255_v57 = vpop.eup %4254  ;;  %v3162_v11 = vadd.f32 1.0, %v4253_v55  ;;  %4256 = vpow2.f32 %v3849_v24 }
 0xb1e   :  { %v3181_v16 = vadd.f32 1.0, %v4255_v57 }
 0xb1f   :  { %4258 = vrcp.f32 %v3162_v11  ;;  %v3174_v33 = vand.u32 2147483648, %v3162_v11  ;;  %v3172_v31 = vand.u32 2147483647, %v3162_v11  ;;  %vm3168_vm6 = vweird.f32 %v3162_v11 }
 0xb20   :  { %4260 = vrcp.f32 %v3181_v16  ;;  %v3140_v58 = vpop.f32.mrf.mxu2  ;;  %v3153_v47 = vpop.f32.mrf.mxu3  ;;  %v3193_v34 = vand.u32 2147483648, %v3181_v16  ;;  %v3191_v37 = vand.u32 2147483647, %v3181_v16  ;;  %vm3187_vm7 = vweird.f32 %v3181_v16 }
 0xb21   :  { %v3175_v21 = vor.u32 1.1754944e-38, %v3174_v33  ;;  %vm3173_vm10 = vcmp.eq.f32.partialorder %v3172_v31, 8.507059e+37 }
 0xb22   :  { %v3194_v38 = vor.u32 1.1754944e-38, %v3193_v34  ;;  %vm3192_vm11 = vcmp.eq.f32.partialorder %v3191_v37, 8.507059e+37 }
 0xb23   :  { %v4257_v59 = vpop.eup %4256 }
 0xb24   :  { %v3201_v32 = vadd.f32 1.0, %v4257_v59 }
 0xb25   :  { %v4259_v35 = vpop.eup %4258 }
 0xb26   :  { %v4261_v25 = vpop.eup %4260  ;;  %v3164_v14 = vmul.f32 %v4259_v35, %v3162_v11  ;;  %4262 = vrcp.f32 %v3201_v32  ;;  %vm3169_vm4 = vweird.f32 %v4259_v35  ;;  %v3213_v41 = vand.u32 2147483648, %v3201_v32 }
 0xb27   :  { %v3183_v39 = vmul.f32 %v4261_v25, %v3181_v16  ;;  %4264 = vtanh.f32 %v3157_v8  ;;  %vm3188_vm5 = vweird.f32 %v4261_v25  ;;  %vm3170_vm8 = vmor %vm3168_vm6, %vm3169_vm4  ;;  %vm3207_vm13 = vweird.f32 %v3201_v32 }
 0xb28   :  { %v3165_v50 = vsub.f32 1.0, %v3164_v14  ;;  %vm3189_vm9 = vmor %vm3187_vm7, %vm3188_vm5  ;;  %v3211_v5 = vand.u32 2147483647, %v3201_v32  ;;  %v3214_v17 = vor.u32 1.1754944e-38, %v3213_v41 }
 0xb29   :  { %v3184_v53 = vsub.f32 1.0, %v3183_v39 }
 0xb2a   :  { %v3166_v6 = vmul.f32 %v4259_v35, %v3165_v50  ;;  %vm3212_vm15 = vcmp.eq.f32.partialorder %v3211_v5, 8.507059e+37 }
 0xb2b   :  { %v3185_v62 = vmul.f32 %v4261_v25, %v3184_v53 }
 0xb2c   :  { %v4263_v0 = vpop.eup %4262  ;;  %v3167_v15 = vadd.f32 %v4259_v35, %v3166_v6 }
 0xb2d   :  { %v3186_v1 = vadd.f32 %v4261_v25, %v3185_v62  ;;  %v3203_v51 = vmul.f32 %v4263_v0, %v3201_v32  ;;  %v4265_v40 = vpop.eup %4264  ;;  %vm3208_vm12 = vweird.f32 %v4263_v0 }
 0xb2e   :  { %v3171_v36 = vsel %vm3170_vm8, %v4259_v35, %v3167_v15  ;;  %vm3209_vm14 = vmor %vm3207_vm13, %vm3208_vm12 }
 0xb2f   :  { %v3176_v60 = vsel %vm3173_vm10, %v3175_v21, %v3171_v36  ;;  %v3190_v4 = vsel %vm3189_vm9, %v4261_v25, %v3186_v1  ;;  %v3204_v49 = vsub.f32 1.0, %v3203_v51 }
 0xb30   :  { %v3195_v12 = vsel %vm3192_vm11, %v3194_v38, %v3190_v4  ;;  %v3218_v63 = vmul.f32 %v4265_v40, %v3176_v60 }
 0xb31   :  { %v3217_v10 = vmul.f32 %v3195_v12, %v5634_v28  ;;  %v3205_v27 = vmul.f32 %v4263_v0, %v3204_v49 }
 0xb33   :  { %v3219_v23 = vadd.f32 %v3218_v63, %v3217_v10  ;;  %v3206_v30 = vadd.f32 %v4263_v0, %v3205_v27 }
 0xb35   :  { %4266 = vtanh.f32 %v3219_v23  ;;  %3851 = vst [vmem:[%s5665_s9 + $0x8] sm:$0xff] %v3219_v23  ;;  %v3210_v46 = vsel %vm3209_vm14, %v4263_v0, %v3206_v30 }
 0xb36   :  { %v3215_v20 = vsel %vm3212_vm15, %v3214_v17, %v3210_v46 }
 0xb3b   :  { %v4267_v48 = vpop.eup %4266 }
 0xb3c   :  { %v3221_v19 = vmul.f32 %v4267_v48, %v3215_v20 }
 0xb3e   :  { %3850 = vst [vmem:[%s5664_s8 + $0x8] sm:$0xff] %v3221_v19  ;;  %v4002_v28 = vpack.c.bf16 %v3221_v19, %v5637_v52 }
 0xb40   :  { %4006 = vst [vmem:[%s5663_s7 + $0x18] sm:$0xff] %v4002_v28  }
 0xb41   :  { %3263 = vsyncpa [#allocation5], 1 }
 0xb42   :  { %3264 = vsyncpa [#allocation7], 1 }

</bundles_post_ra>
